<compile_context>
chip_gen: v5e
topology: v5e:2x2
jax: 0.10.0
libtpu: 0.0.40
codegen_flags: <defaults>
</compile_context>

<pallas_src>
import functools

import jax
import jax.numpy as jnp
import numpy as np
from jax.experimental import pallas as pl
from jax.experimental.pallas import tpu as pltpu

LEAK = 0.1
BN_EPS = 1e-5
EXPANSION = 4


def _leaky(v):
    return jnp.where(v > 0, v, LEAK * v)


# ------------------------------ Pallas kernel ------------------------------ #

def bottleneck_kernel(x_ref, w1_ref, b1_ref, w2_ref, b2_ref, w3_ref, b3_ref,
                      o_ref, xcol_ref, *, W, PAD):
    """Fused Bottleneck forward for one image plane (H*W rows, channels=lanes)."""
    HW = x_ref.shape[0]
    P = w1_ref.shape[1]

    x = x_ref[...]                                        # (HW, Cin) bf16

    # ---- conv1 (1x1, BN folded into weights) + LeakyReLU ------------------ #
    h1 = jnp.dot(x, w1_ref[...], preferred_element_type=jnp.float32)
    y1 = _leaky(h1 + b1_ref[...])                         # (HW, P) f32

    # ---- stage y1 into the column-blocked (dx=-1,0,+1) bf16 scratch -------- #
    # Zero only the halo rows a tap may read but this step does not overwrite.
    zeros_halo = jnp.zeros((W + 1, 3 * P), jnp.bfloat16)
    xcol_ref[PAD - W:PAD + 1, :] = zeros_halo
    xcol_ref[PAD + HW - 1:PAD + HW + W, :] = zeros_halo

    # Edge masks generated in-kernel (no DMA'd mask arrays), applied ONCE at
    # the staging store rather than per tap.
    colmod = jax.lax.broadcasted_iota(jnp.int32, (HW, P), 0) % W
    y1_c = y1.astype(jnp.bfloat16)
    y1_l = jnp.where(colmod != (W - 1), y1, 0.0).astype(jnp.bfloat16)  # dx=-1 block
    y1_r = jnp.where(colmod != 0, y1, 0.0).astype(jnp.bfloat16)        # dx=+1 block

    # Invariant: xcol[PAD + q, b*P:(b+1)*P] == y1[q + (b - 1)], zeroed at the
    # image-row edges, so every 3x3 tap (dy, dx) is a plain shifted slice.
    xcol_ref[PAD:PAD + HW, P:2 * P] = y1_c
    xcol_ref[PAD + 1:PAD + 1 + HW, 0:P] = y1_l
    xcol_ref[PAD - 1:PAD - 1 + HW, 2 * P:3 * P] = y1_r

    # ---- conv2 (3x3, pad=1, BN folded): 3 matmuls with K = 3*P ------------- #
    acc = None
    for d in range(3):                                    # dy = d - 1
        start = PAD + (d - 1) * W
        tap = xcol_ref[start:start + HW, :]               # (HW, 3P) bf16
        part = jnp.dot(tap, w2_ref[d], preferred_element_type=jnp.float32)
        acc = part if acc is None else acc + part
    y2 = _leaky(acc + b2_ref[...])                        # (HW, P) f32

    # ---- conv3 (1x1, BN folded) + residual (resident x) + LeakyReLU -------- #
    h3 = jnp.dot(y2.astype(jnp.bfloat16), w3_ref[...],
                 preferred_element_type=jnp.float32)
    out = _leaky(h3 + b3_ref[...] + x.astype(jnp.float32))
    o_ref[...] = out.astype(o_ref.dtype)                  # bf16 writeback


# ------------------------------- JAX wrapper -------------------------------- #

def _fold_bn(gamma, beta, mean, var):
    s = gamma / jnp.sqrt(var + BN_EPS)
    b = beta - mean * s
    return s.reshape(1, -1).astype(jnp.float32), b.reshape(1, -1).astype(jnp.float32)


def bottleneck_forward(x_nchw, params):
    """Forward pass of Bottleneck (stride=1, downsample=None: module defaults)."""
    N, Cin, H, W = x_nchw.shape
    P = params["w1"].shape[0]           # planes
    Cout = params["w3"].shape[0]        # planes * expansion
    assert Cout == Cin, "downsample=None requires inplanes == planes * expansion"
    HW = H * W
    assert HW % 8 == 0, "H*W must be a multiple of 8 for the (8,128) block constraint"
    M = N * HW
    PAD = max(8, ((W + 7) // 8) * 8)    # sublane-aligned row halo >= W

    # NCHW -> NHWC -> (M, C) slab; bf16 activations feed the MXU directly.
    # (Residual therefore adds bf16-rounded x; pass f32 x for tighter accuracy.)
    x2d = jnp.transpose(x_nchw, (0, 2, 3, 1)).reshape(M, Cin).astype(jnp.bfloat16)

    # Fold BN scale into the conv weights (bf16); biases stay f32.
    s1, b1 = _fold_bn(params["g1"], params["be1"], params["m1"], params["v1"])
    s2, b2 = _fold_bn(params["g2"], params["be2"], params["m2"], params["v2"])
    s3, b3 = _fold_bn(params["g3"], params["be3"], params["m3"], params["v3"])

    w1m = (params["w1"][:, :, 0, 0].T.astype(jnp.float32) * s1).astype(jnp.bfloat16)
    # (O,I,3,3) -> (kh,kw,I,O), scale out channels, -> (3, 3P, P): row index inside
    # a dy block is kw*P + in_channel, matching the xcol column layout.
    w2t = jnp.transpose(params["w2"], (2, 3, 1, 0)).astype(jnp.float32)
    w2m = (w2t * s2.reshape(1, 1, 1, P)).reshape(3, 3 * P, P).astype(jnp.bfloat16)
    w3m = (params["w3"][:, :, 0, 0].T.astype(jnp.float32) * s3).astype(jnp.bfloat16)

    # VMEM budget derived from the actual shapes (double-buffered x/out/weights,
    # bf16 scratch, plus headroom for in-kernel f32 temporaries).
    need = (2 * HW * Cin * 2 + 2 * HW * Cout * 2
            + 2 * (Cin * P + 9 * P * P + P * Cout) * 2
            + (HW + 2 * PAD) * 3 * P * 2
            + 6 * HW * max(P, Cout) * 4)
    vmem_limit = int(min(max(need * 3 // 2 + (2 << 20), 16 << 20), 100 << 20))

    kernel = functools.partial(bottleneck_kernel, W=W, PAD=PAD)

    out2d = pl.pallas_call(
        kernel,
        out_shape=jax.ShapeDtypeStruct((M, Cout), jnp.bfloat16),
        grid=(N,),
        in_specs=[
            pl.BlockSpec((HW, Cin), lambda i: (i, 0)),        # x (one image plane)
            pl.BlockSpec((Cin, P), lambda i: (0, 0)),         # w1 (scale-folded)
            pl.BlockSpec((1, P), lambda i: (0, 0)),           # b1
            pl.BlockSpec((3, 3 * P, P), lambda i: (0, 0, 0)), # w2 (per-dy, K=3P)
            pl.BlockSpec((1, P), lambda i: (0, 0)),           # b2
            pl.BlockSpec((P, Cout), lambda i: (0, 0)),        # w3
            pl.BlockSpec((1, Cout), lambda i: (0, 0)),        # b3
        ],
        out_specs=pl.BlockSpec((HW, Cout), lambda i: (i, 0)),
        scratch_shapes=[pltpu.VMEM((HW + 2 * PAD, 3 * P), jnp.bfloat16)],
        compiler_params=pltpu.CompilerParams(
            dimension_semantics=("parallel",),
            vmem_limit_bytes=vmem_limit,
        ),
    )(x2d, w1m, b1, w2m, b2, w3m, b3)

    return jnp.transpose(out2d.reshape(N, H, W, Cout), (0, 3, 1, 2))


# ---------------------------- reference (pure JAX) --------------------------- #

def reference_forward(x, p):
    def conv(x, w, pad=0):
        return jax.lax.conv_general_dilated(
            x, w, (1, 1), [(pad, pad), (pad, pad)],
            dimension_numbers=("NCHW", "OIHW", "NCHW"),
            precision=jax.lax.Precision.HIGHEST)

    def bn(x, g, b, m, v):
        sh = (1, -1, 1, 1)
        return (x - m.reshape(sh)) / jnp.sqrt(v.reshape(sh) + BN_EPS) * g.reshape(sh) + b.reshape(sh)

    out = _leaky(bn(conv(x, p["w1"]), p["g1"], p["be1"], p["m1"], p["v1"]))
    out = _leaky(bn(conv(out, p["w2"], pad=1), p["g2"], p["be2"], p["m2"], p["v2"]))
    out = bn(conv(out, p["w3"]), p["g3"], p["be3"], p["m3"], p["v3"])
    return _leaky(out + x)


# --------------------------------- parameters -------------------------------- #

def init_params(key, inplanes, planes):
    ks = jax.random.split(key, 15)

    def nrm(k, shape, scale=0.1):
        return scale * jax.random.normal(k, shape, jnp.float32)

    def unif(k, shape):
        return jax.random.uniform(k, shape, jnp.float32, 0.5, 1.5)

    out3 = planes * EXPANSION
    return dict(
        w1=nrm(ks[0], (planes, inplanes, 1, 1)),
        g1=unif(ks[1], (planes,)), be1=nrm(ks[2], (planes,)),
        m1=nrm(ks[3], (planes,)), v1=unif(ks[4], (planes,)),
        w2=nrm(ks[5], (planes, planes, 3, 3)),
        g2=unif(ks[6], (planes,)), be2=nrm(ks[7], (planes,)),
        m2=nrm(ks[8], (planes,)), v2=unif(ks[9], (planes,)),
        w3=nrm(ks[10], (out3, planes, 1, 1)),
        g3=unif(ks[11], (out3,)), be3=nrm(ks[12], (out3,)),
        m3=nrm(ks[13], (out3,)), v3=unif(ks[14], (out3,)),
    )


if __name__ == "__main__":
    key = jax.random.PRNGKey(0)
    kx, kp = jax.random.split(key)

    # inplanes == planes * 4  (downsample=None requires it)
    N, inplanes, planes, H, W = 2, 32, 8, 16, 16
    x = jax.random.normal(kx, (N, inplanes, H, W), jnp.float32)
    params = init_params(kp, inplanes, planes)

    out = bottleneck_forward(x, params)
    out = jax.block_until_ready(out)

    ref = jax.block_until_ready(reference_forward(x, params))
    # bf16 MXU inputs / bf16 output (f32 accumulation) -> loose tolerance
    np.testing.assert_allclose(np.asarray(out, dtype=np.float32), np.asarray(ref),
                               rtol=3e-2, atol=3e-2)

    print("KERNEL_OK")
</pallas_src>

<mosaic_0001>
module attributes {stable_mosaic.version = 11 : i64} {
  func.func @bottleneck_kernel(%arg0: i32, %arg1: memref<256x32xbf16, #tpu.memory_space<vmem>>, %arg2: memref<32x8xbf16, #tpu.memory_space<vmem>>, %arg3: memref<1x8xf32, #tpu.memory_space<vmem>>, %arg4: memref<3x24x8xbf16, #tpu.memory_space<vmem>>, %arg5: memref<1x8xf32, #tpu.memory_space<vmem>>, %arg6: memref<8x32xbf16, #tpu.memory_space<vmem>>, %arg7: memref<1x32xf32, #tpu.memory_space<vmem>>, %arg8: memref<256x32xbf16, #tpu.memory_space<vmem>>, %arg9: memref<288x24xbf16, #tpu.memory_space<vmem>>) attributes {dimension_semantics = [#tpu.dimension_semantics<parallel>], iteration_bounds = array<i64: 2>, scalar_prefetch = 0 : i64, scratch_operands = 1 : i64, tpu.core_type = #tpu.core_type<tc>, window_params = [{transform_indices = @transform_0, window_bounds = array<i64: 256, 32>}, {pipeline_mode = #tpu.pipeline_mode<synchronous>, transform_indices = @transform_1, window_bounds = array<i64: 32, 8>}, {pipeline_mode = #tpu.pipeline_mode<synchronous>, transform_indices = @transform_2, window_bounds = array<i64: 1, 8>}, {pipeline_mode = #tpu.pipeline_mode<synchronous>, transform_indices = @transform_3, window_bounds = array<i64: 3, 24, 8>}, {pipeline_mode = #tpu.pipeline_mode<synchronous>, transform_indices = @transform_4, window_bounds = array<i64: 1, 8>}, {pipeline_mode = #tpu.pipeline_mode<synchronous>, transform_indices = @transform_5, window_bounds = array<i64: 8, 32>}, {pipeline_mode = #tpu.pipeline_mode<synchronous>, transform_indices = @transform_6, window_bounds = array<i64: 1, 32>}, {transform_indices = @transform_7, window_bounds = array<i64: 256, 32>}]} {
    %c0 = arith.constant 0 : index
    %c0_0 = arith.constant 0 : index
    %0 = vector.load %arg1[%c0, %c0_0] : memref<256x32xbf16, #tpu.memory_space<vmem>>, vector<256x32xbf16>
    %c0_1 = arith.constant 0 : index
    %c0_2 = arith.constant 0 : index
    %1 = vector.load %arg2[%c0_1, %c0_2] : memref<32x8xbf16, #tpu.memory_space<vmem>>, vector<32x8xbf16>
    %cst = arith.constant dense<0.000000e+00> : vector<256x8xf32>
    %2 = tpu.matmul %0, %1, %cst {dimension_numbers = #tpu.dot_dimension_numbers<[1], [0], [0], [1], [0, 0, 1, 1], [], []>} : vector<256x32xbf16>, vector<32x8xbf16>, vector<256x8xf32> -> vector<256x8xf32>
    %c0_3 = arith.constant 0 : index
    %c0_4 = arith.constant 0 : index
    %3 = vector.load %arg3[%c0_3, %c0_4] : memref<1x8xf32, #tpu.memory_space<vmem>>, vector<1x8xf32>
    %4 = vector.broadcast %3 : vector<1x8xf32> to vector<256x8xf32>
    %5 = arith.addf %2, %4 : vector<256x8xf32>
    %cst_5 = arith.constant 0.000000e+00 : f32
    %6 = vector.broadcast %cst_5 : f32 to vector<256x8xf32>
    %7 = arith.cmpf ogt, %5, %6 : vector<256x8xf32>
    %cst_6 = arith.constant 1.000000e-01 : f32
    %8 = vector.broadcast %cst_6 : f32 to vector<256x8xf32>
    %9 = arith.mulf %8, %5 : vector<256x8xf32>
    %10 = arith.select %7, %5, %9 : vector<256x8xi1>, vector<256x8xf32>
    %cst_7 = arith.constant 0.000000e+00 : bf16
    %11 = vector.broadcast %cst_7 : bf16 to vector<17x24xbf16>
    %c0_8 = arith.constant 0 : index
    %c0_9 = arith.constant 0 : index
    %12 = vector.load %arg9[%c0_8, %c0_9] : memref<288x24xbf16, #tpu.memory_space<vmem>>, vector<17x24xbf16>
    tpu.vector_store %arg9[%c0_8, %c0_9], %11 {strides = array<i32>} : memref<288x24xbf16, #tpu.memory_space<vmem>>, vector<17x24xbf16>,
    %c271 = arith.constant 271 : index
    %c0_10 = arith.constant 0 : index
    %13 = vector.load %arg9[%c271, %c0_10] : memref<288x24xbf16, #tpu.memory_space<vmem>>, vector<17x24xbf16>
    tpu.vector_store %arg9[%c271, %c0_10], %11 {strides = array<i32>} : memref<288x24xbf16, #tpu.memory_space<vmem>>, vector<17x24xbf16>,
    %14 = tpu.iota {dimensions = array<i32: 0>} : vector<256x8xi32>
    %c16_i32 = arith.constant 16 : i32
    %c0_i32 = arith.constant 0 : i32
    %15 = arith.cmpi eq, %c16_i32, %c0_i32 : i32
    %c1_i32 = arith.constant 1 : i32
    %16 = arith.select %15, %c1_i32, %c16_i32 : i32
    %17 = vector.broadcast %16 : i32 to vector<256x8xi32>
    %18 = arith.remsi %14, %17 : vector<256x8xi32>
    %c0_i32_11 = arith.constant 0 : i32
    %19 = vector.broadcast %c0_i32_11 : i32 to vector<256x8xi32>
    %20 = arith.cmpi ne, %18, %19 : vector<256x8xi32>
    %c0_i32_12 = arith.constant 0 : i32
    %21 = vector.broadcast %c0_i32_12 : i32 to vector<256x8xi32>
    %22 = arith.cmpi slt, %18, %21 : vector<256x8xi32>
    %c0_i32_13 = arith.constant 0 : i32
    %23 = arith.cmpi slt, %16, %c0_i32_13 : i32
    %24 = vector.broadcast %23 : i1 to vector<256x8xi1>
    %25 = vector.broadcast %24 : vector<256x8xi1> to vector<256x8xi1>
    %26 = arith.xori %22, %25 : vector<256x8xi1>
    %27 = arith.andi %26, %20 : vector<256x8xi1>
    %28 = vector.broadcast %16 : i32 to vector<256x8xi32>
    %29 = arith.addi %18, %28 : vector<256x8xi32>
    %30 = arith.select %27, %29, %18 : vector<256x8xi1>, vector<256x8xi32>
    %31 = arith.truncf %10 : vector<256x8xf32> to vector<256x8xbf16>
    %c15_i32 = arith.constant 15 : i32
    %32 = vector.broadcast %c15_i32 : i32 to vector<256x8xi32>
    %33 = arith.cmpi ne, %30, %32 : vector<256x8xi32>
    %cst_14 = arith.constant 0.000000e+00 : f32
    %34 = vector.broadcast %cst_14 : f32 to vector<256x8xf32>
    %35 = arith.select %33, %10, %34 : vector<256x8xi1>, vector<256x8xf32>
    %36 = arith.truncf %35 : vector<256x8xf32> to vector<256x8xbf16>
    %c0_i32_15 = arith.constant 0 : i32
    %37 = vector.broadcast %c0_i32_15 : i32 to vector<256x8xi32>
    %38 = arith.cmpi ne, %30, %37 : vector<256x8xi32>
    %cst_16 = arith.constant 0.000000e+00 : f32
    %39 = vector.broadcast %cst_16 : f32 to vector<256x8xf32>
    %40 = arith.select %38, %10, %39 : vector<256x8xi1>, vector<256x8xf32>
    %41 = arith.truncf %40 : vector<256x8xf32> to vector<256x8xbf16>
    %c16 = arith.constant 16 : index
    %c8 = arith.constant 8 : index
    %42 = vector.load %arg9[%c16, %c8] : memref<288x24xbf16, #tpu.memory_space<vmem>>, vector<256x8xbf16>
    tpu.vector_store %arg9[%c16, %c8], %31 {strides = array<i32>} : memref<288x24xbf16, #tpu.memory_space<vmem>>, vector<256x8xbf16>,
    %c17 = arith.constant 17 : index
    %c0_17 = arith.constant 0 : index
    %43 = vector.load %arg9[%c17, %c0_17] : memref<288x24xbf16, #tpu.memory_space<vmem>>, vector<256x8xbf16>
    tpu.vector_store %arg9[%c17, %c0_17], %36 {strides = array<i32>} : memref<288x24xbf16, #tpu.memory_space<vmem>>, vector<256x8xbf16>,
    %c15 = arith.constant 15 : index
    %c16_18 = arith.constant 16 : index
    %44 = vector.load %arg9[%c15, %c16_18] : memref<288x24xbf16, #tpu.memory_space<vmem>>, vector<256x8xbf16>
    tpu.vector_store %arg9[%c15, %c16_18], %41 {strides = array<i32>} : memref<288x24xbf16, #tpu.memory_space<vmem>>, vector<256x8xbf16>,
    %c0_19 = arith.constant 0 : index
    %c0_20 = arith.constant 0 : index
    %45 = vector.load %arg9[%c0_19, %c0_20] : memref<288x24xbf16, #tpu.memory_space<vmem>>, vector<256x24xbf16>
    %c0_21 = arith.constant 0 : index
    %c0_22 = arith.constant 0 : index
    %c0_23 = arith.constant 0 : index
    %46 = vector.load %arg4[%c0_21, %c0_22, %c0_23] : memref<3x24x8xbf16, #tpu.memory_space<vmem>>, vector<1x24x8xbf16>
    %47 = vector.shape_cast %46 : vector<1x24x8xbf16> to vector<24x8xbf16>
    %cst_24 = arith.constant dense<0.000000e+00> : vector<256x8xf32>
    %48 = tpu.matmul %45, %47, %cst_24 {dimension_numbers = #tpu.dot_dimension_numbers<[1], [0], [0], [1], [0, 0, 1, 1], [], []>} : vector<256x24xbf16>, vector<24x8xbf16>, vector<256x8xf32> -> vector<256x8xf32>
    %c16_25 = arith.constant 16 : index
    %c0_26 = arith.constant 0 : index
    %49 = vector.load %arg9[%c16_25, %c0_26] : memref<288x24xbf16, #tpu.memory_space<vmem>>, vector<256x24xbf16>
    %c1 = arith.constant 1 : index
    %c0_27 = arith.constant 0 : index
    %c0_28 = arith.constant 0 : index
    %50 = vector.load %arg4[%c1, %c0_27, %c0_28] : memref<3x24x8xbf16, #tpu.memory_space<vmem>>, vector<1x24x8xbf16>
    %51 = vector.shape_cast %50 : vector<1x24x8xbf16> to vector<24x8xbf16>
    %cst_29 = arith.constant dense<0.000000e+00> : vector<256x8xf32>
    %52 = tpu.matmul %49, %51, %cst_29 {dimension_numbers = #tpu.dot_dimension_numbers<[1], [0], [0], [1], [0, 0, 1, 1], [], []>} : vector<256x24xbf16>, vector<24x8xbf16>, vector<256x8xf32> -> vector<256x8xf32>
    %53 = arith.addf %48, %52 : vector<256x8xf32>
    %c32 = arith.constant 32 : index
    %c0_30 = arith.constant 0 : index
    %54 = vector.load %arg9[%c32, %c0_30] : memref<288x24xbf16, #tpu.memory_space<vmem>>, vector<256x24xbf16>
    %c2 = arith.constant 2 : index
    %c0_31 = arith.constant 0 : index
    %c0_32 = arith.constant 0 : index
    %55 = vector.load %arg4[%c2, %c0_31, %c0_32] : memref<3x24x8xbf16, #tpu.memory_space<vmem>>, vector<1x24x8xbf16>
    %56 = vector.shape_cast %55 : vector<1x24x8xbf16> to vector<24x8xbf16>
    %cst_33 = arith.constant dense<0.000000e+00> : vector<256x8xf32>
    %57 = tpu.matmul %54, %56, %cst_33 {dimension_numbers = #tpu.dot_dimension_numbers<[1], [0], [0], [1], [0, 0, 1, 1], [], []>} : vector<256x24xbf16>, vector<24x8xbf16>, vector<256x8xf32> -> vector<256x8xf32>
    %58 = arith.addf %53, %57 : vector<256x8xf32>
    %c0_34 = arith.constant 0 : index
    %c0_35 = arith.constant 0 : index
    %59 = vector.load %arg5[%c0_34, %c0_35] : memref<1x8xf32, #tpu.memory_space<vmem>>, vector<1x8xf32>
    %60 = vector.broadcast %59 : vector<1x8xf32> to vector<256x8xf32>
    %61 = arith.addf %58, %60 : vector<256x8xf32>
    %cst_36 = arith.constant 0.000000e+00 : f32
    %62 = vector.broadcast %cst_36 : f32 to vector<256x8xf32>
    %63 = arith.cmpf ogt, %61, %62 : vector<256x8xf32>
    %cst_37 = arith.constant 1.000000e-01 : f32
    %64 = vector.broadcast %cst_37 : f32 to vector<256x8xf32>
    %65 = arith.mulf %64, %61 : vector<256x8xf32>
    %66 = arith.select %63, %61, %65 : vector<256x8xi1>, vector<256x8xf32>
    %67 = arith.truncf %66 : vector<256x8xf32> to vector<256x8xbf16>
    %c0_38 = arith.constant 0 : index
    %c0_39 = arith.constant 0 : index
    %68 = vector.load %arg6[%c0_38, %c0_39] : memref<8x32xbf16, #tpu.memory_space<vmem>>, vector<8x32xbf16>
    %cst_40 = arith.constant dense<0.000000e+00> : vector<256x32xf32>
    %69 = tpu.matmul %67, %68, %cst_40 {dimension_numbers = #tpu.dot_dimension_numbers<[1], [0], [0], [1], [0, 0, 1, 1], [], []>} : vector<256x8xbf16>, vector<8x32xbf16>, vector<256x32xf32> -> vector<256x32xf32>
    %c0_41 = arith.constant 0 : index
    %c0_42 = arith.constant 0 : index
    %70 = vector.load %arg7[%c0_41, %c0_42] : memref<1x32xf32, #tpu.memory_space<vmem>>, vector<1x32xf32>
    %71 = vector.broadcast %70 : vector<1x32xf32> to vector<256x32xf32>
    %72 = arith.addf %69, %71 : vector<256x32xf32>
    %73 = arith.extf %0 : vector<256x32xbf16> to vector<256x32xf32>
    %74 = arith.addf %72, %73 : vector<256x32xf32>
    %cst_43 = arith.constant 0.000000e+00 : f32
    %75 = vector.broadcast %cst_43 : f32 to vector<256x32xf32>
    %76 = arith.cmpf ogt, %74, %75 : vector<256x32xf32>
    %cst_44 = arith.constant 1.000000e-01 : f32
    %77 = vector.broadcast %cst_44 : f32 to vector<256x32xf32>
    %78 = arith.mulf %77, %74 : vector<256x32xf32>
    %79 = arith.select %76, %74, %78 : vector<256x32xi1>, vector<256x32xf32>
    %80 = arith.truncf %79 : vector<256x32xf32> to vector<256x32xbf16>
    %c0_45 = arith.constant 0 : index
    %c0_46 = arith.constant 0 : index
    %81 = vector.load %arg8[%c0_45, %c0_46] : memref<256x32xbf16, #tpu.memory_space<vmem>>, vector<256x32xbf16>
    tpu.vector_store %arg8[%c0_45, %c0_46], %80 {strides = array<i32>} : memref<256x32xbf16, #tpu.memory_space<vmem>>, vector<256x32xbf16>,
    return
  }
  func.func @transform_0(%arg0: i32) -> (i32, i32) {
    %c0_i32 = arith.constant 0 : i32
    %c0_i32_0 = arith.constant 0 : i32
    return %arg0, %c0_i32 : i32, i32
  }
  func.func @transform_1(%arg0: i32) -> (i32, i32) {
    %c0_i32 = arith.constant 0 : i32
    %c0_i32_0 = arith.constant 0 : i32
    %c0_i32_1 = arith.constant 0 : i32
    return %c0_i32, %c0_i32_0 : i32, i32
  }
  func.func @transform_2(%arg0: i32) -> (i32, i32) {
    %c0_i32 = arith.constant 0 : i32
    %c0_i32_0 = arith.constant 0 : i32
    %c0_i32_1 = arith.constant 0 : i32
    return %c0_i32, %c0_i32_0 : i32, i32
  }
  func.func @transform_3(%arg0: i32) -> (i32, i32, i32) {
    %c0_i32 = arith.constant 0 : i32
    %c0_i32_0 = arith.constant 0 : i32
    %c0_i32_1 = arith.constant 0 : i32
    %c0_i32_2 = arith.constant 0 : i32
    return %c0_i32, %c0_i32_0, %c0_i32_1 : i32, i32, i32
  }
  func.func @transform_4(%arg0: i32) -> (i32, i32) {
    %c0_i32 = arith.constant 0 : i32
    %c0_i32_0 = arith.constant 0 : i32
    %c0_i32_1 = arith.constant 0 : i32
    return %c0_i32, %c0_i32_0 : i32, i32
  }
  func.func @transform_5(%arg0: i32) -> (i32, i32) {
    %c0_i32 = arith.constant 0 : i32
    %c0_i32_0 = arith.constant 0 : i32
    %c0_i32_1 = arith.constant 0 : i32
    return %c0_i32, %c0_i32_0 : i32, i32
  }
  func.func @transform_6(%arg0: i32) -> (i32, i32) {
    %c0_i32 = arith.constant 0 : i32
    %c0_i32_0 = arith.constant 0 : i32
    %c0_i32_1 = arith.constant 0 : i32
    return %c0_i32, %c0_i32_0 : i32, i32
  }
  func.func @transform_7(%arg0: i32) -> (i32, i32) {
    %c0_i32 = arith.constant 0 : i32
    %c0_i32_0 = arith.constant 0 : i32
    return %arg0, %c0_i32 : i32, i32
  }
}

</mosaic_0001>

<bundles_post_ra>
// kernel: tpu_custom_call.1
= control target key start
LH: loop header
LB: loop body
LE: loop exit
PB: predicated region body
PF: predicated region fallthrough
CT: control target
= control target key end

     0   :  { %s3988_s24 = smov 0   ;;  %s5460_s0 = inlined_call_operand.vmem [shape: bf16[512,32], index: 0, kind: input, shape index: {}]   ;;  %s5461_s1 = inlined_call_operand.vmem [shape: bf16[32,8], index: 1, kind: input, shape index: {}]   ;;  %s5462_s2 = inlined_call_operand.vmem [shape: f32[1,8], index: 2, kind: input, shape index: {}]   ;;  %s5463_s3 = inlined_call_operand.vmem [shape: bf16[3,24,8], index: 3, kind: input, shape index: {}]   ;;  %s5464_s4 = inlined_call_operand.vmem [shape: f32[1,8], index: 4, kind: input, shape index: {}]   ;;  %s5465_s5 = inlined_call_operand.vmem [shape: bf16[8,32], index: 5, kind: input, shape index: {}]   ;;  %s5466_s6 = inlined_call_operand.vmem [shape: f32[1,32], index: 6, kind: input, shape index: {}]   ;;  %s5467_s7 = inlined_call_operand.vmem [shape: bf16[512,32], index: 7, kind: output, shape index: {}]  }
   0x1 LB: > { %s3549_s25 = sadd.s32 4294967295, %s3943_s24   ;;  %p3553_p0 = scmp.ge.s32.totalorder %s3943_s24, 1  ;;  %s3943_s24 = sphi %s3988_s24, %s17_s24  }
   0x2   : > { %p238_p1 = scmp.lt.s32.totalorder %s3943_s24, 3 }
   0x4   : > { %p239_p2 = pnand %p3553_p0, %p238_p1 }
   0x6   : > { %242 = sbr.rel (%p239_p2) target bundleno = 846 (0x34e), region = 48 }
   0xb   : > { %v3879_v0 = vld [vmem:[%s5461_s1 + $0x8] sm:$0xff]  ;;  %s3554_s28 = sshll.u32 %s3549_s25, 5  ;;  %v3878_v1 = vld [vmem:[%s5461_s1] sm:$0xff]  ;;  %vm415_vm0 = vcmask 261120   ;;  %v666_v16 = vlaneseq  ;;  %s3945_s14 = smov 8  }
   0xc   : > { %p271_p3 = scmp.lt.s32.totalorder %s3554_s28, 63  ;;  %470 = vmatpush.bf16.msra.mxu0 %v3879_v0  ;;  %3916 = vmatpush.bf16.msra.mxu1 %v3879_v0  ;;  %v4046_v19 = vld [vmem:[%s5462_s2] ss:$0 sm:$0xff]  ;;  %s3946_s15 = smov 16   ;;  %vm1833_vm7 = vsmask.f32 3328 }
   0xd   : > { %3917 = vmatpush.bf16.msra.mxu2 %v3879_v0  ;;  %3918 = vmatpush.bf16.msra.mxu3 %v3879_v0  ;;  %v4040_v17 = vshrl.u32 %v666_v16, 7  ;;  %vm1834_vm8 = vsmask.f32 7440 }
   0xe   : > { %s5532_s28 = smov (!%p271_p3, %s3554_s28), 63  ;;  %vm4088_vm11 = vmor %vm1833_vm7, %vm1834_vm8 }
   0xf   : > { %s3555_s8 = sshll.u32 %s5532_s28, 2  ;;  %v703_v20 = vand.u32 15, %v4040_v17  ;;  %v669_v31 = vadd.s32 16, %v4040_v17  ;;  %v671_v52 = vadd.s32 32, %v4040_v17 }
  0x10   : > { %471 = vmatpush.bf16.msra.mxu0 %v3878_v1  ;;  %s4010_s11 = scalar_lea.vmem %s5460_s0, %s3555_s8  ;;  %3919 = vmatpush.bf16.msra.mxu1 %v3878_v1  ;;  %s5323_s19 = scalar_lea.vmem %s5467_s7, %s3555_s8 }
  0x11   : > { %v3862_v2 = vld [vmem:[%s4010_s11] sm:$0xff]  ;;  %3920 = vmatpush.bf16.msra.mxu2 %v3878_v1  ;;  %3921 = vmatpush.bf16.msra.mxu3 %v3878_v1  ;;  %v3863_v4 = vld [vmem:[%s4010_s11 + $0x8] sm:$0xff]  ;;  %v3864_v8 = vld [vmem:[%s4010_s11 + $0x10] sm:$0xff]  ;;  %vm1211_vm2 = vcmp.ne.s32.totalorder %v703_v20, 0  ;;  %v717_v36 = vand.u32 15, %v669_v31  ;;  %v731_v61 = vand.u32 15, %v671_v52 }
  0x12   : > { %v3866_v3 = vld [vmem:[%s4010_s11 + $0x20] sm:$0xff]  ;;  %v3867_v5 = vld [vmem:[%s4010_s11 + $0x28] sm:$0xff]  ;;  %v3868_v9 = vld [vmem:[%s4010_s11 + $0x30] sm:$0xff] }
  0x13   : > { %3630 = vmatmul.msk.bf16.vlgmr.msra.gmra.mxu0 %vm415_vm0, %v3862_v2  ;;  %3634 = vmatmul.msk.bf16.vlgmr.msra.gmra.mxu1 %vm415_vm0, %v3866_v3  ;;  %v3870_v6 = vld [vmem:[%s4010_s11 + $0x40] sm:$0xff]  ;;  %v3871_v10 = vld [vmem:[%s4010_s11 + $0x48] sm:$0xff]  ;;  %v3865_v11 = vld [vmem:[%s4010_s11 + $0x18] sm:$0xff]  ;;  %vm1213_vm5 = vcmp.ne.s32.totalorder %v717_v36, 0  ;;  %vm1215_vm9 = vcmp.ne.s32.totalorder %v731_v61, 0  ;;  %v670_v36 = vadd.s32 24, %v4040_v17 }
  0x14   : > { %3638 = vmatmul.msk.bf16.vlgmr.msra.gmra.mxu2 %vm415_vm0, %v3870_v6  ;;  %v3874_v7 = vld [vmem:[%s4010_s11 + $0x60] sm:$0xff]  ;;  %v3869_v12 = vld [vmem:[%s4010_s11 + $0x38] sm:$0xff]  ;;  %v3872_v13 = vld [vmem:[%s4010_s11 + $0x50] sm:$0xff] }
  0x15   : > { %3642 = vmatmul.msk.bf16.vlgmr.msra.gmra.mxu3 %vm415_vm0, %v3874_v7  ;;  %v3873_v14 = vld [vmem:[%s4010_s11 + $0x58] sm:$0xff]  ;;  %v3875_v15 = vld [vmem:[%s4010_s11 + $0x68] sm:$0xff]  ;;  %v3876_v18 = vld [vmem:[%s4010_s11 + $0x70] sm:$0xff] }
  0x16   : > { %v3877_v33 = vld [vmem:[%s4010_s11 + $0x78] sm:$0xff] }
  0x23   : > { %3631 = vmatmul.msk.bf16.gmra.mxu0 %vm415_vm0, %v3863_v4  ;;  %3635 = vmatmul.msk.bf16.gmra.mxu1 %vm415_vm0, %v3867_v5 }
  0x24   : > { %3639 = vmatmul.msk.bf16.gmra.mxu2 %vm415_vm0, %v3871_v10 }
  0x25   : > { %3643 = vmatmul.msk.bf16.gmra.mxu3 %vm415_vm0, %v3875_v15 }
  0x33   : > { %3632 = vmatmul.msk.bf16.gmra.mxu0 %vm415_vm0, %v3864_v8  ;;  %3636 = vmatmul.msk.bf16.gmra.mxu1 %vm415_vm0, %v3868_v9 }
  0x34   : > { %3640 = vmatmul.msk.bf16.gmra.mxu2 %vm415_vm0, %v3872_v13 }
  0x35   : > { %3644 = vmatmul.msk.bf16.gmra.mxu3 %vm415_vm0, %v3876_v18 }
  0x43   : > { %3633 = vmatmul.msk.bf16.gmra.mxu0 %vm415_vm0, %v3865_v11  ;;  %3637 = vmatmul.msk.bf16.gmra.mxu1 %vm415_vm0, %v3869_v12 }
  0x44   : > { %3641 = vmatmul.msk.bf16.gmra.mxu2 %vm415_vm0, %v3873_v14 }
  0x45   : > { %3645 = vmatmul.msk.bf16.gmra.mxu3 %vm415_vm0, %v3877_v33 }
  0x90   : > { %v473_v21 = vpop.f32.mrf.mxu0  ;;  %v4057_v32 = vpop.f32.mrf.mxu1 }
  0x91   : > { %v474_v22 = vadd.f32 %v4046_v19, %v473_v21 }
  0x93   : > { %vm553_vm1 = vcmp.gt.f32.partialorder %v474_v22, 0.0  ;;  %v585_v23 = vmul.f32 0.1, %v474_v22 }
  0x95   : > { %v617_v24 = vsel %vm553_vm1, %v474_v22, %v585_v23  ;;  %v668_v22 = vadd.s32 8, %v4040_v17 }
  0x96   : > { %v4051_v25 = vpack.c.bf16 %v617_v24, %v617_v24  ;;  %v1243_v26 = vsel %vm1211_vm2, %v617_v24, 0.0 }
  0x97   : > { %v1275_v27 = vpack.c.bf16 %v1243_v26, %v1243_v26  ;;  %v494_v26 = vadd.f32 %v4046_v19, %v4057_v32 }
  0x98   : > { %v475_v28 = vpop.f32.mrf.mxu0  ;;  %1339 = vrot.lane.b32.xlu0 %v4051_v25, %s3945_s14  ;;  %v4065_v41 = vpop.f32.mrf.mxu1 }
  0x99   : > { %v1837_v29 = vshll.u32 %v1275_v27, 16  ;;  %v476_v30 = vadd.f32 %v4046_v19, %v475_v28  ;;  %v1840_v48 = vshrl.u32 %v1275_v27, 16  ;;  %v675_v27 = vadd.s32 64, %v4040_v17 }
  0x9a   : > { %vm561_vm13 = vcmp.gt.f32.partialorder %v494_v26, 0.0 }
  0x9b   : > { %v1839_v34 = vrot.slane %v1837_v29, 5  ;;  %v586_v35 = vmul.f32 0.1, %v476_v30  ;;  %vm554_vm3 = vcmp.gt.f32.partialorder %v476_v30, 0.0  ;;  %v1842_v56 = vrot.slane %v1840_v48, 4 }
  0x9d   : > { %v4063_v40 = vsel %vm554_vm3, %v476_v30, %v586_v35  ;;  %v1843_v2 = vor.u32 %v1842_v56, %v1839_v34  ;;  %v673_v30 = vadd.s32 48, %v4040_v17  ;;  %v710_v35 = vand.u32 15, %v668_v22 }
  0x9e   : > { %v1084_v45 = vpack.c.bf16 %v4063_v40, %v4063_v40  ;;  %v1471_v56 = vshrl.u32 %v4051_v25, 16 }
  0x9f   : > { %v1844_v11 = vrot.slane %v1843_v2, 4  ;;  %vm4118_vm14 = vcmp.ne.s32.totalorder %v710_v35, 15  ;;  %v4132_v2 = vadd.s32 40, %v4040_v17 }
  0xa0   : > { %v478_v37 = vpop.f32.mrf.mxu0  ;;  %2155 = vrot.lane.b32.xlu0 %v1839_v34, %s3946_s15  ;;  %v4080_v58 = vpop.f32.mrf.mxu1  ;;  %v1846_v62 = vshll.u32 %v1084_v45, 16  ;;  %v1850_v13 = vshrl.u32 %v1084_v45, 16 }
  0xa1   : > { %v479_v38 = vadd.f32 %v4046_v19, %v478_v37  ;;  %v593_v37 = vmul.f32 0.1, %v494_v26  ;;  %v499_v22 = vadd.f32 %v4046_v19, %v4080_v58 }
  0xa2   : > { %v1848_v8 = vrot.slane %v1846_v62, 5  ;;  %v1852_v29 = vrot.slane %v1850_v13, 4 }
  0xa3   : > { %vm555_vm4 = vcmp.gt.f32.partialorder %v479_v38, 0.0  ;;  %v587_v39 = vmul.f32 0.1, %v479_v38  ;;  %v4123_v52 = vsel %vm561_vm13, %v494_v26, %v593_v37 }
  0xa4   : > { %v1849_v16 = vsel %vm4088_vm11, %v1844_v11, %v1848_v8 }
  0xa5   : > { %v619_v42 = vsel %vm555_vm4, %v479_v38, %v587_v39  ;;  %v759_v38 = vand.u32 15, %v675_v27 }
  0xa6   : > { %v4067_v43 = vpack.c.bf16 %v619_v42, %v619_v42  ;;  %v1245_v44 = vsel %vm1213_vm5, %v619_v42, 0.0  ;;  %vm563_vm5 = vcmp.gt.f32.partialorder %v499_v22, 0.0 }
  0xa7   : > { %v1277_v46 = vpack.c.bf16 %v1245_v44, %v1245_v44  ;;  %vm1219_vm15 = vcmp.ne.s32.totalorder %v759_v38, 0 }
  0xa8   : > { %v480_v47 = vpop.f32.mrf.mxu0  ;;  %1343 = vrot.lane.b32.xlu1 %v4067_v43, %s3945_s14  ;;  %1341 = vrot.lane.b32.xlu0 %v1084_v45, %s3945_s14  ;;  %v4099_v21 = vpop.f32.mrf.mxu1  ;;  %v1853_v45 = vor.u32 %v1852_v29, %v1848_v8  ;;  %v677_v8 = vadd.s32 80, %v4040_v17 }
  0xa9   : > { %v481_v49 = vadd.f32 %v4046_v19, %v480_v47  ;;  %v1856_v50 = vshll.u32 %v1277_v46, 16  ;;  %v1860_v51 = vshrl.u32 %v1277_v46, 16  ;;  %v745_v46 = vand.u32 15, %v673_v30 }
  0xaa   : > { %v501_v37 = vadd.f32 %v4046_v19, %v4099_v21 }
  0xab   : > { %vm556_vm6 = vcmp.gt.f32.partialorder %v481_v49, 0.0  ;;  %v588_v53 = vmul.f32 0.1, %v481_v49  ;;  %v4076_v54 = vrot.slane %v1856_v50, 5  ;;  %v1862_v55 = vrot.slane %v1860_v51, 4 }
  0xac   : > { %v724_v51 = vand.u32 15, %v670_v36  ;;  %vm1217_vm1 = vcmp.ne.s32.totalorder %v745_v46, 0  ;;  %v595_v36 = vmul.f32 0.1, %v499_v22  ;;  %vm564_vm8 = vcmp.gt.f32.partialorder %v501_v37, 0.0 }
  0xad   : > { %v4078_v57 = vsel %vm556_vm6, %v481_v49, %v588_v53  ;;  %v1863_v60 = vor.u32 %v1862_v55, %v4076_v54 }
  0xae   : > { %v1086_v59 = vpack.c.bf16 %v4078_v57, %v4078_v57  ;;  %vm4148_vm2 = vcmp.ne.s32.totalorder %v724_v51, 15 }
  0xaf   : > { %v1864_v4 = vrot.slane %v1863_v60, 4 }
  0xb0   : > { %v483_v63 = vpop.f32.mrf.mxu0  ;;  %v1870_v0 = vshrl.u32 %v1086_v59, 16  ;;  %1345 = vrot.lane.b32.xlu1 %v1086_v59, %s3945_s14  ;;  %v1866_v1 = vshll.u32 %v1086_v59, 16  ;;  %v503_v55 = vpop.f32.mrf.mxu1 }
  0xb1   : > { %v484_v3 = vadd.f32 %v4046_v19, %v483_v63  ;;  %v1854_v63 = vrot.slane %v1853_v45, 4  ;;  %v504_v51 = vadd.f32 %v4046_v19, %v503_v55 }
  0xb2   : > { %v1868_v5 = vrot.slane %v1866_v1, 5  ;;  %v1872_v9 = vrot.slane %v1870_v0, 4  ;;  %v1148_v0 = vsel %vm4118_vm14, %v4063_v40, 0.0  ;;  %v1251_v1 = vsel %vm1219_vm15, %v4123_v52, 0.0 }
  0xb3   : > { %vm557_vm10 = vcmp.gt.f32.partialorder %v484_v3, 0.0  ;;  %v589_v6 = vmul.f32 0.1, %v484_v3 }
  0xb4   : > { %v1869_v10 = vsel %vm4088_vm11, %v1864_v4, %v1868_v5  ;;  %v1873_v20 = vor.u32 %v1872_v9, %v1868_v5  ;;  %v496_v4 = vadd.f32 %v4046_v19, %v4065_v41  ;;  %v1859_v5 = vsel %vm4088_vm11, %v1854_v63, %v4076_v54 }
  0xb5   : > { %2161 = vrot.lane.b32.xlu2 %v1869_v10, %s3946_s15  ;;  %v621_v12 = vsel %vm557_vm10, %v484_v3, %v589_v6  ;;  %v4134_v3 = vpop.f32.mrf.mxu2  ;;  %v4152_v54 = vpack.c.bf16 %v1148_v0, %v1148_v0 }
  0xb6   : > { %v4095_v14 = vpack.c.bf16 %v621_v12, %v621_v12  ;;  %v1247_v15 = vsel %vm1215_vm9, %v621_v12, 0.0  ;;  %v1874_v33 = vrot.slane %v1873_v20, 4  ;;  %v4145_v12 = vrot.slane %v1471_v56, 7 }
  0xb7   : > { %v1279_v18 = vpack.c.bf16 %v1247_v15, %v1247_v15  ;;  %vm562_vm3 = vcmp.gt.f32.partialorder %v496_v4, 0.0  ;;  %v4189_v56 = vsel %vm563_vm5, %v499_v22, %v595_v36  ;;  %vm565_vm9 = vcmp.gt.f32.partialorder %v504_v51, 0.0 }
  0xb8   : > { %v485_v23 = vpop.f32.mrf.mxu0  ;;  %2157 = vrot.lane.b32.xlu1 %v1849_v16, %s3946_s15  ;;  %1347 = vrot.lane.b32.xlu0 %v4095_v14, %s3945_s14  ;;  %v1283_v16 = vpack.c.bf16 %v1251_v1, %v1251_v1  ;;  %v505_v35 = vpop.f32.mrf.mxu1  ;;  %v4208_v22 = vadd.s32 56, %v4040_v17 }
  0xb9   : > { %v486_v24 = vadd.f32 %v4046_v19, %v485_v23  ;;  %v1876_v28 = vshll.u32 %v1279_v18, 16  ;;  %v1880_v32 = vshrl.u32 %v1279_v18, 16  ;;  %v738_v18 = vand.u32 15, %v4132_v2 }
  0xba   : > { %v594_v23 = vmul.f32 0.1, %v496_v4  ;;  %v1916_v58 = vshll.u32 %v1283_v16, 16 }
  0xbb   : > { %vm558_vm12 = vcmp.gt.f32.partialorder %v486_v24, 0.0  ;;  %v590_v31 = vmul.f32 0.1, %v486_v24  ;;  %v1878_v34 = vrot.slane %v1876_v28, 5  ;;  %v1882_v59 = vrot.slane %v1880_v32, 4 }
  0xbc   : > { %v773_v28 = vand.u32 15, %v677_v8  ;;  %v1918_v0 = vrot.slane %v1916_v58, 5  ;;  %vm4268_vm14 = vcmp.ne.s32.totalorder %v738_v18, 15  ;;  %v3759_v18 = vld [vmem:[%s5463_s3 + $0x20] sm:$0xf] }
  0xbd   : > { %v1879_v39 = vsel %vm4088_vm11, %v1874_v33, %v1878_v34  ;;  %v4113_v42 = vsel %vm558_vm12, %v486_v24, %v590_v31  ;;  %v1883_v10 = vor.u32 %v1882_v59, %v1878_v34  ;;  %v596_v59 = vmul.f32 0.1, %v501_v37 }
  0xbe   : > { %2163 = vrot.lane.b32.xlu2 %v1879_v39, %s3946_s15  ;;  %v1088_v44 = vpack.c.bf16 %v4113_v42, %v4113_v42  ;;  %vm4171_vm6 = vcmp.ne.s32.totalorder %v773_v28, 0  ;;  %v4216_v28 = vpack.c.bf16 %v4123_v52, %v4123_v52 }
  0xbf   : > { %v1884_v29 = vrot.slane %v1883_v10, 4  ;;  %v1253_v63 = vsel %vm4171_vm6, %v4189_v56, 0.0  ;;  %v4201_v41 = vsel %vm564_vm8, %v501_v37, %v596_v59 }
  0xc0   : > { %v488_v48 = vpop.f32.mrf.mxu0  ;;  %v1890_v49 = vshrl.u32 %v1088_v44, 16  ;;  %1349 = vrot.lane.b32.xlu1 %v1088_v44, %s3945_s14  ;;  %v1886_v50 = vshll.u32 %v1088_v44, 16  ;;  %v4169_v44 = vsel %vm562_vm3, %v496_v4, %v594_v23  ;;  %v508_v23 = vpop.f32.mrf.mxu1 }
  0xc1   : > { %v489_v53 = vadd.f32 %v4046_v19, %v488_v48  ;;  %v4181_v47 = vpack.c.bf16 %v4169_v44, %v4169_v44  ;;  %v4183_v48 = vpop.f32.mrf.mxu2 }
  0xc2   : > { %v1888_v60 = vrot.slane %v1886_v50, 5  ;;  %v1892_v61 = vrot.slane %v1890_v49, 4  ;;  %v1479_v49 = vshrl.u32 %v4152_v54, 16  ;;  %v1920_v50 = vshrl.u32 %v1283_v16, 16 }
  0xc3   : > { %vm559_vm0 = vcmp.gt.f32.partialorder %v489_v53, 0.0  ;;  %v591_v62 = vmul.f32 0.1, %v489_v53 }
  0xc4   : > { %v1893_v11 = vor.u32 %v1892_v61, %v1888_v60  ;;  %v1889_v38 = vsel %vm4088_vm11, %v1884_v29, %v1888_v60  ;;  %v4204_v16 = vrot.slane %v1479_v49, 7  ;;  %v681_v49 = vadd.s32 112, %v4040_v17 }
  0xc5   : > { %v623_v6 = vsel %vm559_vm0, %v489_v53, %v591_v62  ;;  %v679_v53 = vadd.s32 96, %v4040_v17  ;;  %v1150_v62 = vsel %vm4148_vm2, %v4078_v57, 0.0  ;;  %v1926_v57 = vshll.u32 %v4181_v47, 16 }
  0xc6   : > { %2159 = vrot.lane.b32.xlu2 %v1859_v5, %s3946_s15  ;;  %v4143_v40 = vpack.c.bf16 %v623_v6, %v623_v6  ;;  %v1249_v9 = vsel %vm1217_vm1, %v623_v6, 0.0  ;;  %v1894_v30 = vrot.slane %v1893_v11, 4  ;;  %v1930_v5 = vshrl.u32 %v4181_v47, 16 }
  0xc7   : > { %v1281_v15 = vpack.c.bf16 %v1249_v9, %v1249_v9  ;;  %v597_v6 = vmul.f32 0.1, %v504_v51  ;;  %v787_v8 = vand.u32 15, %v679_v53  ;;  %v1922_v9 = vrot.slane %v1920_v50, 4 }
  0xc8   : > { %v490_v20 = vpop.f32.mrf.mxu0  ;;  %1351 = vrot.lane.b32.xlu1 %v4143_v40, %s3945_s14  ;;  %v1928_v36 = vrot.slane %v1926_v57, 5  ;;  %v1932_v37 = vrot.slane %v1930_v5, 4  ;;  %v1542_v50 = vshrl.u32 %v4216_v28, 16  ;;  %v2330_v57 = vld [vmem:[%s5463_s3 + $0x8] sm:$0xf]  ;;  %vm2475_vm0 = vcmask 1043456  }
  0xc9   : > { %v491_v24 = vadd.f32 %v4046_v19, %v490_v20  ;;  %v1900_v26 = vshrl.u32 %v1281_v15, 16  ;;  %v1896_v27 = vshll.u32 %v1281_v15, 16  ;;  %v1488_v15 = vshrl.u32 %v4067_v43, 16  ;;  %v4228_v58 = vpop.f32.mrf.mxu2 }
  0xca   : > { %v1482_v20 = vshll.u32 %v4152_v54, 16  ;;  %v4219_v29 = vsel %vm565_vm9, %v504_v51, %v597_v6  ;;  %vm1223_vm10 = vcmp.ne.s32.totalorder %v787_v8, 0  ;;  %v2578_v2 = vunpack.c.l.b16 %v2330_v57 }
  0xcb   : > { %vm560_vm4 = vcmp.gt.f32.partialorder %v491_v24, 0.0  ;;  %v592_v31 = vmul.f32 0.1, %v491_v24  ;;  %v1898_v33 = vrot.slane %v1896_v27, 5  ;;  %v1902_v34 = vrot.slane %v1900_v26, 4 }
  0xcc   : > { %v1285_v26 = vpack.c.bf16 %v1253_v63, %v1253_v63  ;;  %v4230_v52 = vrot.slane %v1488_v15, 7  ;;  %v4262_v15 = vrot.slane %v1542_v50, 7  ;;  %v683_v50 = vadd.s32 128, %v4040_v17 }
  0xcd   : > { %v1899_v39 = vsel %vm4088_vm11, %v1894_v30, %v1898_v33  ;;  %v4166_v32 = vsel %vm560_vm4, %v491_v24, %v592_v31  ;;  %v1903_v46 = vor.u32 %v1902_v34, %v1898_v33  ;;  %v4210_v24 = vpack.c.bf16 %v1150_v62, %v1150_v62 }
  0xce   : > { %2165 = vrot.lane.b32.xlu2 %v1889_v38, %s3946_s15  ;;  %2167 = vrot.lane.b32.xlu0 %v1899_v39, %s3946_s15  ;;  %v1090_v21 = vpack.c.bf16 %v4166_v32, %v4166_v32  ;;  %v506_v30 = vadd.f32 %v4046_v19, %v505_v35  ;;  %v4224_v31 = vpack.c.bf16 %v4201_v41, %v4201_v41  ;;  %v1491_v38 = vshll.u32 %v4067_v43, 16 }
  0xcf   : > { %v1904_v1 = vrot.slane %v1903_v46, 4  ;;  %v1923_v34 = vor.u32 %v1922_v9, %v1918_v0  ;;  %v509_v35 = vadd.f32 %v4046_v19, %v508_v23  ;;  %v1486_v39 = vrot.slane %v4204_v16, 4 }
  0xd0   : > { %v1910_v60 = vshrl.u32 %v1090_v21, 16  ;;  %v1906_v61 = vshll.u32 %v1090_v21, 16  ;;  %v1497_v45 = vshrl.u32 %v4210_v24, 16  ;;  %v1255_v46 = vsel %vm1223_vm10, %v4219_v29, 0.0 }
  0xd1   : > { %v598_v51 = vmul.f32 0.1, %v506_v30  ;;  %v1950_v53 = vshrl.u32 %v4224_v31, 16  ;;  %v1946_v43 = vshll.u32 %v4224_v31, 16  ;;  %v1924_v59 = vrot.slane %v1923_v34, 4 }
  0xd2   : > { %v1908_v55 = vrot.slane %v1906_v61, 5  ;;  %v1912_v4 = vrot.slane %v1910_v60, 4  ;;  %vm566_vm12 = vcmp.gt.f32.partialorder %v506_v30, 0.0  ;;  %v1933_v60 = vor.u32 %v1932_v37, %v1928_v36 }
  0xd3   : > { %v1936_v61 = vshll.u32 %v1285_v26, 16  ;;  %v1940_v62 = vshrl.u32 %v1285_v26, 16  ;;  %v1287_v63 = vpack.c.bf16 %v1255_v46, %v1255_v46  ;;  %vm567_vm13 = vcmp.gt.f32.partialorder %v509_v35, 0.0 }
  0xd4   : > { %v1909_v10 = vsel %vm4088_vm11, %v1904_v1, %v1908_v55  ;;  %v1913_v11 = vor.u32 %v1912_v4, %v1908_v55  ;;  %v599_v1 = vmul.f32 0.1, %v509_v35  ;;  %v801_v4 = vand.u32 15, %v681_v49 }
  0xd5   : > { %v4250_v5 = vor.u32 %v1491_v38, %v4230_v52  ;;  %v4252_v6 = vrot.slane %v1497_v45, 7  ;;  %v4254_v8 = vrot.slane %v1946_v43, 5  ;;  %v1952_v9 = vrot.slane %v1950_v53, 4  ;;  %v4284_v45 = vpop.f32.mrf.mxu2 }
  0xd6   : > { %1353 = vrot.lane.b32.xlu2 %v1090_v21, %s3945_s14  ;;  %2169 = vrot.lane.b32.xlu0 %v1909_v10, %s3946_s15  ;;  %v1914_v27 = vrot.slane %v1913_v11, 4  ;;  %v752_v21 = vand.u32 15, %v4208_v22  ;;  %v510_v10 = vpop.f32.mrf.mxu1  ;;  %v4257_v11 = vsel %vm566_vm12, %v506_v30, %v598_v51  ;;  %v1934_v23 = vrot.slane %v1933_v60, 4 }
  0xd7   : > { %v1938_v26 = vrot.slane %v1936_v61, 5  ;;  %v4274_v30 = vsel %vm567_vm13, %v509_v35, %v599_v1  ;;  %v1942_v34 = vrot.slane %v1940_v62, 4  ;;  %v1956_v37 = vshll.u32 %v1287_v63, 16 }
  0xd8   : > { %v1919_v33 = vsel %vm4088_vm11, %v1914_v27, %v1918_v0  ;;  %v676_v0 = vadd.s32 72, %v4040_v17  ;;  %vm1225_vm15 = vcmp.ne.s32.totalorder %v801_v4, 0  ;;  %v511_v38 = vadd.f32 %v4046_v19, %v510_v10  ;;  %v3648_v10 = vld [vmem:[%s5463_s3 + $0x14] sm:$0xf] }
  0xd9   : > { %2171 = vrot.lane.b32.xlu1 %v1919_v33, %s3946_s15  ;;  %v1960_v46 = vshrl.u32 %v1287_v63, 16  ;;  %v514_v35 = vadd.f32 %v4046_v19, %v4134_v3  ;;  %v1953_v49 = vor.u32 %v1952_v9, %v4254_v8  ;;  %v1939_v51 = vsel %vm4088_vm11, %v1934_v23, %v1938_v26 }
  0xda   : > { %v766_v33 = vand.u32 15, %v676_v0  ;;  %v4294_v53 = vpack.c.bf16 %v4189_v56, %v4189_v56  ;;  %v2580_v43 = vpack.c.b16 %v2578_v2, %v2578_v2  ;;  %v1943_v60 = vor.u32 %v1942_v34, %v1938_v26 }
  0xdb   : > { %v1958_v61 = vrot.slane %v1956_v37, 5  ;;  %v2798_v62 = vunpack.c.l.b16 %v3759_v18  ;;  %v600_v3 = vmul.f32 0.1, %v511_v38  ;;  %v1954_v56 = vrot.slane %v1953_v49, 4 }
  0xdc   : > { %v2586_v1 = vsel %vm2475_vm0, %v2580_v43, 0  ;;  %vm568_vm1 = vcmp.gt.f32.partialorder %v511_v38, 0.0  ;;  %v1962_v4 = vrot.slane %v1960_v46, 4  ;;  %vm1124_vm2 = vcmp.ne.s32.totalorder %v766_v33, 15 }
  0xdd   : > { %2594 = vmatpush.bf16.msrb.mxu2 %v2586_v1  ;;  %v2800_v9 = vpack.c.b16 %v2798_v62, %v2798_v62  ;;  %vm569_vm3 = vcmp.gt.f32.partialorder %v514_v35, 0.0  ;;  %v815_v23 = vand.u32 15, %v683_v50  ;;  %v1944_v34 = vrot.slane %v1943_v60, 4  ;;  %v523_v62 = vpop.f32.mrf.mxu2 }
  0xde   : > { %1355 = vrot.lane.b32.xlu2 %v4216_v28, %s3945_s14  ;;  %1357 = vrot.lane.b32.xlu0 %v4181_v47, %s3945_s14  ;;  %v1929_v47 = vsel %vm4088_vm11, %v1924_v59, %v1928_v36  ;;  %v4279_v36 = vpack.c.bf16 %v4257_v11, %v4257_v11  ;;  %v1257_v59 = vsel %vm1225_vm15, %v4274_v30, 0.0  ;;  %v4311_v46 = vsel %vm568_vm1, %v511_v38, %v600_v3 }
  0xdf   : > { %v1289_v26 = vpack.c.bf16 %v1257_v59, %v1257_v59  ;;  %v2851_v37 = vsel %vm2475_vm0, %v2800_v9, 0  ;;  %v2422_v49 = vunpack.c.l.b16 %v3648_v10  ;;  %v1156_v33 = vsel %vm1124_vm2, %v4169_v44, 0.0 }
  0xe0   : > { %v1970_v63 = vshrl.u32 %v4279_v36, 16  ;;  %v1966_v0 = vshll.u32 %v4279_v36, 16  ;;  %2859 = vmatpush.bf16.msrb.mxu3 %v2851_v37  ;;  %v1959_v50 = vsel %vm4088_vm11, %v1954_v56, %v1958_v61  ;;  %v1963_v43 = vor.u32 %v1962_v4, %v1958_v61 }
  0xe1   : > { %2173 = vrot.lane.b32.xlu1 %v1929_v47, %s3946_s15  ;;  %v601_v47 = vmul.f32 0.1, %v514_v35  ;;  %v516_v38 = vadd.f32 %v4046_v19, %v4183_v48  ;;  %v2424_v60 = vpack.c.b16 %v2422_v49, %v2422_v49  ;;  %vm653_vm4 = vsmask.f32 256 }
  0xe2   : > { %v1968_v2 = vrot.slane %v1966_v0, 5  ;;  %v1972_v18 = vrot.slane %v1970_v63, 4  ;;  %vm4325_vm5 = vcmp.ne.s32.totalorder %v815_v23, 0  ;;  %v1980_v44 = vshrl.u32 %v1289_v26, 16 }
  0xe3   : > { %v4321_v59 = vsel %vm569_vm3, %v514_v35, %v601_v47  ;;  %v1949_v61 = vsel %vm4088_vm11, %v1944_v34, %v4254_v8  ;;  %vm4338_vm6 = vcmp.ne.s32.totalorder %v752_v21, 15  ;;  %v519_v27 = vadd.f32 %v4046_v19, %v4228_v58 }
  0xe4   : > { %v1973_v35 = vor.u32 %v1972_v18, %v1968_v2  ;;  %v1976_v63 = vshll.u32 %v1289_v26, 16  ;;  %v2477_v8 = vsel %vm2475_vm0, %v2424_v60, 0  ;;  %v4351_v22 = vpack.c.bf16 %v4219_v29, %v4219_v29  ;;  %v4366_v18 = vpop.f32.mrf.mxu3 }
  0xe5   : > { %v685_v21 = vadd.s32 144, %v4040_v17  ;;  %v1964_v1 = vrot.slane %v1963_v43, 4  ;;  %2485 = vmatpush.bf16.msrb.mxu1 %v2477_v8  ;;  %v4357_v9 = vpack.c.bf16 %v1156_v33, %v1156_v33  ;;  %v602_v58 = vmul.f32 0.1, %v516_v38 }
  0xe6   : > { %2175 = vrot.lane.b32.xlu2 %v1939_v51, %s3946_s15  ;;  %1359 = vrot.lane.b32.xlu0 %v4294_v53, %s3945_s14  ;;  %v1506_v51 = vshrl.u32 %v4095_v14, 16  ;;  %v1259_v10 = vsel %vm4325_vm5, %v4321_v59, 0.0  ;;  %vm570_vm8 = vcmp.gt.f32.partialorder %v516_v38, 0.0  ;;  %v603_v23 = vmul.f32 0.1, %v519_v27 }
  0xe7   : > { %v1974_v26 = vrot.slane %v1973_v35, 4  ;;  %v1978_v34 = vrot.slane %v1976_v63, 5  ;;  %v1982_v37 = vrot.slane %v1980_v44, 4  ;;  %vm571_vm9 = vcmp.gt.f32.partialorder %v519_v27, 0.0 }
  0xe8   : > { %v4354_v56 = vrot.slane %v1506_v51, 7  ;;  %v829_v51 = vand.u32 15, %v685_v21  ;;  %v1969_v33 = vsel %vm4088_vm11, %v1964_v1, %v1968_v2  ;;  %v4374_v60 = vsel %vm570_vm8, %v516_v38, %v602_v58  ;;  %v4387_v21 = vpop.f32.mrf.mxu2 }
  0xe9   : > { %1361 = vrot.lane.b32.xlu1 %v4224_v31, %s3945_s14  ;;  %v1152_v31 = vsel %vm4268_vm14, %v4113_v42, 0.0  ;;  %v4334_v42 = vpack.c.bf16 %v4311_v46, %v4311_v46  ;;  %5486 = vst [vmem:[#allocation3_spill] sm:$0xff] %v4374_v60  ;;  %vm652_vm10 = vcmask 188416   ;;  %v1291_v3 = vpack.c.bf16 %v1259_v10, %v1259_v10 }
  0xea   : > { %v4347_v0 = vpack.c.bf16 %v1152_v31, %v1152_v31  ;;  %v1551_v31 = vshrl.u32 %v4357_v9, 16  ;;  %vm654_vm12 = vmand %vm652_vm10, %vm653_vm4  ;;  %v4380_v63 = vsel %vm571_vm9, %v519_v27, %v603_v23  ;;  %v1979_v2 = vsel %vm4088_vm11, %v1974_v26, %v1978_v34 }
  0xeb   : > { %v1990_v29 = vshrl.u32 %v4334_v42, 16  ;;  %v1986_v47 = vshll.u32 %v4334_v42, 16  ;;  %v1983_v38 = vor.u32 %v1982_v37, %v1978_v34  ;;  %vm4389_vm13 = vcmp.ne.s32.totalorder %v829_v51, 0 }
  0xec   : > { %v1515_v49 = vshrl.u32 %v4347_v0, 16  ;;  %v4395_v27 = vadd.f32 %v4046_v19, %v4284_v45  ;;  %v524_v58 = vadd.f32 %v4046_v19, %v523_v62  ;;  %v3896_v45 = vld [vmem:[%s5463_s3] sm:$0xff]  ;;  %v1154_v62 = vsel %vm4338_vm6, %v4166_v32, 0.0 }
  0xed   : > { %v4376_v44 = vrot.slane %v1986_v47, 5  ;;  %v1992_v35 = vrot.slane %v1990_v29, 4  ;;  %v1524_v29 = vshrl.u32 %v4143_v40, 16  ;;  %v4405_v47 = vrot.slane %v1551_v31, 7  ;;  %v4422_v31 = vpop.f32.mrf.mxu3  ;;  %2595 = vmatpush.bf16.msrb.mxu2 %v3896_v45 }
  0xee   : > { %2177 = vrot.lane.b32.xlu2 %v1949_v61, %s3946_s15  ;;  %2179 = vrot.lane.b32.xlu0 %v1959_v50, %s3946_s15  ;;  %v655_v50 = vld [vmem:[#allocation2 + $0x8] sm:$0x1]  ;;  %v687_v61 = vadd.s32 160, %v4040_v17  ;;  %v4402_v10 = vrot.slane %v1515_v49, 7  ;;  %v1996_v37 = vshll.u32 %v1291_v3, 16  ;;  %v2000_v49 = vshrl.u32 %v1291_v3, 16 }
  0xef   : > { %v656_v8 = vsel %vm654_vm12, 0, %v655_v50  ;;  %v1993_v34 = vor.u32 %v1992_v35, %v4376_v44  ;;  %v4417_v51 = vadd.s32 88, %v4040_v17  ;;  %v1984_v50 = vrot.slane %v1983_v38, 4 }
  0xf0   : > { %657 = vst [vmem:[#allocation2 + $0x8] sm:$0x1] %v656_v8  ;;  %v843_v26 = vand.u32 15, %v687_v61  ;;  %vm572_vm14 = vcmp.gt.f32.partialorder %v4395_v27, 0.0  ;;  %v605_v32 = vmul.f32 0.1, %v524_v58  ;;  %v4430_v35 = vpack.c.bf16 %v4274_v30, %v4274_v30 }
  0xf1   : > { %1363 = vrot.lane.b32.xlu1 %v4351_v22, %s3945_s14  ;;  %v604_v3 = vmul.f32 0.1, %v4395_v27  ;;  %vm573_vm15 = vcmp.gt.f32.partialorder %v524_v58, 0.0  ;;  %vm1468_vm1 = vsmask.f32 4368  ;;  %vm649_vm2 = vcmask 191488  }
  0xf2   : > { %vm4432_vm3 = vcmp.ne.s32.totalorder %v843_v26, 0  ;;  %v1994_v38 = vrot.slane %v1993_v34, 4  ;;  %v1998_v8 = vrot.slane %v1996_v37, 5  ;;  %v1989_v30 = vsel %vm4088_vm11, %v1984_v50, %v4376_v44  ;;  %v661_v26 = vld [vmem:[#allocation2 + $0x84] sm:$0x8] }
  0xf3   : > { %v2002_v45 = vrot.slane %v2000_v49, 4  ;;  %v3947_v23 = vmov 0   ;;  %vm658_vm5 = vcmask 191491   ;;  %v4444_v57 = vsel %vm573_vm15, %v524_v58, %v605_v32  ;;  %v528_v58 = vpop.f32.mrf.mxu2  ;;  %v3915_v49 = vld [vmem:[%s5463_s3 + $0x18] sm:$0xff] }
  0xf4   : > { %650 = vst.msk [vmem:[#allocation2] sm:$0xf] %vm649_vm2, %v3947_v23  ;;  %vm659_vm6 = vsmask.f32 7950  ;;  %v4452_v43 = vpack.c.bf16 %v1154_v62, %v1154_v62  ;;  %v1560_v44 = vshrl.u32 %v4294_v53, 16  ;;  %v780_v50 = vand.u32 15, %v4417_v51  ;;  %2860 = vmatpush.bf16.msrb.mxu3 %v3915_v49 }
  0xf5   : > { %651 = vst.msk [vmem:[#allocation2 + $0x4] sm:$0xf] %vm649_vm2, %v3947_v23  ;;  %vm660_vm8 = vmand %vm658_vm5, %vm659_vm6  ;;  %v4475_v51 = vsel %vm572_vm14, %v4395_v27, %v604_v3  ;;  %v689_v49 = vadd.s32 176, %v4040_v17  ;;  %vm1435_vm10 = vcmask 126016   ;;  %vm1790_vm15 = vcmask 60416  }
  0xf6   : > { %1365 = vrot.lane.b32.xlu2 %v4279_v36, %s3945_s14  ;;  %2181 = vrot.lane.b32.xlu0 %v1969_v33, %s3946_s15  ;;  %v4400_v36 = vpack.c.bf16 %v4374_v60, %v4374_v60  ;;  %v1261_v33 = vsel %vm4389_vm13, %v4380_v63, 0.0  ;;  %664 = vst.msk [vmem:[#allocation2 + $0x88] sm:$0xf] %vm649_vm2, %v3947_v23  ;;  %v662_v62 = vsel %vm660_vm8, 0, %v661_v26  ;;  %v1533_v27 = vshrl.u32 %v4452_v43, 16  ;;  %vm4507_vm13 = vmor %vm653_vm4, %vm1468_vm1 }
  0xf7   : > { %v1293_v1 = vpack.c.bf16 %v1261_v33, %v1261_v33  ;;  %v4449_v33 = vrot.slane %v1524_v29, 7  ;;  %v4464_v29 = vpack.c.bf16 %v4321_v59, %v4321_v59  ;;  %665 = vst.msk [vmem:[#allocation2 + $0x8c] sm:$0xf] %vm649_vm2, %v3947_v23  ;;  %v3898_v59 = vld [vmem:[%s5463_s3 + $0xc] sm:$0xff]  ;;  %v4480_v23 = vpop.f32.mrf.mxu3  ;;  %v529_v26 = vadd.f32 %v4046_v19, %v528_v58 }
  0xf8   : > { %v2010_v48 = vshrl.u32 %v4400_v36, 16  ;;  %v2006_v61 = vshll.u32 %v4400_v36, 16  ;;  %663 = vst [vmem:[#allocation2 + $0x84] sm:$0x8] %v662_v62  ;;  %2486 = vmatpush.bf16.msrb.mxu1 %v3898_v59  ;;  %vm4494_vm9 = vcmp.ne.s32.totalorder %v780_v50, 15  ;;  %v857_v55 = vand.u32 15, %v689_v49 }
  0xf9   : > { %2183 = vrot.lane.b32.xlu1 %v1979_v2, %s3946_s15  ;;  %v2020_v32 = vshrl.u32 %v1293_v1, 16  ;;  %5491 = vst [vmem:[#allocation4_spill] sm:$0xff] %v4464_v29  ;;  %v1999_v2 = vsel %vm4088_vm11, %v1994_v38, %v1998_v8  ;;  %vm575_vm14 = vcmp.gt.f32.partialorder %v529_v26, 0.0  ;;  %vm1791_vm1 = vsmask.f32 7938 }
  0xfa   : > { %v4446_v34 = vrot.slane %v2006_v61, 5  ;;  %v2012_v37 = vrot.slane %v2010_v48, 4  ;;  %v1263_v48 = vsel %vm4432_vm3, %v4444_v57, 0.0  ;;  %v526_v61 = vadd.f32 %v4046_v19, %v4387_v21  ;;  %vm4579_vm5 = vmand %vm1790_vm15, %vm1791_vm1 }
  0xfb   : > { %v2016_v21 = vshll.u32 %v1293_v1, 16  ;;  %v2022_v4 = vrot.slane %v2020_v32, 4  ;;  %v1484_v32 = vor.u32 %v1482_v20, %v4204_v16  ;;  %vm2254_vm2 = vcmask 191619  }
  0xfc   : > { %vm574_vm12 = vcmp.gt.f32.partialorder %v526_v61, 0.0  ;;  %v606_v59 = vmul.f32 0.1, %v526_v61  ;;  %vm4551_vm3 = vcmp.ne.s32.totalorder %v857_v55, 0 }
  0xfd   : > { %v2018_v62 = vrot.slane %v2016_v21, 5 }
  0xfe   : > { %1367 = vrot.lane.b32.xlu2 %v4430_v35, %s3945_s14  ;;  %1369 = vrot.lane.b32.xlu0 %v4334_v42, %s3945_s14  ;;  %v2003_v42 = vor.u32 %v2002_v45, %v1998_v8  ;;  %v4487_v45 = vpack.c.bf16 %v4475_v51, %v4475_v51  ;;  %v4539_v20 = vsel %vm574_vm12, %v526_v61, %v606_v59 }
  0xff   : > { %v2023_v54 = vor.u32 %v2022_v4, %v2018_v62  ;;  %5496 = vst [vmem:[#allocation5_spill] sm:$0xff] %v4539_v20  ;;  %v4569_v55 = vpack.c.bf16 %v4539_v20, %v4539_v20  ;;  %v1495_v4 = vrot.slane %v4230_v52, 4  ;;  %v4622_v52 = vld [vmem:[%s5462_s2] ss:$0 sm:$0xff] }
 0x100   : > { %v2030_v8 = vshrl.u32 %v4487_v45, 16  ;;  %v2026_v1 = vshll.u32 %v4487_v45, 16  ;;  %v2004_v58 = vrot.slane %v2003_v42, 4 }
 0x101   : > { %2185 = vrot.lane.b32.xlu1 %v1989_v30, %s3946_s15  ;;  %v2013_v30 = vor.u32 %v2012_v37, %v4446_v34  ;;  %v4500_v37 = vpack.c.bf16 %v1263_v48, %v1263_v48  ;;  %v607_v48 = vmul.f32 0.1, %v529_v26 }
 0x102   : > { %v4520_v42 = vrot.slane %v2026_v1, 5  ;;  %v2032_v13 = vrot.slane %v2030_v8, 4  ;;  %v4541_v8 = vpop.f32.mrf.mxu3 }
 0x103   : > { %v2014_v3 = vrot.slane %v2013_v30, 4  ;;  %v1477_v30 = vrot.slane %v4145_v12, 4  ;;  %v4549_v1 = vsel %vm575_vm14, %v529_v26, %v607_v48  ;;  %v2036_v61 = vshll.u32 %v4500_v37, 16 }
 0x104   : > { %v2040_v59 = vshrl.u32 %v4500_v37, 16  ;;  %v2024_v26 = vrot.slane %v2023_v54, 4  ;;  %v5501_v37 = vshll.u32 %v4051_v25, 16  ;;  %vm2259_vm14 = vcmask 191616  }
 0x105   : > { %v2019_v49 = vsel %vm4088_vm11, %v2014_v3, %v2018_v62  ;;  %v4536_v16 = vsel %vm4507_vm13, %v1477_v30, %v1484_v32  ;;  %v2033_v3 = vor.u32 %v2032_v13, %v4520_v42  ;;  %v4575_v13 = vadd.s32 104, %v4040_v17  ;;  %v2256_v30 = vld [vmem:[#allocation2 + $0x4] sm:$0x8] }
 0x106   : > { %2187 = vrot.lane.b32.xlu2 %v1999_v2, %s3946_s15  ;;  %1371 = vrot.lane.b32.xlu0 %v4464_v29, %s3945_s14  ;;  %v4516_v2 = vsel %vm4507_vm13, %v1486_v39, %v4250_v5  ;;  %v2009_v39 = vsel %vm4088_vm11, %v2004_v58, %v4446_v34  ;;  %v534_v5 = vadd.f32 %v4046_v19, %v4366_v18  ;;  %v691_v34 = vadd.s32 192, %v4040_v17 }
 0x107   : > { %v4546_v18 = vpack.c.bf16 %v4380_v63, %v4380_v63  ;;  %v4558_v58 = vrot.slane %v1533_v27, 7  ;;  %v4562_v63 = vrot.slane %v1560_v44, 7  ;;  %v1476_v48 = vor.u32 %v5501_v37, %v4145_v12 }
 0x108   : > { %vm577_vm8 = vcmp.gt.f32.partialorder %v534_v5, 0.0  ;;  %v609_v32 = vmul.f32 0.1, %v534_v5  ;;  %v871_v38 = vand.u32 15, %v691_v34  ;;  %v5504_v12 = vshll.u32 %v4210_v24, 16 }
 0x109   : > { %1373 = vrot.lane.b32.xlu1 %v4400_v36, %s3945_s14  ;;  %v530_v36 = vpop.f32.mrf.mxu2  ;;  %v2050_v37 = vshrl.u32 %v4569_v55, 16  ;;  %v2042_v20 = vrot.slane %v2040_v59, 4  ;;  %v2046_v29 = vshll.u32 %v4569_v55, 16  ;;  %v2029_v24 = vsel %vm4088_vm11, %v2024_v26, %v4520_v42 }
 0x10a   : > { %v1340_v21 = vpop.permute.xlu0 %1339  ;;  %v531_v62 = vadd.f32 %v4046_v19, %v530_v36  ;;  %v1158_v19 = vsel %vm4494_vm9, %v4201_v41, 0.0  ;;  %vm4590_vm9 = vmand %vm2254_vm2, %vm659_vm6  ;;  %v2038_v36 = vrot.slane %v2036_v61, 5  ;;  %v4613_v61 = vsel %vm577_vm8, %v534_v5, %v609_v32  ;;  %v4635_v32 = vpop.f32.mrf.mxu3 }
 0x10b   : > { %1436 = vst.msk [vmem:[#allocation2 + $0x8] sm:$0xf] %vm1435_vm10, %v1340_v21  ;;  %v1265_v21 = vsel %vm4551_vm3, %v4549_v1, 0.0  ;;  %vm4615_vm12 = vcmp.ne.s32.totalorder %v871_v38, 0  ;;  %v539_v44 = vadd.f32 %v4622_v52, %v4480_v23  ;;  %v2048_v38 = vrot.slane %v2046_v29, 5 }
 0x10c   : > { %v608_v25 = vmul.f32 0.1, %v531_v62  ;;  %vm576_vm6 = vcmp.gt.f32.partialorder %v531_v62, 0.0  ;;  %v1297_v5 = vpack.c.bf16 %v1265_v21, %v1265_v21  ;;  %v2043_v23 = vor.u32 %v2042_v20, %v2038_v36 }
 0x10d   : > { %v2052_v41 = vrot.slane %v2050_v37, 4  ;;  %v1267_v21 = vsel %vm4615_vm12, %v4613_v61, 0.0  ;;  %v4653_v29 = vpack.c.bf16 %v4444_v57, %v4444_v57  ;;  %vm579_vm1 = vcmp.gt.f32.partialorder %v539_v44, 0.0 }
 0x10e   : > { %2189 = vrot.lane.b32.xlu2 %v2009_v39, %s3946_s15  ;;  %2191 = vrot.lane.b32.xlu0 %v2019_v49, %s3946_s15  ;;  %v2034_v39 = vrot.slane %v2033_v3, 4  ;;  %v1502_v49 = vor.u32 %v5504_v12, %v4252_v6  ;;  %v536_v12 = vadd.f32 %v4622_v52, %v4422_v31  ;;  %v611_v20 = vmul.f32 0.1, %v539_v44 }
 0x10f   : > { %v4583_v27 = vpop.permute.xlu2 %2161  ;;  %v5507_v31 = vshll.u32 %v4095_v14, 16  ;;  %v2056_v57 = vshll.u32 %v1297_v5, 16  ;;  %v5508_v14 = vshll.u32 %v4452_v43, 16  ;;  %vm2426_vm3 = vcmask 195584  }
 0x110   : > { %v4628_v42 = vsel %vm4507_vm13, %v1495_v4, %v1502_v49  ;;  %v2039_v26 = vsel %vm4088_vm11, %v2034_v39, %v2038_v36  ;;  %v2060_v39 = vshrl.u32 %v1297_v5, 16  ;;  %vm578_vm8 = vcmp.gt.f32.partialorder %v536_v12, 0.0 }
 0x111   : > { %1375 = vrot.lane.b32.xlu1 %v4546_v18, %s3945_s14  ;;  %v1511_v36 = vor.u32 %v5507_v31, %v4354_v56  ;;  %v1538_v59 = vor.u32 %v5508_v14, %v4558_v58  ;;  %v1581_v5 = vshll.u32 %v4351_v22, 16 }
 0x112   : > { %v1793_v54 = vld [vmem:[#allocation2 + $0x8] sm:$0xf]  ;;  %v2156_v34 = vpop.permute.xlu0 %2155 }
 0x113   : > { %v1794_v60 = vsel %vm4579_vm5, %v1476_v48, %v1793_v54  ;;  %v2257_v3 = vsel %vm4590_vm9, %v2156_v34, %v2256_v30  ;;  %v693_v48 = vadd.s32 208, %v4040_v17  ;;  %v794_v30 = vand.u32 15, %v4575_v13 }
 0x114   : > { %1795 = vst [vmem:[#allocation2 + $0x8] sm:$0xf] %v1794_v60  ;;  %v4630_v60 = vpack.c.bf16 %v1158_v19, %v1158_v19  ;;  %v4641_v19 = vsel %vm576_vm6, %v531_v62, %v608_v25  ;;  %v1504_v13 = vrot.slane %v4252_v6, 4  ;;  %v2044_v54 = vrot.slane %v2043_v23, 4 }
 0x115   : > { %2258 = vst [vmem:[#allocation2 + $0x4] sm:$0x8] %v2257_v3  ;;  %v885_v62 = vand.u32 15, %v693_v48  ;;  %v2053_v34 = vor.u32 %v2052_v41, %v2048_v38  ;;  %v1531_v6 = vrot.slane %v4449_v33, 4  ;;  %vm4676_vm2 = vcmp.ne.s32.totalorder %v794_v30, 15 }
 0x116   : > { %1377 = vrot.lane.b32.xlu2 %v4487_v45, %s3945_s14  ;;  %2193 = vrot.lane.b32.xlu0 %v2029_v24, %s3946_s15  ;;  %v4657_v45 = vpack.c.bf16 %v4641_v19, %v4641_v19  ;;  %v4668_v3 = vsel %vm4507_vm13, %v1504_v13, %v1511_v36  ;;  %v1299_v23 = vpack.c.bf16 %v1267_v21, %v1267_v21  ;;  %v610_v41 = vmul.f32 0.1, %v536_v12 }
 0x117   : > { %v4685_v13 = vsel %vm579_vm1, %v539_v44, %v611_v20  ;;  %v4689_v43 = vsel %vm4507_vm13, %v1531_v6, %v1538_v59  ;;  %vm4696_vm5 = vcmp.ne.s32.totalorder %v885_v62, 0  ;;  %v2054_v44 = vrot.slane %v2053_v34, 4 }
 0x118   : > { %v4649_v49 = vpop.permute.xlu2 %2163  ;;  %v2070_v37 = vshrl.u32 %v4657_v45, 16  ;;  %v2066_v24 = vshll.u32 %v4657_v45, 16  ;;  %v2058_v30 = vrot.slane %v2056_v57, 5  ;;  %v2062_v21 = vrot.slane %v2060_v39, 4 }
 0x119   : > { %2195 = vrot.lane.b32.xlu1 %v2039_v26, %s3946_s15  ;;  %v1569_v26 = vshrl.u32 %v4630_v60, 16  ;;  %v1572_v36 = vshll.u32 %v4630_v60, 16  ;;  %v1269_v39 = vsel %vm4696_vm5, %v4685_v13, 0.0  ;;  %v4723_v34 = vpack.c.bf16 %v4549_v1, %v4549_v1 }
 0x11a   : > { %v1344_v25 = vpop.permute.xlu1 %1343  ;;  %v1342_v4 = vpop.permute.xlu0 %1341  ;;  %v4705_v20 = vrot.slane %v2066_v24, 5  ;;  %v2072_v31 = vrot.slane %v2070_v37, 4  ;;  %v541_v57 = vadd.f32 %v4622_v52, %v4541_v8  ;;  %v5513_v24 = vshll.u32 %v4347_v0, 16 }
 0x11b   : > { %1438 = vst.msk [vmem:[#allocation2 + $0x10] sm:$0xf] %vm1435_vm10, %v1344_v25  ;;  %v4709_v62 = vrot.slane %v1569_v26, 7  ;;  %v1160_v25 = vsel %vm4676_vm2, %v4257_v11, 0.0  ;;  %v2059_v11 = vsel %vm4088_vm11, %v2054_v44, %v2058_v30  ;;  %v4734_v14 = vsel %vm578_vm8, %v536_v12, %v610_v41 }
 0x11c   : > { %1798 = vst.msk [vmem:[#allocation2 + $0x10] sm:$0xf] %vm1790_vm15, %v4516_v2  ;;  %v3880_v48 = vld [vmem:[#allocation2] sm:$0xff]  ;;  %v1520_v6 = vor.u32 %v5513_v24, %v4402_v10  ;;  %v2063_v1 = vor.u32 %v2062_v21, %v2058_v30  ;;  %v2073_v59 = vor.u32 %v2072_v31, %v4705_v20  ;;  %v2076_v26 = vshll.u32 %v1299_v23, 16 }
 0x11d   : > { %2262 = vst.msk [vmem:[#allocation2 + $0x10] sm:$0xf] %vm2259_vm14, %v4583_v27  ;;  %v2049_v27 = vsel %vm4088_vm11, %v2044_v54, %v2048_v38  ;;  %3741 = vmatmul.msk.bf16.vlgmr.msrb.gmra.mxu2 %vm2426_vm3, %v3880_v48  ;;  %v1578_v38 = vshrl.u32 %v4351_v22, 16  ;;  %v4740_v8 = vpack.c.bf16 %v4734_v14, %v4734_v14  ;;  %v1540_v12 = vrot.slane %v4558_v58, 4 }
 0x11e   : > { %1437 = vst.msk [vmem:[#allocation2 + $0xc] sm:$0xf] %vm1435_vm10, %v1342_v4  ;;  %1379 = vrot.lane.b32.xlu2 %v4653_v29, %s3945_s14  ;;  %1381 = vrot.lane.b32.xlu0 %v4569_v55, %s3945_s14  ;;  %v4707_v55 = vpop.f32.mrf.mxu3  ;;  %v1513_v4 = vrot.slane %v4354_v56, 4  ;;  %v682_v56 = vadd.s32 120, %v4040_v17  ;;  %v544_v48 = vadd.f32 %v4622_v52, %v4635_v32  ;;  %v612_v58 = vmul.f32 0.1, %v541_v57 }
 0x11f   : > { %1797 = vst.msk [vmem:[#allocation2 + $0xc] sm:$0xf] %vm1790_vm15, %v4536_v16  ;;  %v2080_v16 = vshrl.u32 %v1299_v23, 16  ;;  %v695_v23 = vadd.s32 224, %v4040_v17  ;;  %v2090_v41 = vshrl.u32 %v4740_v8, 16  ;;  %v2086_v2 = vshll.u32 %v4740_v8, 16 }
 0x120   : > { %v2160_v54 = vpop.permute.xlu2 %2159  ;;  %v4748_v0 = vsel %vm4507_vm13, %v1513_v4, %v1520_v6  ;;  %v2064_v32 = vrot.slane %v2063_v1, 4  ;;  %v2074_v30 = vrot.slane %v2073_v59, 4  ;;  %v2078_v21 = vrot.slane %v2076_v26, 5 }
 0x121   : > { %2261 = vst.msk [vmem:[#allocation2 + $0xc] sm:$0xf] %vm2259_vm14, %v2160_v54  ;;  %2197 = vrot.lane.b32.xlu1 %v2049_v27, %s3946_s15  ;;  %v4758_v27 = vpack.c.bf16 %v1160_v25, %v1160_v25  ;;  %v2082_v31 = vrot.slane %v2080_v16, 4  ;;  %vm580_vm9 = vcmp.gt.f32.partialorder %v541_v57, 0.0  ;;  %v899_v24 = vand.u32 15, %v695_v23 }
 0x122   : > { %v1346_v37 = vpop.permute.xlu1 %1345  ;;  %vm581_vm6 = vcmp.gt.f32.partialorder %v544_v48, 0.0  ;;  %v4776_v16 = vpack.c.bf16 %v4613_v61, %v4613_v61  ;;  %v1522_v26 = vrot.slane %v4402_v10, 4  ;;  %v2079_v23 = vsel %vm4088_vm11, %v2074_v30, %v2078_v21 }
 0x123   : > { %1439 = vst.msk [vmem:[#allocation2 + $0x14] sm:$0xf] %vm1435_vm10, %v1346_v37  ;;  %v4766_v37 = vrot.slane %v2086_v2, 5  ;;  %v4789_v2 = vsel %vm580_vm9, %v541_v57, %v612_v58  ;;  %vm4804_vm12 = vcmp.ne.s32.totalorder %v899_v24, 0  ;;  %v4815_v58 = vrot.slane %v1578_v38, 7 }
 0x124   : > { %1799 = vst.msk [vmem:[#allocation2 + $0x14] sm:$0xf] %vm1790_vm15, %v4628_v42  ;;  %v1301_v42 = vpack.c.bf16 %v1269_v39, %v1269_v39  ;;  %v2092_v39 = vrot.slane %v2090_v41, 4  ;;  %v2083_v41 = vor.u32 %v2082_v31, %v2078_v21  ;;  %v686_v38 = vadd.s32 152, %v4040_v17 }
 0x125   : > { %2263 = vst.msk [vmem:[#allocation2 + $0x14] sm:$0xf] %vm2259_vm14, %v4649_v49  ;;  %v5514_v49 = vshll.u32 %v4216_v28, 16  ;;  %v613_v28 = vmul.f32 0.1, %v544_v48 }
 0x126   : > { %2199 = vrot.lane.b32.xlu2 %v2059_v11, %s3946_s15  ;;  %1383 = vrot.lane.b32.xlu0 %v4723_v34, %s3945_s14  ;;  %v808_v11 = vand.u32 15, %v682_v56  ;;  %v2100_v4 = vshrl.u32 %v1301_v42, 16  ;;  %v548_v6 = vpop.f32.mrf.mxu3  ;;  %v2096_v61 = vshll.u32 %v1301_v42, 16  ;;  %v2084_v21 = vrot.slane %v2083_v41, 4 }
 0x127   : > { %v1547_v44 = vor.u32 %v5514_v49, %v4262_v15  ;;  %v549_v42 = vadd.f32 %v4622_v52, %v548_v6 }
 0x128   : > { %v2166_v54 = vpop.permute.xlu2 %2165  ;;  %vm4824_vm1 = vcmp.ne.s32.totalorder %v808_v11, 15  ;;  %v2102_v24 = vrot.slane %v2100_v4, 4  ;;  %v2089_v4 = vsel %vm4088_vm11, %v2084_v21, %v4766_v37  ;;  %v1549_v21 = vrot.slane %v4262_v15, 4 }
 0x129   : > { %v4770_v25 = vsel %vm4507_vm13, %v1540_v12, %v1547_v44  ;;  %1385 = vrot.lane.b32.xlu1 %v4657_v45, %s3945_s14  ;;  %v5515_v12 = vshll.u32 %v4143_v40, 16  ;;  %v2069_v45 = vsel %vm4088_vm11, %v2064_v32, %v4705_v20  ;;  %v546_v40 = vadd.f32 %v4622_v52, %v4707_v55 }
 0x12a   : > { %v2158_v1 = vpop.permute.xlu1 %2157  ;;  %v1348_v59 = vpop.permute.xlu0 %1347  ;;  %v4802_v20 = vsel %vm581_vm6, %v544_v48, %v613_v28  ;;  %v4810_v55 = vpack.c.bf16 %v4789_v2, %v4789_v2  ;;  %v1587_v44 = vshrl.u32 %v4758_v27, 16  ;;  %v697_v48 = vadd.s32 240, %v4040_v17 }
 0x12b   : > { %v1529_v56 = vor.u32 %v5515_v12, %v4449_v33  ;;  %2260 = vst.msk [vmem:[#allocation2 + $0x8] sm:$0xf] %vm2259_vm14, %v2158_v1  ;;  %v2093_v33 = vor.u32 %v2092_v39, %v4766_v37  ;;  %v1596_v32 = vshrl.u32 %v4430_v35, 16  ;;  %v1271_v31 = vsel %vm4804_vm12, %v4802_v20, 0.0 }
 0x12c   : > { %1440 = vst.msk [vmem:[#allocation2 + $0x18] sm:$0xf] %vm1435_vm10, %v1348_v59  ;;  %v3899_v10 = vld [vmem:[#allocation2 + $0x10] sm:$0xff]  ;;  %v2098_v28 = vrot.slane %v2096_v61, 5  ;;  %v615_v11 = vmul.f32 0.1, %v549_v42 }
 0x12d   : > { %v4797_v49 = vsel %vm4507_vm13, %v1522_v26, %v1529_v56  ;;  %1800 = vst.msk [vmem:[#allocation2 + $0x18] sm:$0xf] %vm1790_vm15, %v4668_v3  ;;  %v1590_v3 = vshll.u32 %v4758_v27, 16  ;;  %3828 = vmatmul.msk.bf16.vlgmr.msrb.gmra.mxu3 %vm2426_vm3, %v3899_v10  ;;  %v2094_v39 = vrot.slane %v2093_v33, 4  ;;  %v2106_v6 = vshll.u32 %v4810_v55, 16 }
 0x12e   : > { %2264 = vst.msk [vmem:[#allocation2 + $0x18] sm:$0xf] %vm2259_vm14, %v2166_v54  ;;  %2201 = vrot.lane.b32.xlu2 %v2069_v45, %s3946_s15  ;;  %2203 = vrot.lane.b32.xlu0 %v2079_v23, %s3946_s15  ;;  %v614_v54 = vmul.f32 0.1, %v546_v40  ;;  %v2110_v26 = vshrl.u32 %v4810_v55, 16  ;;  %vm583_vm2 = vcmp.gt.f32.partialorder %v549_v42, 0.0  ;;  %v550_v23 = vpop.f32.mrf.mxu3  ;;  %v1303_v33 = vpack.c.bf16 %v1271_v31, %v1271_v31 }
 0x12f   : > { %v913_v12 = vand.u32 15, %v697_v48  ;;  %v4840_v56 = vrot.slane %v1587_v44, 7  ;;  %v836_v45 = vand.u32 15, %v686_v38  ;;  %vm582_vm5 = vcmp.gt.f32.partialorder %v546_v40, 0.0 }
 0x130   : > { %v1354_v27 = vpop.permute.xlu2 %1353  ;;  %v4846_v41 = vrot.slane %v1596_v32, 7  ;;  %v1162_v10 = vsel %vm4824_vm1, %v4311_v46, 0.0  ;;  %v2099_v37 = vsel %vm4088_vm11, %v2094_v39, %v2098_v28  ;;  %v4859_v61 = vsel %vm583_vm2, %v549_v42, %v615_v11 }
 0x131   : > { %1443 = vst.msk [vmem:[#allocation2 + $0x24] sm:$0xf] %vm1435_vm10, %v1354_v27  ;;  %1387 = vrot.lane.b32.xlu1 %v4776_v16, %s3945_s14  ;;  %v2103_v57 = vor.u32 %v2102_v24, %v2098_v28  ;;  %vm1241_vm8 = vcmp.ne.s32.totalorder %v913_v12, 0  ;;  %v2112_v46 = vrot.slane %v2110_v26, 4  ;;  %v4866_v44 = vsel %vm582_vm5, %v546_v40, %v614_v54 }
 0x132   : > { %1803 = vst.msk [vmem:[#allocation2 + $0x24] sm:$0xf] %vm1790_vm15, %v4689_v43  ;;  %v1350_v1 = vpop.permute.xlu1 %1349  ;;  %v3881_v59 = vld [vmem:[#allocation2 + $0x8] sm:$0xff]  ;;  %v1599_v43 = vshll.u32 %v4430_v35, 16  ;;  %v2108_v35 = vrot.slane %v2106_v6, 5  ;;  %v4869_v48 = vadd.s32 136, %v4040_v17  ;;  %v4881_v38 = vpack.c.bf16 %v4685_v13, %v4685_v13 }
 0x133   : > { %1441 = vst.msk [vmem:[#allocation2 + $0x1c] sm:$0xf] %vm1435_vm10, %v1350_v1  ;;  %3717 = vmatmul.msk.bf16.vlgmr.msrb.gmra.mxu1 %vm2426_vm3, %v3881_v59  ;;  %3742 = vmatmul.msk.bf16.gmra.mxu2 %vm2426_vm3, %v3881_v59  ;;  %vm4871_vm9 = vcmp.ne.s32.totalorder %v836_v45, 15  ;;  %v2120_v32 = vshrl.u32 %v1303_v33, 16  ;;  %v1592_v40 = vor.u32 %v1590_v3, %v4840_v56  ;;  %v1273_v27 = vsel %vm1241_vm8, %v4859_v61, 0.0 }
 0x134   : > { %1801 = vst.msk [vmem:[#allocation2 + $0x1c] sm:$0xf] %vm1790_vm15, %v4748_v0  ;;  %v551_v0 = vadd.f32 %v4622_v52, %v550_v23  ;;  %v1585_v52 = vrot.slane %v4815_v58, 4  ;;  %v2104_v31 = vrot.slane %v2103_v57, 4  ;;  %v2116_v54 = vshll.u32 %v1303_v33, 16 }
 0x135   : > { %v5522_v39 = vshll.u32 %v4357_v9, 16  ;;  %v2113_v11 = vor.u32 %v2112_v46, %v2108_v35  ;;  %v698_v24 = vadd.s32 248, %v4040_v17  ;;  %v822_v59 = vand.u32 15, %v4869_v48 }
 0x136   : > { %1389 = vrot.lane.b32.xlu2 %v4740_v8, %s3945_s14  ;;  %2205 = vrot.lane.b32.xlu0 %v2089_v4, %s3946_s15  ;;  %v4877_v8 = vpack.c.bf16 %v4866_v44, %v4866_v44  ;;  %v616_v3 = vmul.f32 0.1, %v551_v0  ;;  %v4896_v15 = vsel %vm4507_vm13, %v1585_v52, %v1592_v40  ;;  %vm584_vm6 = vcmp.gt.f32.partialorder %v551_v0, 0.0 }
 0x137   : > { %v1556_v28 = vor.u32 %v5522_v39, %v4405_v47  ;;  %v1166_v26 = vsel %vm4871_vm9, %v4475_v51, 0.0  ;;  %v920_v12 = vand.u32 15, %v698_v24  ;;  %v4914_v45 = vpack.c.bf16 %v1273_v27, %v1273_v27  ;;  %v3882_v27 = vld [vmem:[#allocation2 + $0x10] sm:$0xff] }
 0x138   : > { %v1356_v30 = vpop.permute.xlu2 %1355  ;;  %v2130_v6 = vshrl.u32 %v4877_v8, 16  ;;  %v2126_v9 = vshll.u32 %v4877_v8, 16  ;;  %v2109_v4 = vsel %vm4088_vm11, %v2104_v31, %v2108_v35  ;;  %v2118_v23 = vrot.slane %v2116_v54, 5 }
 0x139   : > { %1444 = vst.msk [vmem:[#allocation2 + $0x28] sm:$0xf] %vm1435_vm10, %v1356_v30  ;;  %2207 = vrot.lane.b32.xlu1 %v2099_v37, %s3946_s15  ;;  %v4904_v1 = vsel %vm4507_vm13, %v1549_v21, %v1556_v28  ;;  %v1594_v33 = vrot.slane %v4840_v56, 4  ;;  %v648_v51 = vsel %vm584_vm6, %v551_v0, %v616_v3  ;;  %vm1146_vm12 = vcmp.ne.s32.totalorder %v920_v12, 15  ;;  %v1830_v12 = vld [vmem:[#allocation2 + $0x88] sm:$0x1] }
 0x13a   : > { %1804 = vst.msk [vmem:[#allocation2 + $0x28] sm:$0xf] %vm1790_vm15, %v4770_v25  ;;  %v1352_v13 = vpop.permute.xlu1 %1351  ;;  %v4906_v25 = vpack.c.bf16 %v1162_v10, %v1162_v10  ;;  %v2114_v10 = vrot.slane %v2113_v11, 4  ;;  %v2122_v37 = vrot.slane %v2120_v32, 4  ;;  %v4925_v57 = vrot.slane %v2126_v9, 5 }
 0x13b   : > { %1442 = vst.msk [vmem:[#allocation2 + $0x20] sm:$0xf] %vm1435_vm10, %v1352_v13  ;;  %v1178_v46 = vsel %vm1146_vm12, %v648_v51, 0.0  ;;  %v2132_v35 = vrot.slane %v2130_v6, 4  ;;  %vm1828_vm1 = vcmask 57344   ;;  %v1632_v56 = vshrl.u32 %v4546_v18, 16 }
 0x13c   : > { %1802 = vst.msk [vmem:[#allocation2 + $0x20] sm:$0xf] %vm1790_vm15, %v4797_v49  ;;  %v1601_v49 = vor.u32 %v1599_v43, %v4846_v41  ;;  %v4928_v42 = vpack.c.bf16 %v1166_v26, %v1166_v26  ;;  %v4934_v0 = vpack.c.bf16 %v648_v51, %v648_v51  ;;  %v1558_v32 = vrot.slane %v4405_v47, 4  ;;  %vm4965_vm2 = vmand %vm1828_vm1, %vm653_vm4 }
 0x13d   : > { %v5523_v40 = vshll.u32 %v4294_v53, 16  ;;  %v2119_v31 = vsel %vm4088_vm11, %v2114_v10, %v2118_v23  ;;  %v4948_v54 = vpack.c.bf16 %v4802_v20, %v4802_v20  ;;  %v2123_v13 = vor.u32 %v2122_v37, %v2118_v23  ;;  %vm2292_vm1 = vmand %vm2259_vm14, %vm1833_vm7 }
 0x13e   : > { %1391 = vrot.lane.b32.xlu2 %v4881_v38, %s3945_s14  ;;  %1393 = vrot.lane.b32.xlu0 %v4810_v55, %s3945_s14  ;;  %v1210_v55 = vpack.c.bf16 %v1178_v46, %v1178_v46  ;;  %v4938_v43 = vsel %vm4507_vm13, %v1594_v33, %v1601_v49  ;;  %v2133_v11 = vor.u32 %v2132_v35, %v4925_v57  ;;  %v2136_v3 = vshll.u32 %v4914_v45, 16 }
 0x13f   : > { %v1565_v21 = vor.u32 %v5523_v40, %v4562_v63  ;;  %v1641_v53 = vshrl.u32 %v4928_v42, 16  ;;  %v1567_v20 = vrot.slane %v4562_v63, 4  ;;  %v1574_v6 = vor.u32 %v1572_v36, %v4709_v62 }
 0x140   : > { %v4930_v30 = vpop.permute.xlu2 %2175  ;;  %v2168_v52 = vpop.permute.xlu0 %2167  ;;  %v1749_v39 = vshrl.u32 %v1210_v55, 16  ;;  %v1752_v28 = vshll.u32 %v1210_v55, 16  ;;  %v2140_v26 = vshrl.u32 %v4914_v45, 16  ;;  %v2150_v23 = vshrl.u32 %v4934_v0, 16 }
 0x141   : > { %2265 = vst.msk [vmem:[#allocation2 + $0x1c] sm:$0xf] %vm2259_vm14, %v2168_v52  ;;  %2209 = vrot.lane.b32.xlu1 %v2109_v4, %s3946_s15  ;;  %v4954_v47 = vsel %vm4507_vm13, %v1558_v32, %v1565_v21  ;;  %v2146_v4 = vshll.u32 %v4934_v0, 16  ;;  %v1576_v33 = vrot.slane %v4709_v62, 4  ;;  %v4980_v36 = vsel %vm4507_vm13, %v1567_v20, %v1574_v6 }
 0x142   : > { %v1751_v24 = vrot.slane %v1749_v39, 7  ;;  %v1583_v45 = vor.u32 %v1581_v5, %v4815_v58  ;;  %v2124_v10 = vrot.slane %v2123_v13, 4  ;;  %v2134_v51 = vrot.slane %v2133_v11, 4  ;;  %v5528_v39 = vld [vmem:[#allocation3_spill] sm:$0xff] }
 0x143   : > { %3718 = vmatmul.msk.bf16.gmra.mxu1 %vm2426_vm3, %v3882_v27  ;;  %3743 = vmatmul.msk.bf16.gmra.mxu2 %vm2426_vm3, %v3882_v27  ;;  %v2138_v49 = vrot.slane %v2136_v3, 5  ;;  %v4985_v62 = vrot.slane %v1641_v53, 7  ;;  %v1644_v37 = vshll.u32 %v4928_v42, 16  ;;  %v1605_v22 = vshrl.u32 %v4906_v25, 16 }
 0x144   : > { %v4976_v63 = vor.u32 %v1752_v28, %v1751_v24  ;;  %v1756_v60 = vrot.slane %v1751_v24, 4  ;;  %v4994_v32 = vsel %vm4507_vm13, %v1576_v33, %v1583_v45  ;;  %vm4999_vm4 = vcmp.ne.s32.totalorder %v822_v59, 15  ;;  %v5529_v24 = vld [vmem:[#allocation4_spill] sm:$0xff] }
 0x145   : > { %v5006_v58 = vrot.slane %v1632_v56, 7  ;;  %v2148_v42 = vrot.slane %v2146_v4, 5  ;;  %v2152_v40 = vrot.slane %v2150_v23, 4  ;;  %v2142_v21 = vrot.slane %v2140_v26, 4 }
 0x146   : > { %2211 = vrot.lane.b32.xlu2 %v2119_v31, %s3946_s15  ;;  %1395 = vrot.lane.b32.xlu0 %v4948_v54, %s3945_s14  ;;  %v1831_v55 = vsel %vm4965_vm2, %v1756_v60, %v1830_v12  ;;  %v2129_v48 = vsel %vm4088_vm11, %v2124_v10, %v4925_v57  ;;  %v2139_v59 = vsel %vm4088_vm11, %v2134_v51, %v2138_v49  ;;  %v1608_v31 = vshll.u32 %v4906_v25, 16 }
 0x147   : > { %1832 = vst [vmem:[#allocation2 + $0x88] sm:$0x1] %v1831_v55  ;;  %v1646_v56 = vor.u32 %v1644_v37, %v4985_v62  ;;  %v1164_v28 = vsel %vm4999_vm4, %v5528_v39, 0.0  ;;  %v1650_v13 = vshrl.u32 %v4653_v29, 16  ;;  %v1607_v11 = vrot.slane %v1605_v22, 7 }
 0x148   : > { %v4988_v46 = vpop.permute.xlu2 %2177  ;;  %v2170_v35 = vpop.permute.xlu0 %2169  ;;  %v3900_v52 = vld [vmem:[#allocation2 + $0x18] sm:$0xff]  ;;  %v2153_v57 = vor.u32 %v2152_v40, %v2148_v42  ;;  %v2143_v3 = vor.u32 %v2142_v21, %v2138_v49  ;;  %v1614_v20 = vshrl.u32 %v5529_v24, 16  ;;  %v1196_v25 = vpack.c.bf16 %v1164_v28, %v1164_v28 }
 0x149   : > { %2266 = vst.msk [vmem:[#allocation2 + $0x20] sm:$0xf] %vm2259_vm14, %v2170_v35  ;;  %1397 = vrot.lane.b32.xlu1 %v4877_v8, %s3945_s14  ;;  %3829 = vmatmul.msk.bf16.gmra.mxu3 %vm2426_vm3, %v3900_v52  ;;  %v1639_v8 = vrot.slane %v5006_v58, 4  ;;  %v5029_v26 = vrot.slane %v1650_v13, 7  ;;  %v1653_v12 = vshll.u32 %v4653_v29, 16  ;;  %v692_v4 = vadd.s32 200, %v4040_v17 }
 0x14a   : > { %v5038_v23 = vpack.c.bf16 %v4859_v61, %v4859_v61  ;;  %v3883_v33 = vld [vmem:[#allocation2 + $0x18] sm:$0xff]  ;;  %v2154_v60 = vrot.slane %v2153_v57, 4  ;;  %v2144_v45 = vrot.slane %v2143_v3, 4  ;;  %v1603_v10 = vrot.slane %v4846_v41, 4  ;;  %v5530_v13 = vld [vmem:[#allocation5_spill] sm:$0xff] }
 0x14b   : > { %v2172_v27 = vpop.permute.xlu1 %2171  ;;  %v5026_v53 = vsel %vm4507_vm13, %v1639_v8, %v1646_v56  ;;  %v1610_v29 = vor.u32 %v1608_v31, %v1607_v11  ;;  %v1616_v49 = vrot.slane %v1614_v20, 7  ;;  %v1617_v37 = vshll.u32 %v5529_v24, 16 }
 0x14c   : > { %2267 = vst.msk [vmem:[#allocation2 + $0x24] sm:$0xf] %vm2259_vm14, %v2172_v27  ;;  %v878_v41 = vand.u32 15, %v692_v4  ;;  %v1655_v35 = vor.u32 %v1653_v12, %v5029_v26  ;;  %v688_v52 = vadd.s32 168, %v4040_v17  ;;  %v1612_v40 = vrot.slane %v1607_v11, 4 }
 0x14d   : > { %v5051_v61 = vsel %vm4507_vm13, %v1603_v10, %v1610_v29  ;;  %v1619_v21 = vor.u32 %v1617_v37, %v1616_v49  ;;  %v690_v57 = vadd.s32 184, %v4040_v17  ;;  %v1686_v20 = vshrl.u32 %v4776_v16, 16 }
 0x14e   : > { %2213 = vrot.lane.b32.xlu2 %v2129_v48, %s3946_s15  ;;  %2215 = vrot.lane.b32.xlu0 %v2139_v59, %s3946_s15  ;;  %v1626_v48 = vshll.u32 %v1196_v25, 16  ;;  %v1635_v59 = vshll.u32 %v4546_v18, 16  ;;  %vm3127_vm12 = vcmask 64512  }
 0x14f   : > { %v5075_v7 = vsel %vm4507_vm13, %v1612_v40, %v1619_v21  ;;  %v1707_v40 = vshll.u32 %v4881_v38, 16  ;;  %v1657_v21 = vrot.slane %v5029_v26, 4 }
 0x150   : > { %v1366_v6 = vpop.permute.xlu2 %1365  ;;  %v1358_v9 = vpop.permute.xlu0 %1357 }
 0x151   : > { %1449 = vst.msk [vmem:[#allocation2 + $0x3c] sm:$0xf] %vm1435_vm10, %v1366_v6  ;;  %1401 = vrot.lane.b32.xlu1 %v4934_v0, %s3945_s14  ;;  %v1648_v0 = vrot.slane %v4985_v62, 4 }
 0x152   : > { %1809 = vst.msk [vmem:[#allocation2 + $0x3c] sm:$0xf] %vm1790_vm15, %v4896_v15  ;;  %v1623_v15 = vshrl.u32 %v1196_v25, 16  ;;  %v864_v25 = vand.u32 15, %v690_v57 }
 0x153   : > { %1445 = vst.msk [vmem:[#allocation2 + $0x2c] sm:$0xf] %vm1435_vm10, %v1358_v9  ;;  %v2174_v51 = vpop.permute.xlu1 %2173  ;;  %3719 = vmatmul.msk.bf16.gmra.mxu1 %vm2426_vm3, %v3883_v33  ;;  %3744 = vmatmul.msk.bf16.gmra.mxu2 %vm2426_vm3, %v3883_v33  ;;  %v5066_v5 = vsel %vm4507_vm13, %v1648_v0, %v1655_v35  ;;  %v3884_v28 = vld [vmem:[#allocation2 + $0x20] sm:$0xff] }
 0x154   : > { %1805 = vst.msk [vmem:[#allocation2 + $0x2c] sm:$0xf] %vm1790_vm15, %v4904_v1  ;;  %v2149_v1 = vsel %vm4088_vm11, %v2144_v45, %v2148_v42  ;;  %v1625_v27 = vrot.slane %v1623_v15, 7  ;;  %vm1140_vm11 = vcmp.ne.s32.totalorder %v878_v41, 15  ;;  %v850_v42 = vand.u32 15, %v688_v52 }
 0x155   : > { %2269 = vst.msk [vmem:[#allocation2 + $0x2c] sm:$0xf] %vm2259_vm14, %v4930_v30  ;;  %v3901_v30 = vld [vmem:[#allocation2 + $0x20] sm:$0xff]  ;;  %v1172_v8 = vsel %vm1140_vm11, %v4734_v14, 0.0  ;;  %v5108_v45 = vrot.slane %v1686_v20, 7  ;;  %vm1138_vm8 = vcmp.ne.s32.totalorder %v864_v25, 15 }
 0x156   : > { %2268 = vst.msk [vmem:[#allocation2 + $0x28] sm:$0xf] %vm2259_vm14, %v2174_v51  ;;  %1399 = vrot.lane.b32.xlu2 %v5038_v23, %s3945_s14  ;;  %2219 = vrot.lane.b32.xlu0 %v2154_v60, %s3946_s15  ;;  %v1628_v56 = vor.u32 %v1626_v48, %v1625_v27  ;;  %vm1136_vm5 = vcmp.ne.s32.totalorder %v850_v42, 15  ;;  %v1630_v14 = vrot.slane %v1625_v27, 4  ;;  %v1170_v41 = vsel %vm1138_vm8, %v4641_v19, 0.0 }
 0x157   : > { %v1168_v11 = vsel %vm1136_vm5, %v5530_v13, 0.0  ;;  %v1693_v29 = vrot.slane %v5108_v45, 4  ;;  %v1671_v42 = vshll.u32 %v4723_v34, 16 }
 0x158   : > { %v1368_v55 = vpop.permute.xlu2 %1367  ;;  %v1360_v22 = vpop.permute.xlu0 %1359 }
 0x159   : > { %1450 = vst.msk [vmem:[#allocation2 + $0x40] sm:$0xf] %vm1435_vm10, %v1368_v55  ;;  %2217 = vrot.lane.b32.xlu1 %v2149_v1, %s3946_s15  ;;  %3830 = vmatmul.msk.bf16.gmra.mxu3 %vm2426_vm3, %v3901_v30  ;;  %v1704_v1 = vshrl.u32 %v4881_v38, 16  ;;  %v1668_v55 = vshrl.u32 %v4723_v34, 16 }
 0x15a   : > { %1810 = vst.msk [vmem:[#allocation2 + $0x40] sm:$0xf] %vm1790_vm15, %v4938_v43  ;;  %v1621_v43 = vrot.slane %v1616_v49, 4 }
 0x15b   : > { %1446 = vst.msk [vmem:[#allocation2 + $0x30] sm:$0xf] %vm1435_vm10, %v1360_v22  ;;  %v1362_v62 = vpop.permute.xlu1 %1361  ;;  %v1202_v22 = vpack.c.bf16 %v1170_v41, %v1170_v41  ;;  %v5125_v30 = vrot.slane %v1704_v1, 7  ;;  %v1670_v26 = vrot.slane %v1668_v55, 7  ;;  %v1722_v55 = vshrl.u32 %v4948_v54, 16 }
 0x15c   : > { %1806 = vst.msk [vmem:[#allocation2 + $0x30] sm:$0xf] %vm1790_vm15, %v4954_v47  ;;  %v5089_v31 = vsel %vm4507_vm13, %v1621_v43, %v1628_v56  ;;  %v1204_v47 = vpack.c.bf16 %v1172_v8, %v1172_v8 }
 0x15d   : > { %2270 = vst.msk [vmem:[#allocation2 + $0x30] sm:$0xf] %vm2259_vm14, %v4988_v46  ;;  %v1637_v46 = vor.u32 %v1635_v59, %v5006_v58  ;;  %v1200_v58 = vpack.c.bf16 %v1168_v11, %v1168_v11  ;;  %v3902_v33 = vld [vmem:[#allocation2 + $0x28] sm:$0xff]  ;;  %v1709_v8 = vor.u32 %v1707_v40, %v5125_v30  ;;  %v1711_v40 = vrot.slane %v5125_v30, 4 }
 0x15e   : > { %1447 = vst.msk [vmem:[#allocation2 + $0x34] sm:$0xf] %vm1435_vm10, %v1362_v62  ;;  %v1695_v24 = vshrl.u32 %v1204_v47, 16  ;;  %v1698_v9 = vshll.u32 %v1204_v47, 16  ;;  %v3885_v19 = vld [vmem:[#allocation2 + $0x28] sm:$0xff]  ;;  %v696_v62 = vadd.s32 232, %v4040_v17 }
 0x15f   : > { %1807 = vst.msk [vmem:[#allocation2 + $0x34] sm:$0xf] %vm1790_vm15, %v4980_v36  ;;  %v5097_v36 = vsel %vm4507_vm13, %v1630_v14, %v1637_v46  ;;  %v1659_v60 = vshrl.u32 %v1200_v58, 16  ;;  %v1662_v49 = vshll.u32 %v1200_v58, 16 }
 0x160   : > { %v2188_v39 = vpop.permute.xlu2 %2187  ;;  %v2180_v18 = vpop.permute.xlu0 %2179  ;;  %v1697_v6 = vrot.slane %v1695_v24, 7  ;;  %v906_v43 = vand.u32 15, %v696_v62 }
 0x161   : > { %2271 = vst.msk [vmem:[#allocation2 + $0x34] sm:$0xf] %vm2259_vm14, %v2180_v18  ;;  %v1661_v15 = vrot.slane %v1659_v60, 7 }
 0x162   : > { %v1700_v51 = vor.u32 %v1698_v9, %v1697_v6  ;;  %v1702_v59 = vrot.slane %v1697_v6, 4 }
 0x163   : > { %v1364_v3 = vpop.permute.xlu1 %1363  ;;  %3720 = vmatmul.msk.bf16.gmra.mxu1 %vm2426_vm3, %v3884_v28  ;;  %3745 = vmatmul.msk.bf16.gmra.mxu2 %vm2426_vm3, %v3884_v28  ;;  %v1664_v27 = vor.u32 %v1662_v49, %v1661_v15  ;;  %v1666_v34 = vrot.slane %v1661_v15, 4  ;;  %v1673_v28 = vor.u32 %v1671_v42, %v1670_v26 }
 0x164   : > { %1448 = vst.msk [vmem:[#allocation2 + $0x38] sm:$0xf] %vm1435_vm10, %v1364_v3  ;;  %v5121_v0 = vsel %vm4507_vm13, %v1693_v29, %v1700_v51  ;;  %v5148_v14 = vsel %vm4507_vm13, %v1702_v59, %v1709_v8  ;;  %v1689_v3 = vshll.u32 %v4776_v16, 16 }
 0x165   : > { %1808 = vst.msk [vmem:[#allocation2 + $0x38] sm:$0xf] %vm1790_vm15, %v4994_v32  ;;  %v3122_v32 = vld [vmem:[%s5465_s5] sm:$0xf]  ;;  %v5139_v38 = vsel %vm4507_vm13, %v1657_v21, %v1664_v27  ;;  %v5159_v11 = vsel %vm4507_vm13, %v1666_v34, %v1673_v28 }
 0x166   : > { %v3177_v37 = vsel %vm2475_vm0, %v3122_v32, 0  ;;  %vm1144_vm0 = vcmp.ne.s32.totalorder %v906_v43, 15  ;;  %v1691_v9 = vor.u32 %v1689_v3, %v5108_v45  ;;  %v1743_v45 = vshll.u32 %v5038_v23, 16 }
 0x167   : > { %3186 = vmatpush.bf16.msrb.mxu0 %v3177_v37  ;;  %v1176_v24 = vsel %vm1144_vm0, %v4866_v44, 0.0 }
 0x168   : > { %v5105_v12 = vpop.permute.xlu2 %2189  ;;  %v2182_v4 = vpop.permute.xlu0 %2181  ;;  %v3903_v18 = vld [vmem:[#allocation2 + $0x30] sm:$0xff]  ;;  %v5173_v25 = vpack.c.bf16 %v1176_v24, %v1176_v24 }
 0x169   : > { %2272 = vst.msk [vmem:[#allocation2 + $0x38] sm:$0xf] %vm2259_vm14, %v2182_v4  ;;  %3831 = vmatmul.msk.bf16.gmra.mxu3 %vm2426_vm3, %v3902_v33  ;;  %v3886_v6 = vld [vmem:[#allocation2 + $0x30] sm:$0xff] }
 0x16a   : > { %v1731_v60 = vshrl.u32 %v5173_v25, 16  ;;  %v1734_v59 = vshll.u32 %v5173_v25, 16  ;;  %v5249_v25 = vld [vmem:[%s5464_s4] ss:$0 sm:$0xff] }
 0x16b   : > { %v2184_v10 = vpop.permute.xlu1 %2183 }
 0x16c   : > { %2273 = vst.msk [vmem:[#allocation2 + $0x3c] sm:$0xf] %vm2259_vm14, %v2184_v10  ;;  %v1733_v49 = vrot.slane %v1731_v60, 7 }
 0x16e   : > { %v1738_v15 = vrot.slane %v1733_v49, 4 }
 0x170   : > { %v1378_v35 = vpop.permute.xlu2 %1377  ;;  %v1370_v52 = vpop.permute.xlu0 %1369 }
 0x171   : > { %1455 = vst.msk [vmem:[#allocation2 + $0x54] sm:$0xf] %vm1435_vm10, %v1378_v35 }
 0x172   : > { %1815 = vst.msk [vmem:[#allocation2 + $0x54] sm:$0xf] %vm1790_vm15, %v5026_v53  ;;  %v1677_v53 = vshrl.u32 %v1202_v22, 16 }
 0x173   : > { %1451 = vst.msk [vmem:[#allocation2 + $0x44] sm:$0xf] %vm1435_vm10, %v1370_v52  ;;  %v2186_v48 = vpop.permute.xlu1 %2185  ;;  %3721 = vmatmul.msk.bf16.gmra.mxu1 %vm2426_vm3, %v3885_v19  ;;  %3746 = vmatmul.msk.bf16.gmra.mxu2 %vm2426_vm3, %v3885_v19  ;;  %v3904_v29 = vld [vmem:[#allocation2 + $0x38] sm:$0xff] }
 0x174   : > { %1811 = vst.msk [vmem:[#allocation2 + $0x44] sm:$0xf] %vm1790_vm15, %v5051_v61  ;;  %v694_v61 = vadd.s32 216, %v4040_v17  ;;  %v1679_v46 = vrot.slane %v1677_v53, 7 }
 0x175   : > { %2275 = vst.msk [vmem:[#allocation2 + $0x44] sm:$0xf] %vm2259_vm14, %v2188_v39  ;;  %v1680_v39 = vshll.u32 %v1202_v22, 16  ;;  %v3887_v22 = vld [vmem:[#allocation2 + $0x38] sm:$0xff] }
 0x176   : > { %2274 = vst.msk [vmem:[#allocation2 + $0x40] sm:$0xf] %vm2259_vm14, %v2186_v48  ;;  %v892_v13 = vand.u32 15, %v694_v61  ;;  %v1684_v16 = vrot.slane %v1679_v46, 4  ;;  %v1725_v48 = vshll.u32 %v4948_v54, 16 }
 0x177   : > { %v1682_v57 = vor.u32 %v1680_v39, %v1679_v46 }
 0x178   : > { %v1380_v56 = vpop.permute.xlu2 %1379  ;;  %v1372_v47 = vpop.permute.xlu0 %1371  ;;  %vm1142_vm9 = vcmp.ne.s32.totalorder %v892_v13, 15  ;;  %v5183_v4 = vsel %vm4507_vm13, %v1684_v16, %v1691_v9 }
 0x179   : > { %1456 = vst.msk [vmem:[#allocation2 + $0x58] sm:$0xf] %vm1435_vm10, %v1380_v56  ;;  %3832 = vmatmul.msk.bf16.gmra.mxu3 %vm2426_vm3, %v3903_v18  ;;  %v1174_v44 = vsel %vm1142_vm9, %v4789_v2, 0.0  ;;  %v1736_v18 = vor.u32 %v1734_v59, %v1733_v49 }
 0x17a   : > { %1816 = vst.msk [vmem:[#allocation2 + $0x58] sm:$0xf] %vm1790_vm15, %v5066_v5  ;;  %v1675_v5 = vrot.slane %v1670_v26, 4  ;;  %v1206_v33 = vpack.c.bf16 %v1174_v44, %v1174_v44 }
 0x17b   : > { %1452 = vst.msk [vmem:[#allocation2 + $0x48] sm:$0xf] %vm1435_vm10, %v1372_v47  ;;  %v1374_v17 = vpop.permute.xlu1 %1373 }
 0x17c   : > { %1812 = vst.msk [vmem:[#allocation2 + $0x48] sm:$0xf] %vm1790_vm15, %v5075_v7  ;;  %v5170_v7 = vsel %vm4507_vm13, %v1675_v5, %v1682_v57  ;;  %v1713_v51 = vshrl.u32 %v1206_v33, 16  ;;  %v1716_v1 = vshll.u32 %v1206_v33, 16 }
 0x17d   : > { %2276 = vst.msk [vmem:[#allocation2 + $0x48] sm:$0xf] %vm2259_vm14, %v5105_v12  ;;  %v3905_v53 = vld [vmem:[#allocation2 + $0x40] sm:$0xff] }
 0x17e   : > { %1453 = vst.msk [vmem:[#allocation2 + $0x4c] sm:$0xf] %vm1435_vm10, %v1374_v17  ;;  %v1715_v41 = vrot.slane %v1713_v51, 7  ;;  %v3888_v56 = vld [vmem:[#allocation2 + $0x40] sm:$0xff] }
 0x17f   : > { %1813 = vst.msk [vmem:[#allocation2 + $0x4c] sm:$0xf] %vm1790_vm15, %v5089_v31  ;;  %v1740_v31 = vshrl.u32 %v5038_v23, 16 }
 0x180   : > { %v2200_v58 = vpop.permute.xlu2 %2199  ;;  %v2192_v20 = vpop.permute.xlu0 %2191  ;;  %v1718_v19 = vor.u32 %v1716_v1, %v1715_v41 }
 0x181   : > { %2277 = vst.msk [vmem:[#allocation2 + $0x4c] sm:$0xf] %vm2259_vm14, %v2192_v20  ;;  %v1742_v2 = vrot.slane %v1740_v31, 7 }
 0x182   : > { %v1719_v27 = vsel %vm4507_vm13, %v1711_v40, %v1718_v19 }
 0x183   : > { %v1376_v12 = vpop.permute.xlu1 %1375  ;;  %3722 = vmatmul.msk.bf16.gmra.mxu1 %vm2426_vm3, %v3886_v6  ;;  %3747 = vmatmul.msk.bf16.gmra.mxu2 %vm2426_vm3, %v3886_v6  ;;  %v1747_v8 = vrot.slane %v1742_v2, 4 }
 0x184   : > { %1454 = vst.msk [vmem:[#allocation2 + $0x50] sm:$0xf] %vm1435_vm10, %v1376_v12 }
 0x185   : > { %1814 = vst.msk [vmem:[#allocation2 + $0x50] sm:$0xf] %vm1790_vm15, %v5097_v36  ;;  %v1745_v36 = vor.u32 %v1743_v45, %v1742_v2 }
 0x187   : > { %v1746_v35 = vsel %vm4507_vm13, %v1738_v15, %v1745_v36 }
 0x188   : > { %v2202_v10 = vpop.permute.xlu2 %2201  ;;  %v2194_v32 = vpop.permute.xlu0 %2193  ;;  %v3906_v13 = vld [vmem:[#allocation2 + $0x48] sm:$0xff] }
 0x189   : > { %2278 = vst.msk [vmem:[#allocation2 + $0x50] sm:$0xf] %vm2259_vm14, %v2194_v32  ;;  %3833 = vmatmul.msk.bf16.gmra.mxu3 %vm2426_vm3, %v3904_v29 }
 0x18b   : > { %v2196_v37 = vpop.permute.xlu1 %2195 }
 0x18c   : > { %2279 = vst.msk [vmem:[#allocation2 + $0x54] sm:$0xf] %vm2259_vm14, %v2196_v37 }
 0x190   : > { %v1390_v23 = vpop.permute.xlu2 %1389  ;;  %v1382_v52 = vpop.permute.xlu0 %1381 }
 0x191   : > { %1461 = vst.msk [vmem:[#allocation2 + $0x6c] sm:$0xf] %vm1435_vm10, %v1390_v23 }
 0x192   : > { %1821 = vst.msk [vmem:[#allocation2 + $0x6c] sm:$0xf] %vm1790_vm15, %v5121_v0  ;;  %v1724_v0 = vrot.slane %v1722_v55, 7 }
 0x193   : > { %1457 = vst.msk [vmem:[#allocation2 + $0x5c] sm:$0xf] %vm1435_vm10, %v1382_v52  ;;  %v2198_v21 = vpop.permute.xlu1 %2197  ;;  %3723 = vmatmul.msk.bf16.gmra.mxu1 %vm2426_vm3, %v3887_v22  ;;  %3748 = vmatmul.msk.bf16.gmra.mxu2 %vm2426_vm3, %v3887_v22  ;;  %v3907_v9 = vld [vmem:[#allocation2 + $0x50] sm:$0xff] }
 0x194   : > { %1817 = vst.msk [vmem:[#allocation2 + $0x5c] sm:$0xf] %vm1790_vm15, %v5139_v38  ;;  %v1720_v38 = vrot.slane %v1715_v41, 4  ;;  %v1727_v26 = vor.u32 %v1725_v48, %v1724_v0  ;;  %v1729_v47 = vrot.slane %v1724_v0, 4  ;;  %v3890_v15 = vld [vmem:[#allocation2 + $0x50] sm:$0xff] }
 0x195   : > { %2281 = vst.msk [vmem:[#allocation2 + $0x5c] sm:$0xf] %vm2259_vm14, %v2200_v58 }
 0x196   : > { %2280 = vst.msk [vmem:[#allocation2 + $0x58] sm:$0xf] %vm2259_vm14, %v2198_v21  ;;  %v1728_v54 = vsel %vm4507_vm13, %v1720_v38, %v1727_v26  ;;  %v1737_v39 = vsel %vm4507_vm13, %v1729_v47, %v1736_v18 }
 0x198   : > { %v1392_v30 = vpop.permute.xlu2 %1391  ;;  %v1384_v62 = vpop.permute.xlu0 %1383 }
 0x199   : > { %1462 = vst.msk [vmem:[#allocation2 + $0x70] sm:$0xf] %vm1435_vm10, %v1392_v30  ;;  %3834 = vmatmul.msk.bf16.gmra.mxu3 %vm2426_vm3, %v3905_v53 }
 0x19a   : > { %1822 = vst.msk [vmem:[#allocation2 + $0x70] sm:$0xf] %vm1790_vm15, %v5148_v14  ;;  %v5227_v14 = vsel %vm4507_vm13, %v1747_v8, %v4976_v63 }
 0x19b   : > { %1458 = vst.msk [vmem:[#allocation2 + $0x60] sm:$0xf] %vm1435_vm10, %v1384_v62  ;;  %v1386_v42 = vpop.permute.xlu1 %1385 }
 0x19c   : > { %1818 = vst.msk [vmem:[#allocation2 + $0x60] sm:$0xf] %vm1790_vm15, %v5159_v11 }
 0x19d   : > { %2282 = vst.msk [vmem:[#allocation2 + $0x60] sm:$0xf] %vm2259_vm14, %v2202_v10  ;;  %v3891_v30 = vld [vmem:[#allocation2 + $0x58] sm:$0xff] }
 0x19e   : > { %1459 = vst.msk [vmem:[#allocation2 + $0x64] sm:$0xf] %vm1435_vm10, %v1386_v42 }
 0x19f   : > { %1819 = vst.msk [vmem:[#allocation2 + $0x64] sm:$0xf] %vm1790_vm15, %v5170_v7  ;;  %v3889_v7 = vld [vmem:[#allocation2 + $0x48] sm:$0xff] }
 0x1a0   : > { %v2212_v61 = vpop.permute.xlu2 %2211  ;;  %v2204_v43 = vpop.permute.xlu0 %2203 }
 0x1a1   : > { %2283 = vst.msk [vmem:[#allocation2 + $0x64] sm:$0xf] %vm2259_vm14, %v2204_v43  ;;  %v2597_v34 = vpop.f32.mrf.mxu2 }
 0x1a3   : > { %v1388_v46 = vpop.permute.xlu1 %1387  ;;  %3724 = vmatmul.msk.bf16.gmra.mxu1 %vm2426_vm3, %v3888_v56  ;;  %3749 = vmatmul.msk.bf16.gmra.mxu2 %vm2426_vm3, %v3888_v56 }
 0x1a4   : > { %1460 = vst.msk [vmem:[#allocation2 + $0x68] sm:$0xf] %vm1435_vm10, %v1388_v46 }
 0x1a5   : > { %1820 = vst.msk [vmem:[#allocation2 + $0x68] sm:$0xf] %vm1790_vm15, %v5183_v4 }
 0x1a8   : > { %v2214_v28 = vpop.permute.xlu2 %2213  ;;  %v2206_v17 = vpop.permute.xlu0 %2205  ;;  %v3909_v8 = vld [vmem:[#allocation2 + $0x60] sm:$0xff] }
 0x1a9   : > { %2284 = vst.msk [vmem:[#allocation2 + $0x68] sm:$0xf] %vm2259_vm14, %v2206_v17  ;;  %3835 = vmatmul.msk.bf16.gmra.mxu3 %vm2426_vm3, %v3906_v13  ;;  %v2599_v11 = vpop.f32.mrf.mxu2  ;;  %v3892_v17 = vld [vmem:[#allocation2 + $0x60] sm:$0xff] }
 0x1ab   : > { %v2208_v63 = vpop.permute.xlu1 %2207 }
 0x1ac   : > { %2285 = vst.msk [vmem:[#allocation2 + $0x6c] sm:$0xf] %vm2259_vm14, %v2208_v63 }
 0x1b0   : > { %v1400_v5 = vpop.permute.xlu2 %1399  ;;  %v1394_v57 = vpop.permute.xlu0 %1393 }
 0x1b1   : > { %1466 = vst.msk [vmem:[#allocation2 + $0x80] sm:$0xf] %vm1435_vm10, %v1400_v5  ;;  %v2488_v50 = vpop.f32.mrf.mxu1  ;;  %v2862_v24 = vpop.f32.mrf.mxu3 }
 0x1b2   : > { %1826 = vst.msk [vmem:[#allocation2 + $0x80] sm:$0xf] %vm1790_vm15, %v1746_v35  ;;  %v2598_v3 = vadd.f32 %v2597_v34, %v2488_v50  ;;  %v3908_v35 = vld [vmem:[#allocation2 + $0x58] sm:$0xff] }
 0x1b3   : > { %1463 = vst.msk [vmem:[#allocation2 + $0x74] sm:$0xf] %vm1435_vm10, %v1394_v57  ;;  %v2210_v58 = vpop.permute.xlu1 %2209  ;;  %3725 = vmatmul.msk.bf16.gmra.mxu1 %vm2426_vm3, %v3889_v7  ;;  %3750 = vmatmul.msk.bf16.gmra.mxu2 %vm2426_vm3, %v3889_v7 }
 0x1b4   : > { %1823 = vst.msk [vmem:[#allocation2 + $0x74] sm:$0xf] %vm1790_vm15, %v1719_v27  ;;  %v2942_v20 = vadd.f32 %v2862_v24, %v2598_v3  ;;  %v3910_v24 = vld [vmem:[#allocation2 + $0x68] sm:$0xff] }
 0x1b5   : > { %2287 = vst.msk [vmem:[#allocation2 + $0x74] sm:$0xf] %vm2259_vm14, %v2212_v61 }
 0x1b6   : > { %2286 = vst.msk [vmem:[#allocation2 + $0x70] sm:$0xf] %vm2259_vm14, %v2210_v58  ;;  %v2602_v6 = vpop.f32.mrf.mxu2  ;;  %v2978_v12 = vadd.f32 %v5249_v25, %v2942_v20 }
 0x1b8   : > { %v1396_v16 = vpop.permute.xlu0 %1395  ;;  %v3042_v2 = vmul.f32 0.1, %v2978_v12  ;;  %vm3010_vm13 = vcmp.gt.f32.partialorder %v2978_v12, 0.0 }
 0x1b9   : > { %1464 = vst.msk [vmem:[#allocation2 + $0x78] sm:$0xf] %vm1435_vm10, %v1396_v16  ;;  %v2490_v44 = vpop.f32.mrf.mxu1  ;;  %3836 = vmatmul.msk.bf16.gmra.mxu3 %vm2426_vm3, %v3907_v9  ;;  %v2864_v4 = vpop.f32.mrf.mxu3 }
 0x1ba   : > { %1824 = vst.msk [vmem:[#allocation2 + $0x78] sm:$0xf] %vm1790_vm15, %v1728_v54  ;;  %v2600_v31 = vadd.f32 %v2599_v11, %v2490_v44  ;;  %v3074_v49 = vsel %vm3010_vm13, %v2978_v12, %v3042_v2 }
 0x1bb   : > { %2288 = vst.msk [vmem:[#allocation2 + $0x78] sm:$0xf] %vm2259_vm14, %v2214_v28  ;;  %v1398_v33 = vpop.permute.xlu1 %1397 }
 0x1bc   : > { %v2943_v60 = vadd.f32 %v2864_v4, %v2600_v31  ;;  %1465 = vst.msk [vmem:[#allocation2 + $0x7c] sm:$0xf] %vm1435_vm10, %v1398_v33  ;;  %v3893_v33 = vld [vmem:[#allocation2 + $0x68] sm:$0xff] }
 0x1bd   : > { %1825 = vst.msk [vmem:[#allocation2 + $0x7c] sm:$0xf] %vm1790_vm15, %v1737_v39 }
 0x1be   : > { %v2979_v45 = vadd.f32 %v5249_v25, %v2943_v60  ;;  %v2604_v10 = vpop.f32.mrf.mxu2 }
 0x1c0   : > { %vm3011_vm6 = vcmp.gt.f32.partialorder %v2979_v45, 0.0  ;;  %v3043_v32 = vmul.f32 0.1, %v2979_v45  ;;  %v2216_v29 = vpop.permute.xlu0 %2215 }
 0x1c1   : > { %v2493_v51 = vpop.f32.mrf.mxu1  ;;  %2289 = vst.msk [vmem:[#allocation2 + $0x7c] sm:$0xf] %vm2259_vm14, %v2216_v29 }
 0x1c2   : > { %v3075_v37 = vsel %vm3011_vm6, %v2979_v45, %v3043_v32  ;;  %v2603_v21 = vadd.f32 %v2602_v6, %v2493_v51 }
 0x1c3   : > { %v1402_v36 = vpop.permute.xlu1 %1401  ;;  %v3106_v41 = vpack.c.bf16 %v3075_v37, %v3074_v49  ;;  %3726 = vmatmul.msk.bf16.gmra.mxu1 %vm2426_vm3, %v3890_v15  ;;  %3751 = vmatmul.msk.bf16.gmra.mxu2 %vm2426_vm3, %v3890_v15  ;;  %v3911_v49 = vld [vmem:[#allocation2 + $0x70] sm:$0xff] }
 0x1c4   : > { %1467 = vst.msk [vmem:[#allocation2 + $0x84] sm:$0xf] %vm1435_vm10, %v1402_v36 }
 0x1c5   : > { %1827 = vst.msk [vmem:[#allocation2 + $0x84] sm:$0xf] %vm1790_vm15, %v5227_v14  ;;  %3844 = vmatmul.msk.bf16.vlgmr.msrb.gmra.mxu0 %vm3127_vm12, %v3106_v41 }
 0x1c6   : > { %v2607_v1 = vpop.f32.mrf.mxu2 }
 0x1c8   : > { %v2220_v52 = vpop.permute.xlu0 %2219 }
 0x1c9   : > { %v2495_v23 = vpop.f32.mrf.mxu1  ;;  %3837 = vmatmul.msk.bf16.gmra.mxu3 %vm2426_vm3, %v3908_v35 }
 0x1ca   : > { %v2605_v62 = vadd.f32 %v2604_v10, %v2495_v23 }
 0x1cb   : > { %v2218_v55 = vpop.permute.xlu1 %2217 }
 0x1cc   : > { %v2293_v22 = vld [vmem:[#allocation2 + $0x84] sm:$0xf]  ;;  %2290 = vst.msk [vmem:[#allocation2 + $0x80] sm:$0xf] %vm2259_vm14, %v2218_v55  ;;  %v2867_v19 = vpop.f32.mrf.mxu3 }
 0x1cd   : > { %v2294_v40 = vsel %vm2292_vm1, %v2220_v52, %v2293_v22  ;;  %v2944_v0 = vadd.f32 %v2867_v19, %v2603_v21 }
 0x1ce   : > { %2295 = vst [vmem:[#allocation2 + $0x84] sm:$0xf] %v2294_v40  ;;  %v2609_v27 = vpop.f32.mrf.mxu2  ;;  %v3894_v40 = vld [vmem:[#allocation2 + $0x70] sm:$0xff] }
 0x1cf   : > { %v2980_v53 = vadd.f32 %v5249_v25, %v2944_v0 }
 0x1d1   : > { %v2498_v48 = vpop.f32.mrf.mxu1  ;;  %v3044_v54 = vmul.f32 0.1, %v2980_v53  ;;  %vm3012_vm7 = vcmp.gt.f32.partialorder %v2980_v53, 0.0 }
 0x1d2   : > { %v2608_v46 = vadd.f32 %v2607_v1, %v2498_v48 }
 0x1d3   : > { %3727 = vmatmul.msk.bf16.gmra.mxu1 %vm2426_vm3, %v3891_v30  ;;  %3752 = vmatmul.msk.bf16.gmra.mxu2 %vm2426_vm3, %v3891_v30  ;;  %v3076_v56 = vsel %vm3012_vm7, %v2980_v53, %v3044_v54  ;;  %v3912_v53 = vld [vmem:[#allocation2 + $0x78] sm:$0xff] }
 0x1d4   : > { %v2869_v38 = vpop.f32.mrf.mxu3 }
 0x1d5   : > { %v2945_v26 = vadd.f32 %v2869_v38, %v2605_v62 }
 0x1d6   : > { %v2612_v42 = vpop.f32.mrf.mxu2 }
 0x1d7   : > { %v2981_v59 = vadd.f32 %v5249_v25, %v2945_v26 }
 0x1d9   : > { %v2500_v61 = vpop.f32.mrf.mxu1  ;;  %v3045_v43 = vmul.f32 0.1, %v2981_v59  ;;  %3838 = vmatmul.msk.bf16.gmra.mxu3 %vm2426_vm3, %v3909_v8  ;;  %vm3013_vm10 = vcmp.gt.f32.partialorder %v2981_v59, 0.0 }
 0x1da   : > { %v2610_v13 = vadd.f32 %v2609_v27, %v2500_v61 }
 0x1db   : > { %v3077_v47 = vsel %vm3013_vm10, %v2981_v59, %v3045_v43  ;;  %vm3460_vm10 = vcmask 257024  }
 0x1dc   : > { %v2872_v18 = vpop.f32.mrf.mxu3  ;;  %v3107_v14 = vpack.c.bf16 %v3077_v47, %v3076_v56 }
 0x1dd   : > { %v2946_v34 = vadd.f32 %v2872_v18, %v2608_v46  ;;  %v3895_v18 = vld [vmem:[#allocation2 + $0x78] sm:$0xff] }
 0x1de   : > { %v2614_v39 = vpop.f32.mrf.mxu2  ;;  %3845 = vmatmul.msk.bf16.gmra.mxu0 %vm3127_vm12, %v3107_v14 }
 0x1df   : > { %v2982_v63 = vadd.f32 %v5249_v25, %v2946_v34 }
 0x1e1   : > { %v2503_v28 = vpop.f32.mrf.mxu1  ;;  %v3046_v50 = vmul.f32 0.1, %v2982_v63  ;;  %vm3014_vm15 = vcmp.gt.f32.partialorder %v2982_v63, 0.0 }
 0x1e2   : > { %v2613_v44 = vadd.f32 %v2612_v42, %v2503_v28 }
 0x1e3   : > { %3728 = vmatmul.msk.bf16.gmra.mxu1 %vm2426_vm3, %v3892_v17  ;;  %3753 = vmatmul.msk.bf16.gmra.mxu2 %vm2426_vm3, %v3892_v17  ;;  %v3078_v20 = vsel %vm3014_vm15, %v2982_v63, %v3046_v50  ;;  %v3913_v63 = vld [vmem:[#allocation2 + $0x80] sm:$0xff] }
 0x1e4   : > { %v2874_v11 = vpop.f32.mrf.mxu3 }
 0x1e5   : > { %v2947_v5 = vadd.f32 %v2874_v11, %v2610_v13 }
 0x1e6   : > { %v2617_v57 = vpop.f32.mrf.mxu2 }
 0x1e7   : > { %v2983_v3 = vadd.f32 %v5249_v25, %v2947_v5 }
 0x1e9   : > { %v2505_v7 = vpop.f32.mrf.mxu1  ;;  %v3047_v58 = vmul.f32 0.1, %v2983_v3  ;;  %3839 = vmatmul.msk.bf16.gmra.mxu3 %vm2426_vm3, %v3910_v24  ;;  %vm3015_vm14 = vcmp.gt.f32.partialorder %v2983_v3, 0.0 }
 0x1ea   : > { %v2615_v60 = vadd.f32 %v2614_v39, %v2505_v7 }
 0x1eb   : > { %v3079_v6 = vsel %vm3015_vm14, %v2983_v3, %v3047_v58 }
 0x1ec   : > { %v2877_v16 = vpop.f32.mrf.mxu3  ;;  %v3108_v9 = vpack.c.bf16 %v3079_v6, %v3078_v20 }
 0x1ed   : > { %v2948_v31 = vadd.f32 %v2877_v16, %v2613_v44  ;;  %v3897_v16 = vld [vmem:[#allocation2 + $0x80] sm:$0xff] }
 0x1ee   : > { %v2619_v12 = vpop.f32.mrf.mxu2  ;;  %3846 = vmatmul.msk.bf16.gmra.mxu0 %vm3127_vm12, %v3108_v9 }
 0x1ef   : > { %v2984_v2 = vadd.f32 %v5249_v25, %v2948_v31 }
 0x1f1   : > { %v2508_v4 = vpop.f32.mrf.mxu1  ;;  %v3048_v29 = vmul.f32 0.1, %v2984_v2  ;;  %vm3016_vm2 = vcmp.gt.f32.partialorder %v2984_v2, 0.0 }
 0x1f2   : > { %v2618_v23 = vadd.f32 %v2617_v57, %v2508_v4 }
 0x1f3   : > { %3729 = vmatmul.msk.bf16.gmra.mxu1 %vm2426_vm3, %v3893_v33  ;;  %3754 = vmatmul.msk.bf16.gmra.mxu2 %vm2426_vm3, %v3893_v33  ;;  %v3080_v36 = vsel %vm3016_vm2, %v2984_v2, %v3048_v29  ;;  %v3914_v2 = vld [vmem:[#allocation2 + $0x88] sm:$0xff] }
 0x1f4   : > { %v2879_v45 = vpop.f32.mrf.mxu3 }
 0x1f5   : > { %v2949_v10 = vadd.f32 %v2879_v45, %v2615_v60 }
 0x1f6   : > { %v2622_v32 = vpop.f32.mrf.mxu2 }
 0x1f7   : > { %v2985_v51 = vadd.f32 %v5249_v25, %v2949_v10 }
 0x1f9   : > { %v2510_v37 = vpop.f32.mrf.mxu1  ;;  %v3049_v15 = vmul.f32 0.1, %v2985_v51  ;;  %3840 = vmatmul.msk.bf16.gmra.mxu3 %vm2426_vm3, %v3911_v49  ;;  %vm3017_vm4 = vcmp.gt.f32.partialorder %v2985_v51, 0.0 }
 0x1fa   : > { %v2620_v19 = vadd.f32 %v2619_v12, %v2510_v37 }
 0x1fb   : > { %v3081_v41 = vsel %vm3017_vm4, %v2985_v51, %v3049_v15 }
 0x1fc   : > { %v2882_v1 = vpop.f32.mrf.mxu3  ;;  %v3109_v35 = vpack.c.bf16 %v3081_v41, %v3080_v36 }
 0x1fd   : > { %v2950_v55 = vadd.f32 %v2882_v1, %v2618_v23 }
 0x1fe   : > { %v2624_v52 = vpop.f32.mrf.mxu2  ;;  %3847 = vmatmul.msk.bf16.gmra.mxu0 %vm3127_vm12, %v3109_v35 }
 0x1ff   : > { %v2986_v21 = vadd.f32 %v5249_v25, %v2950_v55 }
 0x201   : > { %v2513_v22 = vpop.f32.mrf.mxu1  ;;  %v3050_v30 = vmul.f32 0.1, %v2986_v21  ;;  %vm3018_vm11 = vcmp.gt.f32.partialorder %v2986_v21, 0.0 }
 0x202   : > { %v2623_v61 = vadd.f32 %v2622_v32, %v2513_v22 }
 0x203   : > { %3730 = vmatmul.msk.bf16.gmra.mxu1 %vm2426_vm3, %v3894_v40  ;;  %3755 = vmatmul.msk.bf16.gmra.mxu2 %vm2426_vm3, %v3894_v40  ;;  %v3082_v42 = vsel %vm3018_vm11, %v2986_v21, %v3050_v30 }
 0x204   : > { %v2884_v27 = vpop.f32.mrf.mxu3 }
 0x205   : > { %v2951_v0 = vadd.f32 %v2884_v27, %v2620_v19 }
 0x206   : > { %v2627_v48 = vpop.f32.mrf.mxu2 }
 0x207   : > { %v2987_v62 = vadd.f32 %v5249_v25, %v2951_v0 }
 0x209   : > { %v2515_v38 = vpop.f32.mrf.mxu1  ;;  %vm3019_vm5 = vcmp.gt.f32.partialorder %v2987_v62, 0.0  ;;  %v3051_v26 = vmul.f32 0.1, %v2987_v62  ;;  %3841 = vmatmul.msk.bf16.gmra.mxu3 %vm2426_vm3, %v3912_v53  ;;  %v283_v53 = vld [vmem:[%s4010_s11] sm:$0xff]  }
 0x20a   : > { %v2625_v14 = vadd.f32 %v2624_v52, %v2515_v38 }
 0x20b   : > { %v3083_v54 = vsel %vm3019_vm5, %v2987_v62, %v3051_v26  ;;  %v5313_v26 = vld [vmem:[%s5466_s6] ss:$0 sm:$0xff] }
 0x20c   : > { %v2887_v59 = vpop.f32.mrf.mxu3  ;;  %v3110_v8 = vpack.c.bf16 %v3083_v54, %v3082_v42 }
 0x20d   : > { %v2952_v56 = vadd.f32 %v2887_v59, %v2623_v61  ;;  %v3268_v59 = vunpack.c.l.bf16 %v283_v53 }
 0x20e   : > { %v2629_v43 = vpop.f32.mrf.mxu2  ;;  %3848 = vmatmul.msk.bf16.gmra.mxu0 %vm3127_vm12, %v3110_v8 }
 0x20f   : > { %v2988_v46 = vadd.f32 %v5249_v25, %v2952_v56 }
 0x211   : > { %v2518_v47 = vpop.f32.mrf.mxu1  ;;  %v3052_v17 = vmul.f32 0.1, %v2988_v46  ;;  %vm3020_vm8 = vcmp.gt.f32.partialorder %v2988_v46, 0.0 }
 0x212   : > { %v2628_v7 = vadd.f32 %v2627_v48, %v2518_v47 }
 0x213   : > { %3731 = vmatmul.msk.bf16.gmra.mxu1 %vm2426_vm3, %v3895_v18  ;;  %3756 = vmatmul.msk.bf16.gmra.mxu2 %vm2426_vm3, %v3895_v18  ;;  %v3084_v57 = vsel %vm3020_vm8, %v2988_v46, %v3052_v17 }
 0x214   : > { %v2889_v39 = vpop.f32.mrf.mxu3 }
 0x215   : > { %v2953_v34 = vadd.f32 %v2889_v39, %v2625_v14 }
 0x216   : > { %v2632_v28 = vpop.f32.mrf.mxu2 }
 0x217   : > { %v2989_v13 = vadd.f32 %v5249_v25, %v2953_v34 }
 0x219   : > { %v2520_v11 = vpop.f32.mrf.mxu1  ;;  %vm3021_vm0 = vcmp.gt.f32.partialorder %v2989_v13, 0.0  ;;  %v3053_v5 = vmul.f32 0.1, %v2989_v13  ;;  %3842 = vmatmul.msk.bf16.gmra.mxu3 %vm2426_vm3, %v3913_v63  ;;  %v3269_v63 = vunpack.c.h.bf16 %v283_v53 }
 0x21a   : > { %v2630_v9 = vadd.f32 %v2629_v43, %v2520_v11 }
 0x21b   : > { %v3085_v50 = vsel %vm3021_vm0, %v2989_v13, %v3053_v5 }
 0x21c   : > { %v2892_v3 = vpop.f32.mrf.mxu3  ;;  %v3111_v24 = vpack.c.bf16 %v3085_v50, %v3084_v57 }
 0x21d   : > { %v2954_v20 = vadd.f32 %v2892_v3, %v2628_v7 }
 0x21e   : > { %v2634_v58 = vpop.f32.mrf.mxu2  ;;  %3849 = vmatmul.msk.bf16.gmra.mxu0 %vm3127_vm12, %v3111_v24 }
 0x21f   : > { %v2990_v44 = vadd.f32 %v5249_v25, %v2954_v20 }
 0x221   : > { %v2523_v6 = vpop.f32.mrf.mxu1  ;;  %v3054_v33 = vmul.f32 0.1, %v2990_v44  ;;  %vm3022_vm9 = vcmp.gt.f32.partialorder %v2990_v44, 0.0 }
 0x222   : > { %v2633_v37 = vadd.f32 %v2632_v28, %v2523_v6 }
 0x223   : > { %3732 = vmatmul.msk.bf16.gmra.mxu1 %vm2426_vm3, %v3897_v16  ;;  %v3086_v32 = vsel %vm3022_vm9, %v2990_v44, %v3054_v33 }
 0x224   : > { %v2894_v12 = vpop.f32.mrf.mxu3 }
 0x225   : > { %v2955_v31 = vadd.f32 %v2894_v12, %v2630_v9 }
 0x226   : > { %v2637_v4 = vpop.f32.mrf.mxu2 }
 0x227   : > { %v2991_v60 = vadd.f32 %v5249_v25, %v2955_v31 }
 0x229   : > { %v2525_v45 = vpop.f32.mrf.mxu1  ;;  %vm3023_vm13 = vcmp.gt.f32.partialorder %v2991_v60, 0.0  ;;  %v3055_v10 = vmul.f32 0.1, %v2991_v60  ;;  %3843 = vmatmul.msk.bf16.gmra.mxu3 %vm2426_vm3, %v3914_v2 }
 0x22a   : > { %v2635_v1 = vadd.f32 %v2634_v58, %v2525_v45 }
 0x22b   : > { %v3087_v29 = vsel %vm3023_vm13, %v2991_v60, %v3055_v10 }
 0x22c   : > { %v2897_v51 = vpop.f32.mrf.mxu3  ;;  %v3112_v49 = vpack.c.bf16 %v3087_v29, %v3086_v32  ;;  %v285_v29 = vld [vmem:[%s4010_s11 + $0x8] sm:$0xff]  }
 0x22d   : > { %v2956_v36 = vadd.f32 %v2897_v51, %v2633_v37 }
 0x22e   : > { %v2639_v15 = vpop.f32.mrf.mxu2  ;;  %3850 = vmatmul.msk.bf16.gmra.mxu0 %vm3127_vm12, %v3112_v49 }
 0x22f   : > { %v2992_v35 = vadd.f32 %v5249_v25, %v2956_v36 }
 0x231   : > { %v2528_v41 = vpop.f32.mrf.mxu1  ;;  %v3056_v22 = vmul.f32 0.1, %v2992_v35  ;;  %vm3024_vm3 = vcmp.gt.f32.partialorder %v2992_v35, 0.0 }
 0x232   : > { %v2638_v62 = vadd.f32 %v2637_v4, %v2528_v41 }
 0x233   : > { %v3088_v27 = vsel %vm3024_vm3, %v2992_v35, %v3056_v22 }
 0x234   : > { %v2899_v23 = vpop.f32.mrf.mxu3 }
 0x235   : > { %v2957_v52 = vadd.f32 %v2899_v23, %v2635_v1 }
 0x236   : > { %v2642_v55 = vpop.f32.mrf.mxu2 }
 0x237   : > { %v2993_v40 = vadd.f32 %v5249_v25, %v2957_v52 }
 0x239   : > { %v2530_v19 = vpop.f32.mrf.mxu1  ;;  %vm3025_vm6 = vcmp.gt.f32.partialorder %v2993_v40, 0.0  ;;  %v3057_v21 = vmul.f32 0.1, %v2993_v40 }
 0x23a   : > { %v2640_v43 = vadd.f32 %v2639_v15, %v2530_v19  ;;  %v3270_v15 = vunpack.c.l.bf16 %v285_v29 }
 0x23b   : > { %v3089_v0 = vsel %vm3025_vm6, %v2993_v40, %v3057_v21 }
 0x23c   : > { %v2902_v48 = vpop.f32.mrf.mxu3  ;;  %v3113_v30 = vpack.c.bf16 %v3089_v0, %v3088_v27 }
 0x23d   : > { %v2958_v42 = vadd.f32 %v2902_v48, %v2638_v62  ;;  %v3271_v48 = vunpack.c.h.bf16 %v285_v29 }
 0x23e   : > { %v2644_v38 = vpop.f32.mrf.mxu2  ;;  %3851 = vmatmul.msk.bf16.gmra.mxu0 %vm3127_vm12, %v3113_v30 }
 0x23f   : > { %v2994_v56 = vadd.f32 %v5249_v25, %v2958_v42 }
 0x241   : > { %v2533_v54 = vpop.f32.mrf.mxu1  ;;  %v3058_v34 = vmul.f32 0.1, %v2994_v56  ;;  %vm3026_vm7 = vcmp.gt.f32.partialorder %v2994_v56, 0.0 }
 0x242   : > { %v3188_v8 = vpop.f32.mrf.mxu0  ;;  %v2643_v6 = vadd.f32 %v2642_v55, %v2533_v54 }
 0x243   : > { %v3189_v61 = vadd.f32 %v5313_v26, %v3188_v8  ;;  %v3090_v3 = vsel %vm3026_vm7, %v2994_v56, %v3058_v34  ;;  %v287_v56 = vld [vmem:[%s4010_s11 + $0x10] sm:$0xff]  }
 0x244   : > { %v2904_v18 = vpop.f32.mrf.mxu3 }
 0x245   : > { %v3300_v47 = vadd.f32 %v3268_v59, %v3189_v61  ;;  %v2959_v14 = vadd.f32 %v2904_v18, %v2640_v43 }
 0x246   : > { %v2647_v39 = vpop.f32.mrf.mxu2 }
 0x247   : > { %vm3332_vm1 = vcmp.gt.f32.partialorder %v3300_v47, 0.0  ;;  %v3364_v46 = vmul.f32 0.1, %v3300_v47  ;;  %v2995_v28 = vadd.f32 %v5249_v25, %v2959_v14 }
 0x249   : > { %v3396_v17 = vsel %vm3332_vm1, %v3300_v47, %v3364_v46  ;;  %v2535_v13 = vpop.f32.mrf.mxu1  ;;  %vm3027_vm15 = vcmp.gt.f32.partialorder %v2995_v28, 0.0  ;;  %v3059_v5 = vmul.f32 0.1, %v2995_v28 }
 0x24a   : > { %v3428_v11 = vpack.c.bf16 %v3396_v17, %v3396_v17  ;;  %v3190_v57 = vpop.f32.mrf.mxu0  ;;  %v2645_v33 = vadd.f32 %v2644_v38, %v2535_v13 }
 0x24b   : > { %v3191_v50 = vadd.f32 %v5313_v26, %v3190_v57  ;;  %v3091_v24 = vsel %vm3027_vm15, %v2995_v28, %v3059_v5 }
 0x24c   : > { %3461 = vst.msk [vmem:[%s5323_s19] sm:$0xf] %vm3460_vm10, %v3428_v11  ;;  %v2907_v58 = vpop.f32.mrf.mxu3  ;;  %v3114_v20 = vpack.c.bf16 %v3091_v24, %v3090_v3 }
 0x24d   : > { %v3301_v7 = vadd.f32 %v3269_v63, %v3191_v50  ;;  %v2960_v44 = vadd.f32 %v2907_v58, %v2643_v6  ;;  %v3273_v6 = vunpack.c.h.bf16 %v287_v56 }
 0x24e   : > { %v2649_v9 = vpop.f32.mrf.mxu2  ;;  %3852 = vmatmul.msk.bf16.gmra.mxu0 %vm3127_vm12, %v3114_v20 }
 0x24f   : > { %vm3333_vm14 = vcmp.gt.f32.partialorder %v3301_v7, 0.0  ;;  %v3365_v16 = vmul.f32 0.1, %v3301_v7  ;;  %v2996_v60 = vadd.f32 %v5249_v25, %v2960_v44 }
 0x251   : > { %v3397_v12 = vsel %vm3333_vm14, %v3301_v7, %v3365_v16  ;;  %v2538_v31 = vpop.f32.mrf.mxu1  ;;  %v3060_v10 = vmul.f32 0.1, %v2996_v60  ;;  %vm3028_vm2 = vcmp.gt.f32.partialorder %v2996_v60, 0.0 }
 0x252   : > { %v3429_v4 = vpack.c.bf16 %v3397_v12, %v3397_v12  ;;  %v2648_v55 = vadd.f32 %v2647_v39, %v2538_v31  ;;  %v3272_v39 = vunpack.c.l.bf16 %v287_v56 }
 0x253   : > { %v3092_v36 = vsel %vm3028_vm2, %v2996_v60, %v3060_v10 }
 0x254   : > { %3462 = vst.msk [vmem:[%s5323_s19 + $0x4] sm:$0xf] %vm3460_vm10, %v3429_v4  ;;  %v2909_v2 = vpop.f32.mrf.mxu3 }
 0x255   : > { %v2961_v45 = vadd.f32 %v2909_v2, %v2645_v33 }
 0x256   : > { %v2652_v51 = vpop.f32.mrf.mxu2 }
 0x257   : > { %v2997_v32 = vadd.f32 %v5249_v25, %v2961_v45 }
 0x259   : > { %v2540_v49 = vpop.f32.mrf.mxu1  ;;  %vm3029_vm4 = vcmp.gt.f32.partialorder %v2997_v32, 0.0  ;;  %v3061_v37 = vmul.f32 0.1, %v2997_v32 }
 0x25a   : > { %v2650_v30 = vadd.f32 %v2649_v9, %v2540_v49 }
 0x25b   : > { %v3093_v41 = vsel %vm3029_vm4, %v2997_v32, %v3061_v37  ;;  %v3193_v1 = vpop.f32.mrf.mxu0  ;;  %v289_v32 = vld [vmem:[%s4010_s11 + $0x18] sm:$0xff]  }
 0x25c   : > { %v3194_v35 = vadd.f32 %v5313_v26, %v3193_v1  ;;  %v2912_v23 = vpop.f32.mrf.mxu3  ;;  %v3115_v52 = vpack.c.bf16 %v3093_v41, %v3092_v36 }
 0x25d   : > { %v2962_v40 = vadd.f32 %v2912_v23, %v2648_v55 }
 0x25e   : > { %v3302_v22 = vadd.f32 %v3270_v15, %v3194_v35  ;;  %3853 = vmatmul.msk.bf16.gmra.mxu0 %vm3127_vm12, %v3115_v52  ;;  %v2654_v0 = vpop.f32.mrf.mxu2  ;;  %v3274_v15 = vunpack.c.l.bf16 %v289_v32 }
 0x25f   : > { %v2998_v53 = vadd.f32 %v5249_v25, %v2962_v40 }
 0x260   : > { %vm3334_vm11 = vcmp.gt.f32.partialorder %v3302_v22, 0.0  ;;  %v3366_v19 = vmul.f32 0.1, %v3302_v22 }
 0x261   : > { %v2543_v21 = vpop.f32.mrf.mxu1  ;;  %v3062_v61 = vmul.f32 0.1, %v2998_v53  ;;  %vm3030_vm5 = vcmp.gt.f32.partialorder %v2998_v53, 0.0 }
 0x262   : > { %v3398_v27 = vsel %vm3334_vm11, %v3302_v22, %v3366_v19  ;;  %v2653_v50 = vadd.f32 %v2652_v51, %v2543_v21 }
 0x263   : > { %v3430_v62 = vpack.c.bf16 %v3398_v27, %v3398_v27  ;;  %v3195_v38 = vpop.f32.mrf.mxu0  ;;  %v3094_v34 = vsel %vm3030_vm5, %v2998_v53, %v3062_v61 }
 0x264   : > { %v3196_v42 = vadd.f32 %v5313_v26, %v3195_v38  ;;  %v2914_v54 = vpop.f32.mrf.mxu3 }
 0x265   : > { %3463 = vst.msk [vmem:[%s5323_s19 + $0x8] sm:$0xf] %vm3460_vm10, %v3430_v62  ;;  %v2963_v59 = vadd.f32 %v2914_v54, %v2650_v30  ;;  %v3275_v30 = vunpack.c.h.bf16 %v289_v32 }
 0x266   : > { %v3303_v8 = vadd.f32 %v3271_v48, %v3196_v42  ;;  %v2657_v63 = vpop.f32.mrf.mxu2 }
 0x267   : > { %v2999_v43 = vadd.f32 %v5249_v25, %v2963_v59 }
 0x268   : > { %vm3335_vm8 = vcmp.gt.f32.partialorder %v3303_v8, 0.0  ;;  %v3367_v47 = vmul.f32 0.1, %v3303_v8 }
 0x269   : > { %v2545_v18 = vpop.f32.mrf.mxu1  ;;  %vm3031_vm0 = vcmp.gt.f32.partialorder %v2999_v43, 0.0  ;;  %v3063_v14 = vmul.f32 0.1, %v2999_v43 }
 0x26a   : > { %v3399_v46 = vsel %vm3335_vm8, %v3303_v8, %v3367_v47  ;;  %v2655_v16 = vadd.f32 %v2654_v0, %v2545_v18  ;;  %v291_v47 = vld [vmem:[%s4010_s11 + $0x20] sm:$0xff]  }
 0x26b   : > { %v3431_v28 = vpack.c.bf16 %v3399_v46, %v3399_v46  ;;  %v3095_v17 = vsel %vm3031_vm0, %v2999_v43, %v3063_v14  ;;  %v3198_v13 = vpop.f32.mrf.mxu0 }
 0x26c   : > { %v3199_v11 = vadd.f32 %v5313_v26, %v3198_v13  ;;  %v2917_v5 = vpop.f32.mrf.mxu3  ;;  %v3116_v57 = vpack.c.bf16 %v3095_v17, %v3094_v34 }
 0x26d   : > { %3464 = vst.msk [vmem:[%s5323_s19 + $0xc] sm:$0xf] %vm3460_vm10, %v3431_v28  ;;  %v2964_v24 = vadd.f32 %v2917_v5, %v2653_v50  ;;  %v3276_v28 = vunpack.c.l.bf16 %v291_v47 }
 0x26e   : > { %v3304_v3 = vadd.f32 %v3272_v39, %v3199_v11  ;;  %3854 = vmatmul.msk.bf16.gmra.mxu0 %vm3127_vm12, %v3116_v57  ;;  %v2659_v60 = vpop.f32.mrf.mxu2 }
 0x26f   : > { %v3000_v44 = vadd.f32 %v5249_v25, %v2964_v24 }
 0x270   : > { %vm3336_vm9 = vcmp.gt.f32.partialorder %v3304_v3, 0.0  ;;  %v3368_v7 = vmul.f32 0.1, %v3304_v3 }
 0x271   : > { %v2548_v58 = vpop.f32.mrf.mxu1  ;;  %v3064_v45 = vmul.f32 0.1, %v3000_v44  ;;  %vm3032_vm13 = vcmp.gt.f32.partialorder %v3000_v44, 0.0 }
 0x272   : > { %v3400_v20 = vsel %vm3336_vm9, %v3304_v3, %v3368_v7  ;;  %v2658_v22 = vadd.f32 %v2657_v63, %v2548_v58 }
 0x273   : > { %v3432_v9 = vpack.c.bf16 %v3400_v20, %v3400_v20  ;;  %v3200_v12 = vpop.f32.mrf.mxu0  ;;  %v3096_v36 = vsel %vm3032_vm13, %v3000_v44, %v3064_v45 }
 0x274   : > { %v3201_v31 = vadd.f32 %v5313_v26, %v3200_v12  ;;  %v2919_v4 = vpop.f32.mrf.mxu3 }
 0x275   : > { %3465 = vst.msk [vmem:[%s5323_s19 + $0x10] sm:$0xf] %vm3460_vm10, %v3432_v9  ;;  %v2965_v33 = vadd.f32 %v2919_v4, %v2655_v16  ;;  %v3277_v16 = vunpack.c.h.bf16 %v291_v47 }
 0x276   : > { %v3305_v2 = vadd.f32 %v3273_v6, %v3201_v31  ;;  %v2662_v21 = vpop.f32.mrf.mxu2 }
 0x277   : > { %v3001_v10 = vadd.f32 %v5249_v25, %v2965_v33 }
 0x278   : > { %vm3337_vm3 = vcmp.gt.f32.partialorder %v3305_v2, 0.0  ;;  %v3369_v29 = vmul.f32 0.1, %v3305_v2 }
 0x279   : > { %v2550_v51 = vpop.f32.mrf.mxu1  ;;  %vm3033_vm6 = vcmp.gt.f32.partialorder %v3001_v10, 0.0  ;;  %v3065_v49 = vmul.f32 0.1, %v3001_v10 }
 0x27a   : > { %v3401_v37 = vsel %vm3337_vm3, %v3305_v2, %v3369_v29  ;;  %v2660_v62 = vadd.f32 %v2659_v60, %v2550_v51  ;;  %v293_v29 = vld [vmem:[%s4010_s11 + $0x28] sm:$0xff]  }
 0x27b   : > { %v3433_v41 = vpack.c.bf16 %v3401_v37, %v3401_v37  ;;  %v3097_v1 = vsel %vm3033_vm6, %v3001_v10, %v3065_v49  ;;  %v3203_v35 = vpop.f32.mrf.mxu0 }
 0x27c   : > { %v3204_v23 = vadd.f32 %v5313_v26, %v3203_v35  ;;  %v2922_v52 = vpop.f32.mrf.mxu3  ;;  %v3117_v55 = vpack.c.bf16 %v3097_v1, %v3096_v36 }
 0x27d   : > { %3466 = vst.msk [vmem:[%s5323_s19 + $0x14] sm:$0xf] %vm3460_vm10, %v3433_v41  ;;  %v2966_v19 = vadd.f32 %v2922_v52, %v2658_v22 }
 0x27e   : > { %v3306_v40 = vadd.f32 %v3274_v15, %v3204_v23  ;;  %3855 = vmatmul.msk.bf16.gmra.mxu0 %vm3127_vm12, %v3117_v55  ;;  %v2664_v39 = vpop.f32.mrf.mxu2  ;;  %v3278_v15 = vunpack.c.l.bf16 %v293_v29 }
 0x27f   : > { %v3002_v38 = vadd.f32 %v5249_v25, %v2966_v19 }
 0x280   : > { %vm3338_vm1 = vcmp.gt.f32.partialorder %v3306_v40, 0.0  ;;  %v3370_v27 = vmul.f32 0.1, %v3306_v40 }
 0x281   : > { %v2553_v0 = vpop.f32.mrf.mxu1  ;;  %v3066_v43 = vmul.f32 0.1, %v3002_v38  ;;  %vm3034_vm7 = vcmp.gt.f32.partialorder %v3002_v38, 0.0 }
 0x282   : > { %v3402_v48 = vsel %vm3338_vm1, %v3306_v40, %v3370_v27  ;;  %v2663_v3 = vadd.f32 %v2662_v21, %v2553_v0 }
 0x283   : > { %v3434_v53 = vpack.c.bf16 %v3402_v48, %v3402_v48  ;;  %v3205_v42 = vpop.f32.mrf.mxu0  ;;  %v3098_v17 = vsel %vm3034_vm7, %v3002_v38, %v3066_v43 }
 0x284   : > { %v3206_v54 = vadd.f32 %v5313_v26, %v3205_v42  ;;  %v2924_v59 = vpop.f32.mrf.mxu3 }
 0x285   : > { %3467 = vst.msk [vmem:[%s5323_s19 + $0x18] sm:$0xf] %vm3460_vm10, %v3434_v53  ;;  %v2967_v8 = vadd.f32 %v2924_v59, %v2660_v62 }
 0x286   : > { %v3307_v61 = vadd.f32 %v3275_v30, %v3206_v54  ;;  %v2667_v4 = vpop.f32.mrf.mxu2  ;;  %v3279_v30 = vunpack.c.h.bf16 %v293_v29  ;;  %v297_v29 = vld [vmem:[%s4010_s11 + $0x38] sm:$0xff]  }
 0x287   : > { %v3003_v56 = vadd.f32 %v5249_v25, %v2967_v8 }
 0x288   : > { %vm3339_vm15 = vcmp.gt.f32.partialorder %v3307_v61, 0.0  ;;  %v3371_v18 = vmul.f32 0.1, %v3307_v61 }
 0x289   : > { %v2555_v14 = vpop.f32.mrf.mxu1  ;;  %vm3035_vm14 = vcmp.gt.f32.partialorder %v3003_v56, 0.0  ;;  %v3067_v46 = vmul.f32 0.1, %v3003_v56 }
 0x28a   : > { %v3403_v34 = vsel %vm3339_vm15, %v3307_v61, %v3371_v18  ;;  %v2665_v9 = vadd.f32 %v2664_v39, %v2555_v14  ;;  %v295_v18 = vld [vmem:[%s4010_s11 + $0x30] sm:$0xff]  }
 0x28b   : > { %v3435_v13 = vpack.c.bf16 %v3403_v34, %v3403_v34  ;;  %v3099_v63 = vsel %vm3035_vm14, %v3003_v56, %v3067_v46  ;;  %v3208_v11 = vpop.f32.mrf.mxu0 }
 0x28c   : > { %v3209_v5 = vadd.f32 %v5313_v26, %v3208_v11  ;;  %v2927_v57 = vpop.f32.mrf.mxu3  ;;  %v3118_v50 = vpack.c.bf16 %v3099_v63, %v3098_v17 }
 0x28d   : > { %3468 = vst.msk [vmem:[%s5323_s19 + $0x1c] sm:$0xf] %vm3460_vm10, %v3435_v13  ;;  %v2968_v7 = vadd.f32 %v2927_v57, %v2663_v3 }
 0x28e   : > { %v3308_v24 = vadd.f32 %v3276_v28, %v3209_v5  ;;  %3856 = vmatmul.msk.bf16.gmra.mxu0 %vm3127_vm12, %v3118_v50  ;;  %v2669_v19 = vpop.f32.mrf.mxu2  ;;  %v3280_v28 = vunpack.c.l.bf16 %v295_v18 }
 0x28f   : > { %v3004_v12 = vadd.f32 %v5249_v25, %v2968_v7 }
 0x290   : > { %vm3340_vm2 = vcmp.gt.f32.partialorder %v3308_v24, 0.0  ;;  %v3372_v58 = vmul.f32 0.1, %v3308_v24 }
 0x291   : > { %v2558_v6 = vpop.f32.mrf.mxu1  ;;  %v3068_v10 = vmul.f32 0.1, %v3004_v12  ;;  %vm3036_vm4 = vcmp.gt.f32.partialorder %v3004_v12, 0.0 }
 0x292   : > { %v3404_v20 = vsel %vm3340_vm2, %v3308_v24, %v3372_v58  ;;  %v2668_v40 = vadd.f32 %v2667_v4, %v2558_v6 }
 0x293   : > { %v3436_v44 = vpack.c.bf16 %v3404_v20, %v3404_v20  ;;  %v3210_v31 = vpop.f32.mrf.mxu0  ;;  %v3100_v36 = vsel %vm3036_vm4, %v3004_v12, %v3068_v10 }
 0x294   : > { %v3211_v33 = vadd.f32 %v5313_v26, %v3210_v31  ;;  %v2929_v60 = vpop.f32.mrf.mxu3 }
 0x295   : > { %3469 = vst.msk [vmem:[%s5323_s19 + $0x20] sm:$0xf] %vm3460_vm10, %v3436_v44  ;;  %v2969_v2 = vadd.f32 %v2929_v60, %v2665_v9  ;;  %v3281_v9 = vunpack.c.h.bf16 %v295_v18 }
 0x296   : > { %v3309_v45 = vadd.f32 %v3277_v16, %v3211_v33  ;;  %v2672_v14 = vpop.f32.mrf.mxu2 }
 0x297   : > { %v3005_v32 = vadd.f32 %v5249_v25, %v2969_v2 }
 0x298   : > { %vm3341_vm11 = vcmp.gt.f32.partialorder %v3309_v45, 0.0  ;;  %v3373_v51 = vmul.f32 0.1, %v3309_v45 }
 0x299   : > { %vm3037_vm5 = vcmp.gt.f32.partialorder %v3005_v32, 0.0  ;;  %v3069_v49 = vmul.f32 0.1, %v3005_v32  ;;  %v2560_v23 = vpop.f32.mrf.mxu1 }
 0x29a   : > { %v3405_v37 = vsel %vm3341_vm11, %v3309_v45, %v3373_v51  ;;  %v2670_v62 = vadd.f32 %v2669_v19, %v2560_v23 }
 0x29b   : > { %v3437_v41 = vpack.c.bf16 %v3405_v37, %v3405_v37  ;;  %v3101_v1 = vsel %vm3037_vm5, %v3005_v32, %v3069_v49  ;;  %v3213_v35 = vpop.f32.mrf.mxu0 }
 0x29c   : > { %v3214_v52 = vadd.f32 %v5313_v26, %v3213_v35  ;;  %v2932_v55 = vpop.f32.mrf.mxu3  ;;  %v3119_v22 = vpack.c.bf16 %v3101_v1, %v3100_v36 }
 0x29d   : > { %3470 = vst.msk [vmem:[%s5323_s19 + $0x24] sm:$0xf] %vm3460_vm10, %v3437_v41  ;;  %v2970_v27 = vadd.f32 %v2932_v55, %v2668_v40  ;;  %v3283_v40 = vunpack.c.h.bf16 %v297_v29 }
 0x29e   : > { %v3310_v21 = vadd.f32 %v3278_v15, %v3214_v52  ;;  %3857 = vmatmul.msk.bf16.gmra.mxu0 %vm3127_vm12, %v3119_v22  ;;  %v2674_v6 = vpop.f32.mrf.mxu2  ;;  %v3282_v15 = vunpack.c.l.bf16 %v297_v29 }
 0x29f   : > { %v3006_v38 = vadd.f32 %v5249_v25, %v2970_v27 }
 0x2a0   : > { %vm3342_vm8 = vcmp.gt.f32.partialorder %v3310_v21, 0.0  ;;  %v3374_v0 = vmul.f32 0.1, %v3310_v21 }
 0x2a1   : > { %v2563_v61 = vpop.f32.mrf.mxu1  ;;  %v3070_v56 = vmul.f32 0.1, %v3006_v38  ;;  %vm3038_vm0 = vcmp.gt.f32.partialorder %v3006_v38, 0.0 }
 0x2a2   : > { %v3406_v48 = vsel %vm3342_vm8, %v3310_v21, %v3374_v0  ;;  %v2673_v3 = vadd.f32 %v2672_v14, %v2563_v61 }
 0x2a3   : > { %v3438_v53 = vpack.c.bf16 %v3406_v48, %v3406_v48  ;;  %v3215_v42 = vpop.f32.mrf.mxu0  ;;  %v3102_v17 = vsel %vm3038_vm0, %v3006_v38, %v3070_v56  ;;  %v299_v48 = vld [vmem:[%s4010_s11 + $0x40] sm:$0xff]  }
 0x2a4   : > { %v3216_v54 = vadd.f32 %v5313_v26, %v3215_v42  ;;  %v2934_v59 = vpop.f32.mrf.mxu3 }
 0x2a5   : > { %3471 = vst.msk [vmem:[%s5323_s19 + $0x28] sm:$0xf] %vm3460_vm10, %v3438_v53  ;;  %v2971_v8 = vadd.f32 %v2934_v59, %v2670_v62  ;;  %v3284_v53 = vunpack.c.l.bf16 %v299_v48 }
 0x2a6   : > { %v3311_v43 = vadd.f32 %v3279_v30, %v3216_v54 }
 0x2a7   : > { %v3007_v47 = vadd.f32 %v5249_v25, %v2971_v8 }
 0x2a8   : > { %vm3343_vm9 = vcmp.gt.f32.partialorder %v3311_v43, 0.0  ;;  %v3375_v46 = vmul.f32 0.1, %v3311_v43 }
 0x2a9   : > { %vm3039_vm13 = vcmp.gt.f32.partialorder %v3007_v47, 0.0  ;;  %v3071_v39 = vmul.f32 0.1, %v3007_v47  ;;  %v2565_v58 = vpop.f32.mrf.mxu1 }
 0x2aa   : > { %v3407_v34 = vsel %vm3343_vm9, %v3311_v43, %v3375_v46  ;;  %v2675_v44 = vadd.f32 %v2674_v6, %v2565_v58  ;;  %v3285_v43 = vunpack.c.h.bf16 %v299_v48  ;;  %v301_v46 = vld [vmem:[%s4010_s11 + $0x48] sm:$0xff]  }
 0x2ab   : > { %v3439_v13 = vpack.c.bf16 %v3407_v34, %v3407_v34  ;;  %v3103_v63 = vsel %vm3039_vm13, %v3007_v47, %v3071_v39  ;;  %v3218_v11 = vpop.f32.mrf.mxu0 }
 0x2ac   : > { %v3219_v5 = vadd.f32 %v5313_v26, %v3218_v11  ;;  %v2937_v57 = vpop.f32.mrf.mxu3  ;;  %v3120_v50 = vpack.c.bf16 %v3103_v63, %v3102_v17 }
 0x2ad   : > { %3472 = vst.msk [vmem:[%s5323_s19 + $0x2c] sm:$0xf] %vm3460_vm10, %v3439_v13  ;;  %v2972_v7 = vadd.f32 %v2937_v57, %v2673_v3 }
 0x2ae   : > { %v3312_v24 = vadd.f32 %v3280_v28, %v3219_v5  ;;  %3858 = vmatmul.msk.bf16.gmra.mxu0 %vm3127_vm12, %v3120_v50  ;;  %v3286_v28 = vunpack.c.l.bf16 %v301_v46  ;;  %v3287_v50 = vunpack.c.h.bf16 %v301_v46 }
 0x2af   : > { %v3008_v31 = vadd.f32 %v5249_v25, %v2972_v7 }
 0x2b0   : > { %vm3344_vm3 = vcmp.gt.f32.partialorder %v3312_v24, 0.0  ;;  %v3376_v20 = vmul.f32 0.1, %v3312_v24 }
 0x2b1   : > { %v3072_v10 = vmul.f32 0.1, %v3008_v31  ;;  %vm3040_vm6 = vcmp.gt.f32.partialorder %v3008_v31, 0.0 }
 0x2b2   : > { %v3408_v16 = vsel %vm3344_vm3, %v3312_v24, %v3376_v20  ;;  %v303_v20 = vld [vmem:[%s4010_s11 + $0x50] sm:$0xff]  }
 0x2b3   : > { %v3440_v12 = vpack.c.bf16 %v3408_v16, %v3408_v16  ;;  %v3220_v4 = vpop.f32.mrf.mxu0  ;;  %v3104_v36 = vsel %vm3040_vm6, %v3008_v31, %v3072_v10 }
 0x2b4   : > { %v3221_v33 = vadd.f32 %v5313_v26, %v3220_v4  ;;  %v2939_v60 = vpop.f32.mrf.mxu3 }
 0x2b5   : > { %3473 = vst.msk [vmem:[%s5323_s19 + $0x30] sm:$0xf] %vm3460_vm10, %v3440_v12  ;;  %v2973_v2 = vadd.f32 %v2939_v60, %v2675_v44 }
 0x2b6   : > { %v3313_v45 = vadd.f32 %v3281_v9, %v3221_v33  ;;  %v3288_v9 = vunpack.c.l.bf16 %v303_v20 }
 0x2b7   : > { %v3009_v32 = vadd.f32 %v5249_v25, %v2973_v2  ;;  %v3289_v2 = vunpack.c.h.bf16 %v303_v20 }
 0x2b8   : > { %vm3345_vm1 = vcmp.gt.f32.partialorder %v3313_v45, 0.0  ;;  %v3377_v51 = vmul.f32 0.1, %v3313_v45 }
 0x2b9   : > { %vm3041_vm7 = vcmp.gt.f32.partialorder %v3009_v32, 0.0  ;;  %v3073_v49 = vmul.f32 0.1, %v3009_v32 }
 0x2ba   : > { %v3409_v37 = vsel %vm3345_vm1, %v3313_v45, %v3377_v51  ;;  %v305_v51 = vld [vmem:[%s4010_s11 + $0x58] sm:$0xff]  }
 0x2bb   : > { %v3441_v41 = vpack.c.bf16 %v3409_v37, %v3409_v37  ;;  %v3105_v1 = vsel %vm3041_vm7, %v3009_v32, %v3073_v49  ;;  %v3223_v35 = vpop.f32.mrf.mxu0 }
 0x2bc   : > { %v3224_v23 = vadd.f32 %v5313_v26, %v3223_v35  ;;  %v3121_v52 = vpack.c.bf16 %v3105_v1, %v3104_v36 }
 0x2bd   : > { %3474 = vst.msk [vmem:[%s5323_s19 + $0x34] sm:$0xf] %vm3460_vm10, %v3441_v41 }
 0x2be   : > { %v3314_v25 = vadd.f32 %v3282_v15, %v3224_v23  ;;  %3859 = vmatmul.msk.bf16.gmra.mxu0 %vm3127_vm12, %v3121_v52  ;;  %v3290_v15 = vunpack.c.l.bf16 %v305_v51 }
 0x2c0   : > { %vm3346_vm15 = vcmp.gt.f32.partialorder %v3314_v25, 0.0  ;;  %v3378_v55 = vmul.f32 0.1, %v3314_v25 }
 0x2c2   : > { %v3410_v22 = vsel %vm3346_vm15, %v3314_v25, %v3378_v55  ;;  %v3291_v25 = vunpack.c.h.bf16 %v305_v51 }
 0x2c3   : > { %v3442_v19 = vpack.c.bf16 %v3410_v22, %v3410_v22  ;;  %v3225_v21 = vpop.f32.mrf.mxu0 }
 0x2c4   : > { %v3226_v27 = vadd.f32 %v5313_v26, %v3225_v21  ;;  %v307_v21 = vld [vmem:[%s4010_s11 + $0x60] sm:$0xff]  }
 0x2c5   : > { %3475 = vst.msk [vmem:[%s5323_s19 + $0x38] sm:$0xf] %vm3460_vm10, %v3442_v19  ;;  %v3292_v48 = vunpack.c.l.bf16 %v307_v21 }
 0x2c6   : > { %v3315_v0 = vadd.f32 %v3283_v40, %v3226_v27 }
 0x2c8   : > { %vm3347_vm14 = vcmp.gt.f32.partialorder %v3315_v0, 0.0  ;;  %v3379_v30 = vmul.f32 0.1, %v3315_v0 }
 0x2ca   : > { %v3411_v62 = vsel %vm3347_vm14, %v3315_v0, %v3379_v30 }
 0x2cb   : > { %v3443_v38 = vpack.c.bf16 %v3411_v62, %v3411_v62  ;;  %v3228_v42 = vpop.f32.mrf.mxu0 }
 0x2cc   : > { %v3229_v54 = vadd.f32 %v5313_v26, %v3228_v42 }
 0x2cd   : > { %3476 = vst.msk [vmem:[%s5323_s19 + $0x3c] sm:$0xf] %vm3460_vm10, %v3443_v38 }
 0x2ce   : > { %v3316_v59 = vadd.f32 %v3284_v53, %v3229_v54 }
 0x2d0   : > { %vm3348_vm12 = vcmp.gt.f32.partialorder %v3316_v59, 0.0  ;;  %v3380_v8 = vmul.f32 0.1, %v3316_v59 }
 0x2d2   : > { %v3412_v61 = vsel %vm3348_vm12, %v3316_v59, %v3380_v8  ;;  %v3293_v59 = vunpack.c.h.bf16 %v307_v21 }
 0x2d3   : > { %v3444_v56 = vpack.c.bf16 %v3412_v61, %v3412_v61  ;;  %v3230_v47 = vpop.f32.mrf.mxu0 }
 0x2d4   : > { %v3231_v18 = vadd.f32 %v5313_v26, %v3230_v47  ;;  %v309_v47 = vld [vmem:[%s4010_s11 + $0x68] sm:$0xff]  }
 0x2d5   : > { %3477 = vst.msk [vmem:[%s5323_s19 + $0x40] sm:$0xf] %vm3460_vm10, %v3444_v56  ;;  %v3294_v46 = vunpack.c.l.bf16 %v309_v47 }
 0x2d6   : > { %v3317_v14 = vadd.f32 %v3285_v43, %v3231_v18 }
 0x2d8   : > { %vm3349_vm2 = vcmp.gt.f32.partialorder %v3317_v14, 0.0  ;;  %v3381_v39 = vmul.f32 0.1, %v3317_v14 }
 0x2da   : > { %v3413_v34 = vsel %vm3349_vm2, %v3317_v14, %v3381_v39 }
 0x2db   : > { %v3445_v17 = vpack.c.bf16 %v3413_v34, %v3413_v34  ;;  %v3233_v13 = vpop.f32.mrf.mxu0 }
 0x2dc   : > { %v3234_v63 = vadd.f32 %v5313_v26, %v3233_v13 }
 0x2dd   : > { %3478 = vst.msk [vmem:[%s5323_s19 + $0x44] sm:$0xf] %vm3460_vm10, %v3445_v17 }
 0x2de   : > { %v3318_v11 = vadd.f32 %v3286_v28, %v3234_v63 }
 0x2e0   : > { %vm3350_vm4 = vcmp.gt.f32.partialorder %v3318_v11, 0.0  ;;  %v3382_v5 = vmul.f32 0.1, %v3318_v11 }
 0x2e2   : > { %v3414_v57 = vsel %vm3350_vm4, %v3318_v11, %v3382_v5  ;;  %v3295_v11 = vunpack.c.h.bf16 %v309_v47 }
 0x2e3   : > { %v3446_v3 = vpack.c.bf16 %v3414_v57, %v3414_v57  ;;  %v3235_v24 = vpop.f32.mrf.mxu0 }
 0x2e4   : > { %v3236_v7 = vadd.f32 %v5313_v26, %v3235_v24  ;;  %v311_v24 = vld [vmem:[%s4010_s11 + $0x70] sm:$0xff]  }
 0x2e5   : > { %3479 = vst.msk [vmem:[%s5323_s19 + $0x48] sm:$0xf] %vm3460_vm10, %v3446_v3  ;;  %v3296_v20 = vunpack.c.l.bf16 %v311_v24 }
 0x2e6   : > { %v3319_v58 = vadd.f32 %v3287_v50, %v3236_v7 }
 0x2e8   : > { %vm3351_vm11 = vcmp.gt.f32.partialorder %v3319_v58, 0.0  ;;  %v3383_v6 = vmul.f32 0.1, %v3319_v58 }
 0x2ea   : > { %v3415_v16 = vsel %vm3351_vm11, %v3319_v58, %v3383_v6 }
 0x2eb   : > { %v3447_v44 = vpack.c.bf16 %v3415_v16, %v3415_v16  ;;  %v3238_v12 = vpop.f32.mrf.mxu0 }
 0x2ec   : > { %v3239_v31 = vadd.f32 %v5313_v26, %v3238_v12 }
 0x2ed   : > { %3480 = vst.msk [vmem:[%s5323_s19 + $0x4c] sm:$0xf] %vm3460_vm10, %v3447_v44 }
 0x2ee   : > { %v3320_v4 = vadd.f32 %v3288_v9, %v3239_v31 }
 0x2f0   : > { %vm3352_vm5 = vcmp.gt.f32.partialorder %v3320_v4, 0.0  ;;  %v3384_v33 = vmul.f32 0.1, %v3320_v4 }
 0x2f2   : > { %v3416_v60 = vsel %vm3352_vm5, %v3320_v4, %v3384_v33  ;;  %v3297_v4 = vunpack.c.h.bf16 %v311_v24 }
 0x2f3   : > { %v3448_v45 = vpack.c.bf16 %v3416_v60, %v3416_v60  ;;  %v3240_v10 = vpop.f32.mrf.mxu0 }
 0x2f4   : > { %v3241_v32 = vadd.f32 %v5313_v26, %v3240_v10  ;;  %v313_v10 = vld [vmem:[%s4010_s11 + $0x78] sm:$0xff]  }
 0x2f5   : > { %3481 = vst.msk [vmem:[%s5323_s19 + $0x50] sm:$0xf] %vm3460_vm10, %v3448_v45  ;;  %v3298_v51 = vunpack.c.l.bf16 %v313_v10 }
 0x2f6   : > { %v3321_v29 = vadd.f32 %v3289_v2, %v3241_v32 }
 0x2f8   : > { %vm3353_vm8 = vcmp.gt.f32.partialorder %v3321_v29, 0.0  ;;  %v3385_v49 = vmul.f32 0.1, %v3321_v29 }
 0x2fa   : > { %v3417_v37 = vsel %vm3353_vm8, %v3321_v29, %v3385_v49 }
 0x2fb   : > { %v3449_v36 = vpack.c.bf16 %v3417_v37, %v3417_v37  ;;  %v3243_v41 = vpop.f32.mrf.mxu0 }
 0x2fc   : > { %v3244_v1 = vadd.f32 %v5313_v26, %v3243_v41 }
 0x2fd   : > { %3482 = vst.msk [vmem:[%s5323_s19 + $0x54] sm:$0xf] %vm3460_vm10, %v3449_v36 }
 0x2fe   : > { %v3322_v35 = vadd.f32 %v3290_v15, %v3244_v1 }
 0x300   : > { %vm3354_vm0 = vcmp.gt.f32.partialorder %v3322_v35, 0.0  ;;  %v3386_v23 = vmul.f32 0.1, %v3322_v35 }
 0x302   : > { %v3418_v52 = vsel %vm3354_vm0, %v3322_v35, %v3386_v23  ;;  %v3299_v35 = vunpack.c.h.bf16 %v313_v10 }
 0x303   : > { %v3450_v55 = vpack.c.bf16 %v3418_v52, %v3418_v52  ;;  %v3245_v22 = vpop.f32.mrf.mxu0 }
 0x304   : > { %v3246_v40 = vadd.f32 %v5313_v26, %v3245_v22 }
 0x305   : > { %3483 = vst.msk [vmem:[%s5323_s19 + $0x58] sm:$0xf] %vm3460_vm10, %v3450_v55 }
 0x306   : > { %v3323_v19 = vadd.f32 %v3291_v25, %v3246_v40 }
 0x308   : > { %vm3355_vm9 = vcmp.gt.f32.partialorder %v3323_v19, 0.0  ;;  %v3387_v27 = vmul.f32 0.1, %v3323_v19 }
 0x30a   : > { %v3419_v0 = vsel %vm3355_vm9, %v3323_v19, %v3387_v27 }
 0x30b   : > { %v3451_v30 = vpack.c.bf16 %v3419_v0, %v3419_v0  ;;  %v3248_v62 = vpop.f32.mrf.mxu0 }
 0x30c   : > { %v3249_v53 = vadd.f32 %v5313_v26, %v3248_v62 }
 0x30d   : > { %3484 = vst.msk [vmem:[%s5323_s19 + $0x5c] sm:$0xf] %vm3460_vm10, %v3451_v30 }
 0x30e   : > { %v3324_v38 = vadd.f32 %v3292_v48, %v3249_v53 }
 0x310   : > { %vm3356_vm13 = vcmp.gt.f32.partialorder %v3324_v38, 0.0  ;;  %v3388_v42 = vmul.f32 0.1, %v3324_v38 }
 0x312   : > { %v3420_v54 = vsel %vm3356_vm13, %v3324_v38, %v3388_v42 }
 0x313   : > { %v3452_v8 = vpack.c.bf16 %v3420_v54, %v3420_v54  ;;  %v3250_v61 = vpop.f32.mrf.mxu0 }
 0x314   : > { %v3251_v43 = vadd.f32 %v5313_v26, %v3250_v61 }
 0x315   : > { %3485 = vst.msk [vmem:[%s5323_s19 + $0x60] sm:$0xf] %vm3460_vm10, %v3452_v8 }
 0x316   : > { %v3325_v56 = vadd.f32 %v3293_v59, %v3251_v43 }
 0x318   : > { %vm3357_vm3 = vcmp.gt.f32.partialorder %v3325_v56, 0.0  ;;  %v3389_v18 = vmul.f32 0.1, %v3325_v56 }
 0x31a   : > { %v3421_v14 = vsel %vm3357_vm3, %v3325_v56, %v3389_v18 }
 0x31b   : > { %v3453_v39 = vpack.c.bf16 %v3421_v14, %v3421_v14  ;;  %v3253_v34 = vpop.f32.mrf.mxu0 }
 0x31c   : > { %v3254_v28 = vadd.f32 %v5313_v26, %v3253_v34 }
 0x31d   : > { %3486 = vst.msk [vmem:[%s5323_s19 + $0x64] sm:$0xf] %vm3460_vm10, %v3453_v39 }
 0x31e   : > { %v3326_v17 = vadd.f32 %v3294_v46, %v3254_v28 }
 0x320   : > { %vm3358_vm6 = vcmp.gt.f32.partialorder %v3326_v17, 0.0  ;;  %v3390_v13 = vmul.f32 0.1, %v3326_v17 }
 0x322   : > { %v3422_v63 = vsel %vm3358_vm6, %v3326_v17, %v3390_v13 }
 0x323   : > { %v3454_v5 = vpack.c.bf16 %v3422_v63, %v3422_v63  ;;  %v3255_v57 = vpop.f32.mrf.mxu0 }
 0x324   : > { %v3256_v50 = vadd.f32 %v5313_v26, %v3255_v57 }
 0x325   : > { %3487 = vst.msk [vmem:[%s5323_s19 + $0x68] sm:$0xf] %vm3460_vm10, %v3454_v5 }
 0x326   : > { %v3327_v3 = vadd.f32 %v3295_v11, %v3256_v50 }
 0x328   : > { %vm3359_vm1 = vcmp.gt.f32.partialorder %v3327_v3, 0.0  ;;  %v3391_v7 = vmul.f32 0.1, %v3327_v3 }
 0x32a   : > { %v3423_v58 = vsel %vm3359_vm1, %v3327_v3, %v3391_v7 }
 0x32b   : > { %v3455_v6 = vpack.c.bf16 %v3423_v58, %v3423_v58  ;;  %v3258_v16 = vpop.f32.mrf.mxu0 }
 0x32c   : > { %v3259_v9 = vadd.f32 %v5313_v26, %v3258_v16 }
 0x32d   : > { %3488 = vst.msk [vmem:[%s5323_s19 + $0x6c] sm:$0xf] %vm3460_vm10, %v3455_v6 }
 0x32e   : > { %v3328_v44 = vadd.f32 %v3296_v20, %v3259_v9 }
 0x330   : > { %vm3360_vm7 = vcmp.gt.f32.partialorder %v3328_v44, 0.0  ;;  %v3392_v12 = vmul.f32 0.1, %v3328_v44 }
 0x332   : > { %v3424_v31 = vsel %vm3360_vm7, %v3328_v44, %v3392_v12 }
 0x333   : > { %v3456_v33 = vpack.c.bf16 %v3424_v31, %v3424_v31  ;;  %v3260_v60 = vpop.f32.mrf.mxu0 }
 0x334   : > { %v3261_v2 = vadd.f32 %v5313_v26, %v3260_v60 }
 0x335   : > { %3489 = vst.msk [vmem:[%s5323_s19 + $0x70] sm:$0xf] %vm3460_vm10, %v3456_v33 }
 0x336   : > { %v3329_v45 = vadd.f32 %v3297_v4, %v3261_v2 }
 0x338   : > { %vm3361_vm15 = vcmp.gt.f32.partialorder %v3329_v45, 0.0  ;;  %v3393_v32 = vmul.f32 0.1, %v3329_v45 }
 0x33a   : > { %v3425_v29 = vsel %vm3361_vm15, %v3329_v45, %v3393_v32 }
 0x33b   : > { %v3457_v49 = vpack.c.bf16 %v3425_v29, %v3425_v29  ;;  %v3263_v37 = vpop.f32.mrf.mxu0 }
 0x33c   : > { %v3264_v15 = vadd.f32 %v5313_v26, %v3263_v37 }
 0x33d   : > { %3490 = vst.msk [vmem:[%s5323_s19 + $0x74] sm:$0xf] %vm3460_vm10, %v3457_v49 }
 0x33e   : > { %v3330_v36 = vadd.f32 %v3298_v51, %v3264_v15 }
 0x340   : > { %vm3362_vm14 = vcmp.gt.f32.partialorder %v3330_v36, 0.0  ;;  %v3394_v41 = vmul.f32 0.1, %v3330_v36 }
 0x342   : > { %v3426_v1 = vsel %vm3362_vm14, %v3330_v36, %v3394_v41 }
 0x343   : > { %v3458_v23 = vpack.c.bf16 %v3426_v1, %v3426_v1  ;;  %v3265_v52 = vpop.f32.mrf.mxu0 }
 0x344   : > { %v3266_v25 = vadd.f32 %v5313_v26, %v3265_v52 }
 0x345   : > { %3491 = vst.msk [vmem:[%s5323_s19 + $0x78] sm:$0xf] %vm3460_vm10, %v3458_v23 }
 0x346   : > { %v3331_v55 = vadd.f32 %v3299_v35, %v3266_v25 }
 0x348   : > { %vm3363_vm12 = vcmp.gt.f32.partialorder %v3331_v55, 0.0  ;;  %v3395_v22 = vmul.f32 0.1, %v3331_v55 }
 0x34a   : > { %v3427_v40 = vsel %vm3363_vm12, %v3331_v55, %v3395_v22 }
 0x34b   : > { %v3459_v19 = vpack.c.bf16 %v3427_v40, %v3427_v40 }
 0x34d   : > { %3492 = vst.msk [vmem:[%s5323_s19 + $0x7c] sm:$0xf] %vm3460_vm10, %v3459_v19 }
 0x34e PF: > { %s17_s24 = sadd.s32 1, %s3943_s24  }
 0x34f   : > { %p14_p4 = scmp.ge.s32.totalorder %s17_s24, 4  }
 0x351   :  { %16 = sbr.rel (!%p14_p4) target bundleno = 1 (0x1), region = 80 }

</bundles_post_ra>
